<compile_context>
chip_gen: v7x
topology: tpu7x:2x2x1
jax: 0.10.0
libtpu: 0.0.40
codegen_flags: <defaults>
</compile_context>

<pallas_src>
import functools
import math

import jax
import jax.numpy as jnp
import numpy as np
from jax.experimental import pallas as pl
from jax.experimental.pallas import tpu as pltpu


# ----------------------------- helpers -------------------------------------

def _round_up(x, m):
    return ((x + m - 1) // m) * m


def _pad_k(k):
    """Padded reduction size: lane/MXU aligned, 512-aligned when tiled."""
    if k <= 512:
        return _round_up(k, 128)
    return _round_up(k, 512)


# ----------------------------- Pallas kernels ------------------------------

def _matmul_bias_kernel(a_ref, w_ref, b_ref, o_ref, *, relu):
    """(M,tk)bf16 @ (tk,N)bf16 accumulated into the resident f32 output block;
    bias + optional ReLU applied on the last K step."""
    k = pl.program_id(0)

    @pl.when(k == 0)
    def _():
        o_ref[...] = jnp.zeros_like(o_ref)

    o_ref[...] += jnp.dot(a_ref[...], w_ref[...],
                          preferred_element_type=jnp.float32)

    @pl.when(k == pl.num_programs(0) - 1)
    def _():
        out = o_ref[...] + b_ref[...]
        if relu:
            out = jnp.maximum(out, 0.0)
        o_ref[...] = out


def matmul_bias(a_bf16, w_bf16, bias_f32, *, relu):
    """(M,Kp)bf16 @ (Kp,N)bf16 + bias (f32), optional ReLU. Kp pre-padded."""
    M, Kp = a_bf16.shape
    Kp_w, N = w_bf16.shape
    assert Kp == Kp_w and Kp % 128 == 0
    tk = min(Kp, 512)
    assert Kp % tk == 0
    kernel = functools.partial(_matmul_bias_kernel, relu=relu)
    return pl.pallas_call(
        kernel,
        out_shape=jax.ShapeDtypeStruct((M, N), jnp.float32),
        grid_spec=pltpu.PrefetchScalarGridSpec(
            num_scalar_prefetch=0,
            grid=(Kp // tk,),
            in_specs=[
                pl.BlockSpec((M, tk), lambda k: (0, k)),
                pl.BlockSpec((tk, N), lambda k: (k, 0)),
                pl.BlockSpec((1, N), lambda k: (0, 0)),
            ],
            out_specs=pl.BlockSpec((M, N), lambda k: (0, 0)),
        ),
        compiler_params=pltpu.CompilerParams(
            dimension_semantics=("arbitrary",)),
    )(a_bf16, w_bf16, bias_f32)


def _tail_kernel(cols_ref, w4_ref, b4_ref, w1_ref, b1_ref, w2_ref, b2_ref,
                 o_ref, acc_ref, *, batch):
    """Fused conv4 (K-tiled) -> ReLU -> MaxPool3d(2,2) -> fc1+ReLU -> fc2."""
    k = pl.program_id(0)

    @pl.when(k == 0)
    def _():
        acc_ref[...] = jnp.zeros_like(acc_ref)

    acc_ref[...] += jnp.dot(cols_ref[...], w4_ref[...],
                            preferred_element_type=jnp.float32)

    @pl.when(k == pl.num_programs(0) - 1)
    def _():
        # conv4 epilogue: bias + ReLU on the resident f32 accumulator.
        h = jnp.maximum(acc_ref[...] + b4_ref[...], 0.0)          # (B*8, 512)
        # MaxPool3d(2,2) on a 2x2x2 spatial grid == max over the 8 rows
        # belonging to each batch element (rows are batch-contiguous).
        h = jnp.max(h.reshape(batch, 8, h.shape[-1]), axis=1)     # (B, 512)
        # fc1 + ReLU
        h = jnp.dot(h.astype(jnp.bfloat16), w1_ref[...],
                    preferred_element_type=jnp.float32) + b1_ref[...]
        h = jnp.maximum(h, 0.0)                                   # (B, hidden)
        # fc2 (N padded to 128 lanes; sliced outside)
        out = jnp.dot(h.astype(jnp.bfloat16), w2_ref[...],
                      preferred_element_type=jnp.float32) + b2_ref[...]
        o_ref[...] = out                                          # (B, 128)


def tail_forward(pp, h3, action_dim):
    """h3: conv3 output (B, 2, 2, 2, 256), f32.  Returns (B, action_dim)."""
    B = h3.shape[0]
    cols = im2col_3d(h3).astype(jnp.bfloat16)            # (B*8, 27*256)
    Kp = pp["conv4_w"].shape[0]
    K = cols.shape[1]
    if Kp != K:
        cols = jnp.pad(cols, ((0, 0), (0, Kp - K)))
    tk = min(Kp, 512)
    M = cols.shape[0]                                    # B*8
    N4 = pp["conv4_w"].shape[1]                          # 512
    Nh = pp["fc1_w"].shape[1]                            # hidden (128)
    No = pp["fc2_w"].shape[1]                            # 128 (padded)
    out = pl.pallas_call(
        functools.partial(_tail_kernel, batch=B),
        out_shape=jax.ShapeDtypeStruct((B, No), jnp.float32),
        grid_spec=pltpu.PrefetchScalarGridSpec(
            num_scalar_prefetch=0,
            grid=(Kp // tk,),
            in_specs=[
                pl.BlockSpec((M, tk), lambda k: (0, k)),
                pl.BlockSpec((tk, N4), lambda k: (k, 0)),
                pl.BlockSpec((1, N4), lambda k: (0, 0)),
                pl.BlockSpec((pp["fc1_w"].shape[0], Nh), lambda k: (0, 0)),
                pl.BlockSpec((1, Nh), lambda k: (0, 0)),
                pl.BlockSpec((Nh, No), lambda k: (0, 0)),
                pl.BlockSpec((1, No), lambda k: (0, 0)),
            ],
            out_specs=pl.BlockSpec((B, No), lambda k: (0, 0)),
            scratch_shapes=[pltpu.VMEM((M, N4), jnp.float32)],
        ),
        compiler_params=pltpu.CompilerParams(
            dimension_semantics=("arbitrary",)),
    )(cols, pp["conv4_w"], pp["conv4_b"], pp["fc1_w"], pp["fc1_b"],
      pp["fc2_w"], pp["fc2_b"])
    return out[:, :action_dim]


# ------------------------------- JAX glue ----------------------------------

def im2col_3d(x):
    """x: (B, D, H, W, Cin) -> (B*D*H*W, 27*Cin) for k=3, stride=1, pad=1."""
    B, D, H, W, C = x.shape
    xp = jnp.pad(x, ((0, 0), (1, 1), (1, 1), (1, 1), (0, 0)))
    patches = []
    for kd in range(3):
        for kh in range(3):
            for kw in range(3):
                patches.append(xp[:, kd:kd + D, kh:kh + H, kw:kw + W, :])
    p = jnp.stack(patches, axis=-2)          # (B, D, H, W, 27, Cin)
    return p.reshape(B * D * H * W, 27 * C)


def conv3d_relu(x, w_bf16, b_f32):
    """Conv3d(k=3,s=1,p=1)+ReLU as im2col + Pallas MXU matmul (bf16 in/f32 acc)."""
    B, D, H, W, _ = x.shape
    cols = im2col_3d(x).astype(jnp.bfloat16)
    Kp = w_bf16.shape[0]
    K = cols.shape[1]
    if Kp != K:
        cols = jnp.pad(cols, ((0, 0), (0, Kp - K)))
    out = matmul_bias(cols, w_bf16, b_f32, relu=True)
    return out.reshape(B, D, H, W, w_bf16.shape[1])


def maxpool3d_2x2x2(x):
    """MaxPool3d(2,2) in plain XLA (tiny tensor; not worth a pallas_call)."""
    B, D, H, W, C = x.shape
    xr = x.reshape(B, D // 2, 2, H // 2, 2, W // 2, 2, C)
    return xr.max(axis=(2, 4, 6))


# ------------------------- parameters & forward -----------------------------

def init_params(key, action_dim=7, hidden_dim=128):
    ks = jax.random.split(key, 12)

    def lin(kw, kb, fan_in, fan_out):
        bound = 1.0 / np.sqrt(fan_in)
        w = jax.random.uniform(kw, (fan_in, fan_out), jnp.float32, -bound, bound)
        b = jax.random.uniform(kb, (fan_out,), jnp.float32, -bound, bound)
        return w, b

    p = {}
    # Conv weights stored as (27*Cin, Cout); row index = ((kd*3+kh)*3+kw)*Cin + ci,
    # i.e. torch's (Cout, Cin, 3, 3, 3) weight transposed to (kd, kh, kw, ci, co).
    p["conv1_w"], p["conv1_b"] = lin(ks[0], ks[1], 27 * 3, 64)
    p["conv2_w"], p["conv2_b"] = lin(ks[2], ks[3], 27 * 64, 128)
    p["conv3_w"], p["conv3_b"] = lin(ks[4], ks[5], 27 * 128, 256)
    p["conv4_w"], p["conv4_b"] = lin(ks[6], ks[7], 27 * 256, 512)
    p["fc1_w"], p["fc1_b"] = lin(ks[8], ks[9], 512, hidden_dim)
    p["fc2_w"], p["fc2_b"] = lin(ks[10], ks[11], hidden_dim, action_dim)
    return p


def prepare_params(params):
    """One-time kernel-side prep: pad K to MXU-friendly multiples, pad fc2's N
    to 128 lanes, cast weights to bf16, reshape biases to (1,N) f32."""
    pp = {}
    for name in ("conv1", "conv2", "conv3", "conv4"):
        w = params[name + "_w"]
        b = params[name + "_b"]
        K, N = w.shape
        Kp = _pad_k(K)
        if Kp != K:
            w = jnp.pad(w, ((0, Kp - K), (0, 0)))
        pp[name + "_w"] = w.astype(jnp.bfloat16)
        pp[name + "_b"] = b.reshape(1, N).astype(jnp.float32)

    pp["fc1_w"] = params["fc1_w"].astype(jnp.bfloat16)           # (512, hidden)
    pp["fc1_b"] = params["fc1_b"].reshape(1, -1).astype(jnp.float32)

    w2, b2 = params["fc2_w"], params["fc2_b"]
    No = _round_up(max(w2.shape[1], 128), 128)                   # lane-dense out
    pp["fc2_w"] = jnp.pad(w2, ((0, 0), (0, No - w2.shape[1]))).astype(jnp.bfloat16)
    pp["fc2_b"] = jnp.pad(b2, (0, No - b2.shape[0])).reshape(1, No).astype(jnp.float32)
    return pp


def policy_forward(pp, x, *, action_dim=7):
    h = conv3d_relu(x, pp["conv1_w"], pp["conv1_b"])
    h = conv3d_relu(h, pp["conv2_w"], pp["conv2_b"])
    h = maxpool3d_2x2x2(h)                       # (B,2,2,2,128), XLA
    h = conv3d_relu(h, pp["conv3_w"], pp["conv3_b"])
    # Fused conv4 -> ReLU -> MaxPool3d -> fc1 -> ReLU -> fc2 in one pallas_call.
    return tail_forward(pp, h, action_dim)


def policy_forward_ref(params, x):
    """Pure-jnp f32 reference with identical math (for correctness check)."""
    def conv_ref(x, w, b):
        B, D, H, W, _ = x.shape
        out = jnp.maximum(im2col_3d(x) @ w + b, 0.0)
        return out.reshape(B, D, H, W, w.shape[1])

    def pool_ref(x):
        B, D, H, W, C = x.shape
        xr = x.reshape(B, D // 2, 2, H // 2, 2, W // 2, 2, C)
        return xr.max(axis=(2, 4, 6))

    B = x.shape[0]
    h = conv_ref(x, params["conv1_w"], params["conv1_b"])
    h = conv_ref(h, params["conv2_w"], params["conv2_b"])
    h = pool_ref(h)
    h = conv_ref(h, params["conv3_w"], params["conv3_b"])
    h = conv_ref(h, params["conv4_w"], params["conv4_b"])
    h = pool_ref(h)
    h = h.reshape(B, -1)
    h = jnp.maximum(h @ params["fc1_w"] + params["fc1_b"], 0.0)
    return h @ params["fc2_w"] + params["fc2_b"]


if __name__ == "__main__":
    key = jax.random.PRNGKey(0)
    k_in, k_par = jax.random.split(key)
    # Linear(512, hidden) after two 2x2x2 pools implies a 4x4x4 spatial input.
    x = jax.random.uniform(k_in, (2, 4, 4, 4, 3), jnp.float32)
    raw_params = init_params(k_par, action_dim=7, hidden_dim=128)
    pp = prepare_params(raw_params)              # pad/cast weights once

    fwd = jax.jit(functools.partial(policy_forward, action_dim=7))
    logits = jax.block_until_ready(fwd(pp, x))
    ref = jax.block_until_ready(policy_forward_ref(raw_params, x))

    assert logits.shape == (2, 7), logits.shape
    assert bool(jnp.all(jnp.isfinite(logits)))
    # bf16 streamed operands with f32 accumulation: allow ~2e-2 tolerance.
    assert bool(jnp.allclose(logits, ref, rtol=2e-2, atol=2e-2)), (logits, ref)
    print("KERNEL_OK")
</pallas_src>

<mosaic_0001>
module attributes {stable_mosaic.version = 11 : i64} {
  func.func @_matmul_bias_kernel(%arg0: i32, %arg1: memref<128x128xbf16, #tpu.memory_space<vmem>>, %arg2: memref<128x64xbf16, #tpu.memory_space<vmem>>, %arg3: memref<1x64xf32, #tpu.memory_space<vmem>>, %arg4: memref<128x64xf32, #tpu.memory_space<vmem>>) attributes {dimension_semantics = [#tpu.dimension_semantics<arbitrary>], iteration_bounds = array<i64: 1>, scalar_prefetch = 0 : i64, scratch_operands = 0 : i64, tpu.core_type = #tpu.core_type<tc>, window_params = [{transform_indices = @transform_0, window_bounds = array<i64: 128, 128>}, {transform_indices = @transform_1, window_bounds = array<i64: 128, 64>}, {pipeline_mode = #tpu.pipeline_mode<synchronous>, transform_indices = @transform_2, window_bounds = array<i64: 1, 64>}, {pipeline_mode = #tpu.pipeline_mode<synchronous>, transform_indices = @transform_3, window_bounds = array<i64: 128, 64>}]} {
    %c0_i32 = arith.constant 0 : i32
    %0 = arith.cmpi eq, %arg0, %c0_i32 : i32
    %1 = arith.extui %0 : i1 to i32
    %c0_i32_0 = arith.constant 0 : i32
    %2 = arith.cmpi ne, %1, %c0_i32_0 : i32
    scf.if %2 {
      %cst_10 = arith.constant 0.000000e+00 : f32
      %12 = vector.broadcast %cst_10 : f32 to vector<128x64xf32>
      %c0_11 = arith.constant 0 : index
      %c0_12 = arith.constant 0 : index
      %13 = vector.load %arg4[%c0_11, %c0_12] : memref<128x64xf32, #tpu.memory_space<vmem>>, vector<128x64xf32>
      tpu.vector_store %arg4[%c0_11, %c0_12], %12 {strides = array<i32>} : memref<128x64xf32, #tpu.memory_space<vmem>>, vector<128x64xf32>,
    } else {
    }
    %c0 = arith.constant 0 : index
    %c0_1 = arith.constant 0 : index
    %3 = vector.load %arg4[%c0, %c0_1] : memref<128x64xf32, #tpu.memory_space<vmem>>, vector<128x64xf32>
    %c0_2 = arith.constant 0 : index
    %c0_3 = arith.constant 0 : index
    %4 = vector.load %arg1[%c0_2, %c0_3] : memref<128x128xbf16, #tpu.memory_space<vmem>>, vector<128x128xbf16>
    %c0_4 = arith.constant 0 : index
    %c0_5 = arith.constant 0 : index
    %5 = vector.load %arg2[%c0_4, %c0_5] : memref<128x64xbf16, #tpu.memory_space<vmem>>, vector<128x64xbf16>
    %cst = arith.constant dense<0.000000e+00> : vector<128x64xf32>
    %6 = tpu.matmul %4, %5, %cst {dimension_numbers = #tpu.dot_dimension_numbers<[1], [0], [0], [1], [0, 0, 1, 1], [], []>} : vector<128x128xbf16>, vector<128x64xbf16>, vector<128x64xf32> -> vector<128x64xf32>
    %7 = arith.addf %3, %6 : vector<128x64xf32>
    %c0_6 = arith.constant 0 : index
    %c0_7 = arith.constant 0 : index
    %8 = vector.load %arg4[%c0_6, %c0_7] : memref<128x64xf32, #tpu.memory_space<vmem>>, vector<128x64xf32>
    tpu.vector_store %arg4[%c0_6, %c0_7], %7 {strides = array<i32>} : memref<128x64xf32, #tpu.memory_space<vmem>>, vector<128x64xf32>,
    %c0_i32_8 = arith.constant 0 : i32
    %9 = arith.cmpi eq, %arg0, %c0_i32_8 : i32
    %10 = arith.extui %9 : i1 to i32
    %c0_i32_9 = arith.constant 0 : i32
    %11 = arith.cmpi ne, %10, %c0_i32_9 : i32
    scf.if %11 {
      %c0_10 = arith.constant 0 : index
      %c0_11 = arith.constant 0 : index
      %12 = vector.load %arg4[%c0_10, %c0_11] : memref<128x64xf32, #tpu.memory_space<vmem>>, vector<128x64xf32>
      %c0_12 = arith.constant 0 : index
      %c0_13 = arith.constant 0 : index
      %13 = vector.load %arg3[%c0_12, %c0_13] : memref<1x64xf32, #tpu.memory_space<vmem>>, vector<1x64xf32>
      %14 = vector.broadcast %13 : vector<1x64xf32> to vector<128x64xf32>
      %15 = arith.addf %12, %14 : vector<128x64xf32>
      %cst_14 = arith.constant 0.000000e+00 : f32
      %16 = vector.broadcast %cst_14 : f32 to vector<128x64xf32>
      %17 = arith.maximumf %15, %16 : vector<128x64xf32>
      %c0_15 = arith.constant 0 : index
      %c0_16 = arith.constant 0 : index
      %18 = vector.load %arg4[%c0_15, %c0_16] : memref<128x64xf32, #tpu.memory_space<vmem>>, vector<128x64xf32>
      tpu.vector_store %arg4[%c0_15, %c0_16], %17 {strides = array<i32>} : memref<128x64xf32, #tpu.memory_space<vmem>>, vector<128x64xf32>,
    } else {
    }
    return
  }
  func.func @transform_0(%arg0: i32) -> (i32, i32) {
    %c0_i32 = arith.constant 0 : i32
    %c0_i32_0 = arith.constant 0 : i32
    return %c0_i32, %arg0 : i32, i32
  }
  func.func @transform_1(%arg0: i32) -> (i32, i32) {
    %c0_i32 = arith.constant 0 : i32
    %c0_i32_0 = arith.constant 0 : i32
    return %arg0, %c0_i32 : i32, i32
  }
  func.func @transform_2(%arg0: i32) -> (i32, i32) {
    %c0_i32 = arith.constant 0 : i32
    %c0_i32_0 = arith.constant 0 : i32
    %c0_i32_1 = arith.constant 0 : i32
    return %c0_i32, %c0_i32_0 : i32, i32
  }
  func.func @transform_3(%arg0: i32) -> (i32, i32) {
    %c0_i32 = arith.constant 0 : i32
    %c0_i32_0 = arith.constant 0 : i32
    %c0_i32_1 = arith.constant 0 : i32
    return %c0_i32, %c0_i32_0 : i32, i32
  }
}

module attributes {stable_mosaic.version = 11 : i64} {
  func.func @_matmul_bias_kernel(%arg0: i32, %arg1: memref<128x512xbf16, #tpu.memory_space<vmem>>, %arg2: memref<512x128xbf16, #tpu.memory_space<vmem>>, %arg3: memref<1x128xf32, #tpu.memory_space<vmem>>, %arg4: memref<128x128xf32, #tpu.memory_space<vmem>>) attributes {dimension_semantics = [#tpu.dimension_semantics<arbitrary>], iteration_bounds = array<i64: 4>, scalar_prefetch = 0 : i64, scratch_operands = 0 : i64, tpu.core_type = #tpu.core_type<tc>, window_params = [{transform_indices = @transform_0, window_bounds = array<i64: 128, 512>}, {transform_indices = @transform_1, window_bounds = array<i64: 512, 128>}, {pipeline_mode = #tpu.pipeline_mode<synchronous>, transform_indices = @transform_2, window_bounds = array<i64: 1, 128>}, {pipeline_mode = #tpu.pipeline_mode<synchronous>, transform_indices = @transform_3, window_bounds = array<i64: 128, 128>}]} {
    %c0_i32 = arith.constant 0 : i32
    %0 = arith.cmpi eq, %arg0, %c0_i32 : i32
    %1 = arith.extui %0 : i1 to i32
    %c0_i32_0 = arith.constant 0 : i32
    %2 = arith.cmpi ne, %1, %c0_i32_0 : i32
    scf.if %2 {
      %cst_9 = arith.constant 0.000000e+00 : f32
      %12 = vector.broadcast %cst_9 : f32 to vector<128x128xf32>
      %c0_10 = arith.constant 0 : index
      %c0_11 = arith.constant 0 : index
      %13 = vector.load %arg4[%c0_10, %c0_11] : memref<128x128xf32, #tpu.memory_space<vmem>>, vector<128x128xf32>
      tpu.vector_store %arg4[%c0_10, %c0_11], %12 {strides = array<i32>} : memref<128x128xf32, #tpu.memory_space<vmem>>, vector<128x128xf32>,
    } else {
    }
    %c0 = arith.constant 0 : index
    %c0_1 = arith.constant 0 : index
    %3 = vector.load %arg4[%c0, %c0_1] : memref<128x128xf32, #tpu.memory_space<vmem>>, vector<128x128xf32>
    %c0_2 = arith.constant 0 : index
    %c0_3 = arith.constant 0 : index
    %4 = vector.load %arg1[%c0_2, %c0_3] : memref<128x512xbf16, #tpu.memory_space<vmem>>, vector<128x512xbf16>
    %c0_4 = arith.constant 0 : index
    %c0_5 = arith.constant 0 : index
    %5 = vector.load %arg2[%c0_4, %c0_5] : memref<512x128xbf16, #tpu.memory_space<vmem>>, vector<512x128xbf16>
    %cst = arith.constant dense<0.000000e+00> : vector<128x128xf32>
    %6 = tpu.matmul %4, %5, %cst {dimension_numbers = #tpu.dot_dimension_numbers<[1], [0], [0], [1], [0, 0, 1, 1], [], []>} : vector<128x512xbf16>, vector<512x128xbf16>, vector<128x128xf32> -> vector<128x128xf32>
    %7 = arith.addf %3, %6 : vector<128x128xf32>
    %c0_6 = arith.constant 0 : index
    %c0_7 = arith.constant 0 : index
    %8 = vector.load %arg4[%c0_6, %c0_7] : memref<128x128xf32, #tpu.memory_space<vmem>>, vector<128x128xf32>
    tpu.vector_store %arg4[%c0_6, %c0_7], %7 {strides = array<i32>} : memref<128x128xf32, #tpu.memory_space<vmem>>, vector<128x128xf32>,
    %c3_i32 = arith.constant 3 : i32
    %9 = arith.cmpi eq, %arg0, %c3_i32 : i32
    %10 = arith.extui %9 : i1 to i32
    %c0_i32_8 = arith.constant 0 : i32
    %11 = arith.cmpi ne, %10, %c0_i32_8 : i32
    scf.if %11 {
      %c0_9 = arith.constant 0 : index
      %c0_10 = arith.constant 0 : index
      %12 = vector.load %arg4[%c0_9, %c0_10] : memref<128x128xf32, #tpu.memory_space<vmem>>, vector<128x128xf32>
      %c0_11 = arith.constant 0 : index
      %c0_12 = arith.constant 0 : index
      %13 = vector.load %arg3[%c0_11, %c0_12] : memref<1x128xf32, #tpu.memory_space<vmem>>, vector<1x128xf32>
      %14 = vector.broadcast %13 : vector<1x128xf32> to vector<128x128xf32>
      %15 = arith.addf %12, %14 : vector<128x128xf32>
      %cst_13 = arith.constant 0.000000e+00 : f32
      %16 = vector.broadcast %cst_13 : f32 to vector<128x128xf32>
      %17 = arith.maximumf %15, %16 : vector<128x128xf32>
      %c0_14 = arith.constant 0 : index
      %c0_15 = arith.constant 0 : index
      %18 = vector.load %arg4[%c0_14, %c0_15] : memref<128x128xf32, #tpu.memory_space<vmem>>, vector<128x128xf32>
      tpu.vector_store %arg4[%c0_14, %c0_15], %17 {strides = array<i32>} : memref<128x128xf32, #tpu.memory_space<vmem>>, vector<128x128xf32>,
    } else {
    }
    return
  }
  func.func @transform_0(%arg0: i32) -> (i32, i32) {
    %c0_i32 = arith.constant 0 : i32
    %c0_i32_0 = arith.constant 0 : i32
    return %c0_i32, %arg0 : i32, i32
  }
  func.func @transform_1(%arg0: i32) -> (i32, i32) {
    %c0_i32 = arith.constant 0 : i32
    %c0_i32_0 = arith.constant 0 : i32
    return %arg0, %c0_i32 : i32, i32
  }
  func.func @transform_2(%arg0: i32) -> (i32, i32) {
    %c0_i32 = arith.constant 0 : i32
    %c0_i32_0 = arith.constant 0 : i32
    %c0_i32_1 = arith.constant 0 : i32
    return %c0_i32, %c0_i32_0 : i32, i32
  }
  func.func @transform_3(%arg0: i32) -> (i32, i32) {
    %c0_i32 = arith.constant 0 : i32
    %c0_i32_0 = arith.constant 0 : i32
    %c0_i32_1 = arith.constant 0 : i32
    return %c0_i32, %c0_i32_0 : i32, i32
  }
}

module attributes {stable_mosaic.version = 11 : i64} {
  func.func @_matmul_bias_kernel(%arg0: i32, %arg1: memref<16x512xbf16, #tpu.memory_space<vmem>>, %arg2: memref<512x256xbf16, #tpu.memory_space<vmem>>, %arg3: memref<1x256xf32, #tpu.memory_space<vmem>>, %arg4: memref<16x256xf32, #tpu.memory_space<vmem>>) attributes {dimension_semantics = [#tpu.dimension_semantics<arbitrary>], iteration_bounds = array<i64: 7>, scalar_prefetch = 0 : i64, scratch_operands = 0 : i64, tpu.core_type = #tpu.core_type<tc>, window_params = [{transform_indices = @transform_0, window_bounds = array<i64: 16, 512>}, {transform_indices = @transform_1, window_bounds = array<i64: 512, 256>}, {pipeline_mode = #tpu.pipeline_mode<synchronous>, transform_indices = @transform_2, window_bounds = array<i64: 1, 256>}, {pipeline_mode = #tpu.pipeline_mode<synchronous>, transform_indices = @transform_3, window_bounds = array<i64: 16, 256>}]} {
    %c0_i32 = arith.constant 0 : i32
    %0 = arith.cmpi eq, %arg0, %c0_i32 : i32
    %1 = arith.extui %0 : i1 to i32
    %c0_i32_0 = arith.constant 0 : i32
    %2 = arith.cmpi ne, %1, %c0_i32_0 : i32
    scf.if %2 {
      %cst_9 = arith.constant 0.000000e+00 : f32
      %12 = vector.broadcast %cst_9 : f32 to vector<16x256xf32>
      %c0_10 = arith.constant 0 : index
      %c0_11 = arith.constant 0 : index
      %13 = vector.load %arg4[%c0_10, %c0_11] : memref<16x256xf32, #tpu.memory_space<vmem>>, vector<16x256xf32>
      tpu.vector_store %arg4[%c0_10, %c0_11], %12 {strides = array<i32>} : memref<16x256xf32, #tpu.memory_space<vmem>>, vector<16x256xf32>,
    } else {
    }
    %c0 = arith.constant 0 : index
    %c0_1 = arith.constant 0 : index
    %3 = vector.load %arg4[%c0, %c0_1] : memref<16x256xf32, #tpu.memory_space<vmem>>, vector<16x256xf32>
    %c0_2 = arith.constant 0 : index
    %c0_3 = arith.constant 0 : index
    %4 = vector.load %arg1[%c0_2, %c0_3] : memref<16x512xbf16, #tpu.memory_space<vmem>>, vector<16x512xbf16>
    %c0_4 = arith.constant 0 : index
    %c0_5 = arith.constant 0 : index
    %5 = vector.load %arg2[%c0_4, %c0_5] : memref<512x256xbf16, #tpu.memory_space<vmem>>, vector<512x256xbf16>
    %cst = arith.constant dense<0.000000e+00> : vector<16x256xf32>
    %6 = tpu.matmul %4, %5, %cst {dimension_numbers = #tpu.dot_dimension_numbers<[1], [0], [0], [1], [0, 0, 1, 1], [], []>} : vector<16x512xbf16>, vector<512x256xbf16>, vector<16x256xf32> -> vector<16x256xf32>
    %7 = arith.addf %3, %6 : vector<16x256xf32>
    %c0_6 = arith.constant 0 : index
    %c0_7 = arith.constant 0 : index
    %8 = vector.load %arg4[%c0_6, %c0_7] : memref<16x256xf32, #tpu.memory_space<vmem>>, vector<16x256xf32>
    tpu.vector_store %arg4[%c0_6, %c0_7], %7 {strides = array<i32>} : memref<16x256xf32, #tpu.memory_space<vmem>>, vector<16x256xf32>,
    %c6_i32 = arith.constant 6 : i32
    %9 = arith.cmpi eq, %arg0, %c6_i32 : i32
    %10 = arith.extui %9 : i1 to i32
    %c0_i32_8 = arith.constant 0 : i32
    %11 = arith.cmpi ne, %10, %c0_i32_8 : i32
    scf.if %11 {
      %c0_9 = arith.constant 0 : index
      %c0_10 = arith.constant 0 : index
      %12 = vector.load %arg4[%c0_9, %c0_10] : memref<16x256xf32, #tpu.memory_space<vmem>>, vector<16x256xf32>
      %c0_11 = arith.constant 0 : index
      %c0_12 = arith.constant 0 : index
      %13 = vector.load %arg3[%c0_11, %c0_12] : memref<1x256xf32, #tpu.memory_space<vmem>>, vector<1x256xf32>
      %14 = vector.broadcast %13 : vector<1x256xf32> to vector<16x256xf32>
      %15 = arith.addf %12, %14 : vector<16x256xf32>
      %cst_13 = arith.constant 0.000000e+00 : f32
      %16 = vector.broadcast %cst_13 : f32 to vector<16x256xf32>
      %17 = arith.maximumf %15, %16 : vector<16x256xf32>
      %c0_14 = arith.constant 0 : index
      %c0_15 = arith.constant 0 : index
      %18 = vector.load %arg4[%c0_14, %c0_15] : memref<16x256xf32, #tpu.memory_space<vmem>>, vector<16x256xf32>
      tpu.vector_store %arg4[%c0_14, %c0_15], %17 {strides = array<i32>} : memref<16x256xf32, #tpu.memory_space<vmem>>, vector<16x256xf32>,
    } else {
    }
    return
  }
  func.func @transform_0(%arg0: i32) -> (i32, i32) {
    %c0_i32 = arith.constant 0 : i32
    %c0_i32_0 = arith.constant 0 : i32
    return %c0_i32, %arg0 : i32, i32
  }
  func.func @transform_1(%arg0: i32) -> (i32, i32) {
    %c0_i32 = arith.constant 0 : i32
    %c0_i32_0 = arith.constant 0 : i32
    return %arg0, %c0_i32 : i32, i32
  }
  func.func @transform_2(%arg0: i32) -> (i32, i32) {
    %c0_i32 = arith.constant 0 : i32
    %c0_i32_0 = arith.constant 0 : i32
    %c0_i32_1 = arith.constant 0 : i32
    return %c0_i32, %c0_i32_0 : i32, i32
  }
  func.func @transform_3(%arg0: i32) -> (i32, i32) {
    %c0_i32 = arith.constant 0 : i32
    %c0_i32_0 = arith.constant 0 : i32
    %c0_i32_1 = arith.constant 0 : i32
    return %c0_i32, %c0_i32_0 : i32, i32
  }
}

module attributes {stable_mosaic.version = 11 : i64} {
  func.func @_tail_kernel(%arg0: i32, %arg1: memref<16x512xbf16, #tpu.memory_space<vmem>>, %arg2: memref<512x512xbf16, #tpu.memory_space<vmem>>, %arg3: memref<1x512xf32, #tpu.memory_space<vmem>>, %arg4: memref<512x128xbf16, #tpu.memory_space<vmem>>, %arg5: memref<1x128xf32, #tpu.memory_space<vmem>>, %arg6: memref<128x128xbf16, #tpu.memory_space<vmem>>, %arg7: memref<1x128xf32, #tpu.memory_space<vmem>>, %arg8: memref<2x128xf32, #tpu.memory_space<vmem>>, %arg9: memref<16x512xf32, #tpu.memory_space<vmem>>) attributes {dimension_semantics = [#tpu.dimension_semantics<arbitrary>], iteration_bounds = array<i64: 14>, scalar_prefetch = 0 : i64, scratch_operands = 1 : i64, tpu.core_type = #tpu.core_type<tc>, window_params = [{transform_indices = @transform_0, window_bounds = array<i64: 16, 512>}, {transform_indices = @transform_1, window_bounds = array<i64: 512, 512>}, {pipeline_mode = #tpu.pipeline_mode<synchronous>, transform_indices = @transform_2, window_bounds = array<i64: 1, 512>}, {pipeline_mode = #tpu.pipeline_mode<synchronous>, transform_indices = @transform_3, window_bounds = array<i64: 512, 128>}, {pipeline_mode = #tpu.pipeline_mode<synchronous>, transform_indices = @transform_4, window_bounds = array<i64: 1, 128>}, {pipeline_mode = #tpu.pipeline_mode<synchronous>, transform_indices = @transform_5, window_bounds = array<i64: 128, 128>}, {pipeline_mode = #tpu.pipeline_mode<synchronous>, transform_indices = @transform_6, window_bounds = array<i64: 1, 128>}, {pipeline_mode = #tpu.pipeline_mode<synchronous>, transform_indices = @transform_7, window_bounds = array<i64: 2, 128>}]} {
    %c0_i32 = arith.constant 0 : i32
    %0 = arith.cmpi eq, %arg0, %c0_i32 : i32
    %1 = arith.extui %0 : i1 to i32
    %c0_i32_0 = arith.constant 0 : i32
    %2 = arith.cmpi ne, %1, %c0_i32_0 : i32
    scf.if %2 {
      %cst_9 = arith.constant 0.000000e+00 : f32
      %12 = vector.broadcast %cst_9 : f32 to vector<16x512xf32>
      %c0_10 = arith.constant 0 : index
      %c0_11 = arith.constant 0 : index
      %13 = vector.load %arg9[%c0_10, %c0_11] : memref<16x512xf32, #tpu.memory_space<vmem>>, vector<16x512xf32>
      tpu.vector_store %arg9[%c0_10, %c0_11], %12 {strides = array<i32>} : memref<16x512xf32, #tpu.memory_space<vmem>>, vector<16x512xf32>,
    } else {
    }
    %c0 = arith.constant 0 : index
    %c0_1 = arith.constant 0 : index
    %3 = vector.load %arg9[%c0, %c0_1] : memref<16x512xf32, #tpu.memory_space<vmem>>, vector<16x512xf32>
    %c0_2 = arith.constant 0 : index
    %c0_3 = arith.constant 0 : index
    %4 = vector.load %arg1[%c0_2, %c0_3] : memref<16x512xbf16, #tpu.memory_space<vmem>>, vector<16x512xbf16>
    %c0_4 = arith.constant 0 : index
    %c0_5 = arith.constant 0 : index
    %5 = vector.load %arg2[%c0_4, %c0_5] : memref<512x512xbf16, #tpu.memory_space<vmem>>, vector<512x512xbf16>
    %cst = arith.constant dense<0.000000e+00> : vector<16x512xf32>
    %6 = tpu.matmul %4, %5, %cst {dimension_numbers = #tpu.dot_dimension_numbers<[1], [0], [0], [1], [0, 0, 1, 1], [], []>} : vector<16x512xbf16>, vector<512x512xbf16>, vector<16x512xf32> -> vector<16x512xf32>
    %7 = arith.addf %3, %6 : vector<16x512xf32>
    %c0_6 = arith.constant 0 : index
    %c0_7 = arith.constant 0 : index
    %8 = vector.load %arg9[%c0_6, %c0_7] : memref<16x512xf32, #tpu.memory_space<vmem>>, vector<16x512xf32>
    tpu.vector_store %arg9[%c0_6, %c0_7], %7 {strides = array<i32>} : memref<16x512xf32, #tpu.memory_space<vmem>>, vector<16x512xf32>,
    %c13_i32 = arith.constant 13 : i32
    %9 = arith.cmpi eq, %arg0, %c13_i32 : i32
    %10 = arith.extui %9 : i1 to i32
    %c0_i32_8 = arith.constant 0 : i32
    %11 = arith.cmpi ne, %10, %c0_i32_8 : i32
    scf.if %11 {
      %c0_9 = arith.constant 0 : index
      %c0_10 = arith.constant 0 : index
      %12 = vector.load %arg9[%c0_9, %c0_10] : memref<16x512xf32, #tpu.memory_space<vmem>>, vector<16x512xf32>
      %c0_11 = arith.constant 0 : index
      %c0_12 = arith.constant 0 : index
      %13 = vector.load %arg3[%c0_11, %c0_12] : memref<1x512xf32, #tpu.memory_space<vmem>>, vector<1x512xf32>
      %14 = vector.broadcast %13 : vector<1x512xf32> to vector<16x512xf32>
      %15 = arith.addf %12, %14 : vector<16x512xf32>
      %cst_13 = arith.constant 0.000000e+00 : f32
      %16 = vector.broadcast %cst_13 : f32 to vector<16x512xf32>
      %17 = arith.maximumf %15, %16 : vector<16x512xf32>
      %18 = vector.shape_cast %17 : vector<16x512xf32> to vector<2x8x512xf32>
      %cst_14 = arith.constant dense<0xFF800000> : vector<2x512xf32>
      %19 = vector.multi_reduction <maximumf>, %18, %cst_14 [1] : vector<2x8x512xf32> to vector<2x512xf32>
      %20 = arith.truncf %19 : vector<2x512xf32> to vector<2x512xbf16>
      %c0_15 = arith.constant 0 : index
      %c0_16 = arith.constant 0 : index
      %21 = vector.load %arg4[%c0_15, %c0_16] : memref<512x128xbf16, #tpu.memory_space<vmem>>, vector<512x128xbf16>
      %cst_17 = arith.constant dense<0.000000e+00> : vector<2x128xf32>
      %22 = tpu.matmul %20, %21, %cst_17 {dimension_numbers = #tpu.dot_dimension_numbers<[1], [0], [0], [1], [0, 0, 1, 1], [], []>} : vector<2x512xbf16>, vector<512x128xbf16>, vector<2x128xf32> -> vector<2x128xf32>
      %c0_18 = arith.constant 0 : index
      %c0_19 = arith.constant 0 : index
      %23 = vector.load %arg5[%c0_18, %c0_19] : memref<1x128xf32, #tpu.memory_space<vmem>>, vector<1x128xf32>
      %24 = vector.broadcast %23 : vector<1x128xf32> to vector<2x128xf32>
      %25 = arith.addf %22, %24 : vector<2x128xf32>
      %cst_20 = arith.constant 0.000000e+00 : f32
      %26 = vector.broadcast %cst_20 : f32 to vector<2x128xf32>
      %27 = arith.maximumf %25, %26 : vector<2x128xf32>
      %28 = arith.truncf %27 : vector<2x128xf32> to vector<2x128xbf16>
      %c0_21 = arith.constant 0 : index
      %c0_22 = arith.constant 0 : index
      %29 = vector.load %arg6[%c0_21, %c0_22] : memref<128x128xbf16, #tpu.memory_space<vmem>>, vector<128x128xbf16>
      %cst_23 = arith.constant dense<0.000000e+00> : vector<2x128xf32>
      %30 = tpu.matmul %28, %29, %cst_23 {dimension_numbers = #tpu.dot_dimension_numbers<[1], [0], [0], [1], [0, 0, 1, 1], [], []>} : vector<2x128xbf16>, vector<128x128xbf16>, vector<2x128xf32> -> vector<2x128xf32>
      %c0_24 = arith.constant 0 : index
      %c0_25 = arith.constant 0 : index
      %31 = vector.load %arg7[%c0_24, %c0_25] : memref<1x128xf32, #tpu.memory_space<vmem>>, vector<1x128xf32>
      %32 = vector.broadcast %31 : vector<1x128xf32> to vector<2x128xf32>
      %33 = arith.addf %30, %32 : vector<2x128xf32>
      %c0_26 = arith.constant 0 : index
      %c0_27 = arith.constant 0 : index
      %34 = vector.load %arg8[%c0_26, %c0_27] : memref<2x128xf32, #tpu.memory_space<vmem>>, vector<2x128xf32>
      tpu.vector_store %arg8[%c0_26, %c0_27], %33 {strides = array<i32>} : memref<2x128xf32, #tpu.memory_space<vmem>>, vector<2x128xf32>,
    } else {
    }
    return
  }
  func.func @transform_0(%arg0: i32) -> (i32, i32) {
    %c0_i32 = arith.constant 0 : i32
    %c0_i32_0 = arith.constant 0 : i32
    return %c0_i32, %arg0 : i32, i32
  }
  func.func @transform_1(%arg0: i32) -> (i32, i32) {
    %c0_i32 = arith.constant 0 : i32
    %c0_i32_0 = arith.constant 0 : i32
    return %arg0, %c0_i32 : i32, i32
  }
  func.func @transform_2(%arg0: i32) -> (i32, i32) {
    %c0_i32 = arith.constant 0 : i32
    %c0_i32_0 = arith.constant 0 : i32
    %c0_i32_1 = arith.constant 0 : i32
    return %c0_i32, %c0_i32_0 : i32, i32
  }
  func.func @transform_3(%arg0: i32) -> (i32, i32) {
    %c0_i32 = arith.constant 0 : i32
    %c0_i32_0 = arith.constant 0 : i32
    %c0_i32_1 = arith.constant 0 : i32
    return %c0_i32, %c0_i32_0 : i32, i32
  }
  func.func @transform_4(%arg0: i32) -> (i32, i32) {
    %c0_i32 = arith.constant 0 : i32
    %c0_i32_0 = arith.constant 0 : i32
    %c0_i32_1 = arith.constant 0 : i32
    return %c0_i32, %c0_i32_0 : i32, i32
  }
  func.func @transform_5(%arg0: i32) -> (i32, i32) {
    %c0_i32 = arith.constant 0 : i32
    %c0_i32_0 = arith.constant 0 : i32
    %c0_i32_1 = arith.constant 0 : i32
    return %c0_i32, %c0_i32_0 : i32, i32
  }
  func.func @transform_6(%arg0: i32) -> (i32, i32) {
    %c0_i32 = arith.constant 0 : i32
    %c0_i32_0 = arith.constant 0 : i32
    %c0_i32_1 = arith.constant 0 : i32
    return %c0_i32, %c0_i32_0 : i32, i32
  }
  func.func @transform_7(%arg0: i32) -> (i32, i32) {
    %c0_i32 = arith.constant 0 : i32
    %c0_i32_0 = arith.constant 0 : i32
    %c0_i32_1 = arith.constant 0 : i32
    return %c0_i32, %c0_i32_0 : i32, i32
  }
}

</mosaic_0001>

<bundles_post_ra>
// kernel: policy_forward.4
= control target key start
LH: loop header
LB: loop body
LE: loop exit
PB: predicated region body
PF: predicated region fallthrough
CT: control target
= control target key end

     0   :  { %8 = vsyncpa [#allocation3], 0  ;;  %s524_s12 = smov [#allocation2]   ;;  %s912_s0 = inlined_call_operand.vmem [shape: bf16[128,128], index: 0, kind: input, shape index: {}]   ;;  %s913_s1 = inlined_call_operand.vmem [shape: bf16[128,64], index: 1, kind: input, shape index: {}]   ;;  %s914_s2 = inlined_call_operand.hbm [shape: f32[1,64], index: 2, kind: input, shape index: {}]   ;;  %s915_s3 = inlined_call_operand.vmem [shape: f32[128,64], index: 3, kind: output, shape index: {}]  }
   0x1   :  { %s19_s13 = sshll.u32 %s524_s12, 4  ;;  %s500_s16 = scalar_lea.hbm %s914_s2, 16  ;;  %s20_s13 = int_to_ptr.vmem [resolvable:$true] %s19_s13 }
   0x2   :  { %p501_p0 = scmp.ne.s32.totalorder %s914_s2, %s500_s16  ;;  %p504_p1 = scmp.lt.u32.totalorder %s500_s16, %s914_s2 }
   0x4   :  { %p506_p2 = pnand %p504_p1, %p501_p0 }
   0x6   :  { %509 = shalt.err (!%p506_p2)
}
   0x7   :  { %s510_s21 = scalar_lea.vmem %s20_s13, 16  ;;  %s514_s22 = scalar_lea.vmem %s20_s13, 32 }
   0x8   :  { %p511_p3 = scmp.ne.s32.totalorder %s20_s13, %s510_s21  ;;  %p515_p4 = scmp.lt.s32.totalorder %s20_s13, %s20_s13 }
   0x9   :  { %p516_p5 = scmp.lt.s32.totalorder %s514_s22, %s510_s21 }
   0xb   :  { %p517_p6 = por %p516_p5, %p515_p4 }
   0xd   :  { %p518_p7 = pnand %p517_p6, %p511_p3 }
   0xf   :  { %521 = shalt.err (!%p518_p7)
}
  0x10   :  { %22 = dma.hbm_to_vmem [thread:$0]  %s914_s2, 16, %s20_s13, [#allocation3]  }
  0x11   :  { %522 = dma.done.wait [#allocation3], 16  }
  0x12   :  { %523 = vsyncadd [#allocation3], 4294967280  ;;  %vm31_vm0 = vcmask 523264   ;;  %v525_v0 = vmov 0.0   ;;  %v484_v1 = vld [vmem:[%s913_s1] sm:$0xff]   ;;  %v485_v2 = vld [vmem:[%s913_s1 + $0x8] sm:$0xff]  }
  0x13   :  { %34 = vst.msk [vmem:[%s915_s3 + $0x10] sm:$0xff] %vm31_vm0, %v525_v0  ;;  %32 = vst.msk [vmem:[%s915_s3] sm:$0xff] %vm31_vm0, %v525_v0  ;;  %434 = vmatprep.subr.bf16.mxu0 %v484_v1  ;;  %466 = vmatprep.subr.bf16.mxu1 %v484_v1  ;;  %v486_v3 = vld [vmem:[%s913_s1 + $0x10] sm:$0xff]   ;;  %v487_v4 = vld [vmem:[%s913_s1 + $0x18] sm:$0xff]  }
  0x14   :  { %33 = vst.msk [vmem:[%s915_s3 + $0x8] sm:$0xff] %vm31_vm0, %v525_v0  ;;  %35 = vst.msk [vmem:[%s915_s3 + $0x18] sm:$0xff] %vm31_vm0, %v525_v0  ;;  %435 = vmatpush3.bf16.msra.mxu0 %v484_v1  ;;  %474 = vmatpush3.bf16.msra.mxu1 %v484_v1  ;;  %v492_v5 = vld [vmem:[%s912_s0] sm:$0xff]   ;;  %v489_v8 = vld [vmem:[%s913_s1 + $0x28] sm:$0xff]  }
  0x15   :  { %36 = vst.msk [vmem:[%s915_s3 + $0x20] sm:$0xff] %vm31_vm0, %v525_v0  ;;  %37 = vst.msk [vmem:[%s915_s3 + $0x28] sm:$0xff] %vm31_vm0, %v525_v0  ;;  %436 = vmatprep.subr.bf16.mxu0 %v485_v2  ;;  %467 = vmatprep.subr.bf16.mxu1 %v485_v2  ;;  %v493_v6 = vld [vmem:[%s912_s0 + $0x20] sm:$0xff]   ;;  %v490_v9 = vld [vmem:[%s913_s1 + $0x30] sm:$0xff]  }
  0x16   :  { %38 = vst.msk [vmem:[%s915_s3 + $0x30] sm:$0xff] %vm31_vm0, %v525_v0  ;;  %39 = vst.msk [vmem:[%s915_s3 + $0x38] sm:$0xff] %vm31_vm0, %v525_v0  ;;  %450 = vmatprep.mubr.bf16.mxu0 %v492_v5  ;;  %v488_v7 = vld [vmem:[%s913_s1 + $0x20] sm:$0xff]   ;;  %458 = vmatprep.mubr.bf16.mxu1 %v493_v6  ;;  %v491_v10 = vld [vmem:[%s913_s1 + $0x38] sm:$0xff]  }
  0x17   :  { %40 = vst.msk [vmem:[%s915_s3 + $0x40] sm:$0xff] %vm31_vm0, %v525_v0  ;;  %41 = vst.msk [vmem:[%s915_s3 + $0x48] sm:$0xff] %vm31_vm0, %v525_v0  ;;  %v494_v11 = vld [vmem:[%s912_s0 + $0x8] sm:$0xff]   ;;  %v496_v13 = vld [vmem:[%s912_s0 + $0x10] sm:$0xff]  }
  0x18   :  { %42 = vst.msk [vmem:[%s915_s3 + $0x50] sm:$0xff] %vm31_vm0, %v525_v0  ;;  %43 = vst.msk [vmem:[%s915_s3 + $0x58] sm:$0xff] %vm31_vm0, %v525_v0  ;;  %437 = vmatpush3.bf16.msra.mxu0 %v485_v2  ;;  %475 = vmatpush3.bf16.msra.mxu1 %v485_v2  ;;  %v495_v12 = vld [vmem:[%s912_s0 + $0x28] sm:$0xff]   ;;  %v497_v14 = vld [vmem:[%s912_s0 + $0x30] sm:$0xff]  }
  0x19   :  { %44 = vst.msk [vmem:[%s915_s3 + $0x60] sm:$0xff] %vm31_vm0, %v525_v0  ;;  %45 = vst.msk [vmem:[%s915_s3 + $0x68] sm:$0xff] %vm31_vm0, %v525_v0  ;;  %438 = vmatprep.subr.bf16.mxu0 %v486_v3  ;;  %468 = vmatprep.subr.bf16.mxu1 %v486_v3  ;;  %v498_v15 = vld [vmem:[%s912_s0 + $0x18] sm:$0xff]   ;;  %v738_v45 = vld [vmem:[#allocation2] ss:$0 sm:$0xff] }
  0x1a   :  { %46 = vst.msk [vmem:[%s915_s3 + $0x70] sm:$0xff] %vm31_vm0, %v525_v0  ;;  %47 = vst.msk [vmem:[%s915_s3 + $0x78] sm:$0xff] %vm31_vm0, %v525_v0  ;;  %v499_v16 = vld [vmem:[%s912_s0 + $0x38] sm:$0xff]   ;;  %v50_v17 = vld [vmem:[%s915_s3 + $0x10] sm:$0xff] }
  0x1b   :  { %v48_v19 = vld [vmem:[%s915_s3] sm:$0xff]  ;;  %v51_v23 = vld [vmem:[%s915_s3 + $0x18] sm:$0xff]  ;;  %v49_v29 = vld [vmem:[%s915_s3 + $0x8] sm:$0xff] }
  0x1c   :  { %439 = vmatpush3.bf16.msra.mxu0 %v486_v3  ;;  %476 = vmatpush3.bf16.msra.mxu1 %v486_v3  ;;  %v52_v43 = vld [vmem:[%s915_s3 + $0x20] sm:$0xff]  ;;  %v53_v54 = vld [vmem:[%s915_s3 + $0x28] sm:$0xff] }
  0x1d   :  { %440 = vmatprep.subr.bf16.mxu0 %v487_v4  ;;  %469 = vmatprep.subr.bf16.mxu1 %v487_v4  ;;  %v54_v41 = vld [vmem:[%s915_s3 + $0x30] sm:$0xff]  ;;  %v55_v48 = vld [vmem:[%s915_s3 + $0x38] sm:$0xff] }
  0x1e   :  { %v56_v20 = vld [vmem:[%s915_s3 + $0x40] sm:$0xff]  ;;  %v57_v30 = vld [vmem:[%s915_s3 + $0x48] sm:$0xff] }
  0x1f   :  { %v58_v18 = vld [vmem:[%s915_s3 + $0x50] sm:$0xff]  ;;  %v59_v24 = vld [vmem:[%s915_s3 + $0x58] sm:$0xff] }
  0x20   :  { %441 = vmatpush3.bf16.msra.mxu0 %v487_v4  ;;  %477 = vmatpush3.bf16.msra.mxu1 %v487_v4  ;;  %v60_v44 = vld [vmem:[%s915_s3 + $0x60] sm:$0xff]  ;;  %v61_v55 = vld [vmem:[%s915_s3 + $0x68] sm:$0xff] }
  0x21   :  { %442 = vmatprep.subr.bf16.mxu0 %v488_v7  ;;  %470 = vmatprep.subr.bf16.mxu1 %v488_v7  ;;  %v62_v42 = vld [vmem:[%s915_s3 + $0x70] sm:$0xff]  ;;  %v63_v49 = vld [vmem:[%s915_s3 + $0x78] sm:$0xff] }
  0x24   :  { %443 = vmatpush3.bf16.msra.mxu0 %v488_v7  ;;  %478 = vmatpush3.bf16.msra.mxu1 %v488_v7 }
  0x25   :  { %444 = vmatprep.subr.bf16.mxu0 %v489_v8  ;;  %471 = vmatprep.subr.bf16.mxu1 %v489_v8 }
  0x28   :  { %445 = vmatpush3.bf16.msra.mxu0 %v489_v8  ;;  %479 = vmatpush3.bf16.msra.mxu1 %v489_v8 }
  0x29   :  { %446 = vmatprep.subr.bf16.mxu0 %v490_v9  ;;  %472 = vmatprep.subr.bf16.mxu1 %v490_v9 }
  0x2c   :  { %447 = vmatpush3.bf16.msra.mxu0 %v490_v9  ;;  %480 = vmatpush3.bf16.msra.mxu1 %v490_v9 }
  0x2d   :  { %448 = vmatprep.subr.bf16.mxu0 %v491_v10  ;;  %473 = vmatprep.subr.bf16.mxu1 %v491_v10 }
  0x30   :  { %449 = vmatpush3.bf16.msra.mxu0 %v491_v10  ;;  %481 = vmatpush3.bf16.msra.mxu1 %v491_v10 }
  0x33   :  { %451 = vmatmul.mubr.bf16.vlgmr.msra.gmra.mrb[0].mxu0 %v494_v11  ;;  %459 = vmatmul.mubr.bf16.vlgmr.msra.gmra.mrb[0].mxu1 %v495_v12 }
  0x34   :  { %454 = vmatprep.mubr.bf16.mxu0 %v496_v13  ;;  %462 = vmatprep.mubr.bf16.mxu1 %v497_v14 }
  0x3b   :  { %455 = vmatmul.mubr.bf16.gmra.mrb[4].mxu0 %v498_v15  ;;  %463 = vmatmul.mubr.bf16.gmra.mrb[4].mxu1 %v499_v16 }
 0x106   :  { %v452_v21 = vpop.f32.mrb[0].mxu0  ;;  %v460_v22 = vpop.f32.mrb[0].mxu1 }
 0x107   :  { %v291_v25 = vadd.f32 %v452_v21, %v50_v17  ;;  %v299_v26 = vadd.f32 %v460_v22, %v58_v18  ;;  %v226_v27 = vpop.f32.mrb[1].mxu0  ;;  %v258_v28 = vpop.f32.mrb[1].mxu1 }
 0x108   :  { %v289_v31 = vadd.f32 %v226_v27, %v48_v19  ;;  %v297_v32 = vadd.f32 %v258_v28, %v56_v20  ;;  %v453_v33 = vpop.f32.mrb[2].mxu0  ;;  %v461_v34 = vpop.f32.mrb[2].mxu1 }
 0x109   :  { %308 = vst.msk [vmem:[%s915_s3 + $0x10] sm:$0xff] %vm31_vm0, %v291_v25  ;;  %316 = vst.msk [vmem:[%s915_s3 + $0x50] sm:$0xff] %vm31_vm0, %v299_v26  ;;  %v292_v35 = vadd.f32 %v453_v33, %v51_v23  ;;  %v300_v36 = vadd.f32 %v461_v34, %v59_v24  ;;  %v229_v37 = vpop.f32.mrb[3].mxu0  ;;  %v261_v38 = vpop.f32.mrb[3].mxu1 }
 0x10a   :  { %306 = vst.msk [vmem:[%s915_s3] sm:$0xff] %vm31_vm0, %v289_v31  ;;  %314 = vst.msk [vmem:[%s915_s3 + $0x40] sm:$0xff] %vm31_vm0, %v297_v32  ;;  %v290_v39 = vadd.f32 %v229_v37, %v49_v29  ;;  %v298_v40 = vadd.f32 %v261_v38, %v57_v30 }
 0x10b   :  { %309 = vst.msk [vmem:[%s915_s3 + $0x18] sm:$0xff] %vm31_vm0, %v292_v35  ;;  %317 = vst.msk [vmem:[%s915_s3 + $0x58] sm:$0xff] %vm31_vm0, %v300_v36 }
 0x10c   :  { %307 = vst.msk [vmem:[%s915_s3 + $0x8] sm:$0xff] %vm31_vm0, %v290_v39  ;;  %315 = vst.msk [vmem:[%s915_s3 + $0x48] sm:$0xff] %vm31_vm0, %v298_v40 }
 0x10e   :  { %v456_v46 = vpop.f32.mrb[4].mxu0  ;;  %v464_v47 = vpop.f32.mrb[4].mxu1 }
 0x10f   :  { %v295_v50 = vadd.f32 %v456_v46, %v54_v41  ;;  %v303_v51 = vadd.f32 %v464_v47, %v62_v42  ;;  %v242_v52 = vpop.f32.mrb[5].mxu0  ;;  %v274_v53 = vpop.f32.mrb[5].mxu1 }
 0x110   :  { %v327_v56 = vld [vmem:[%s915_s3 + $0x10] sm:$0xff]  ;;  %v293_v58 = vadd.f32 %v242_v52, %v52_v43  ;;  %v301_v59 = vadd.f32 %v274_v53, %v60_v44  ;;  %v457_v60 = vpop.f32.mrb[6].mxu0  ;;  %v465_v61 = vpop.f32.mrb[6].mxu1 }
 0x111   :  { %v335_v57 = vld [vmem:[%s915_s3 + $0x50] sm:$0xff]  ;;  %v350_v62 = vadd.f32 %v738_v45, %v327_v56  ;;  %v325_v0 = vld [vmem:[%s915_s3] sm:$0xff]  ;;  %312 = vst.msk [vmem:[%s915_s3 + $0x30] sm:$0xff] %vm31_vm0, %v295_v50  ;;  %320 = vst.msk [vmem:[%s915_s3 + $0x70] sm:$0xff] %vm31_vm0, %v303_v51  ;;  %v296_v2 = vadd.f32 %v457_v60, %v55_v48  ;;  %v304_v3 = vadd.f32 %v465_v61, %v63_v49  ;;  %v245_v4 = vpop.f32.mrb[7].mxu0  ;;  %v277_v5 = vpop.f32.mrb[7].mxu1 }
 0x112   :  { %v358_v63 = vadd.f32 %v738_v45, %v335_v57  ;;  %v333_v1 = vld [vmem:[%s915_s3 + $0x40] sm:$0xff]  ;;  %v348_v6 = vadd.f32 %v738_v45, %v325_v0  ;;  %v328_v8 = vld [vmem:[%s915_s3 + $0x18] sm:$0xff]  ;;  %310 = vst.msk [vmem:[%s915_s3 + $0x20] sm:$0xff] %vm31_vm0, %v293_v58  ;;  %318 = vst.msk [vmem:[%s915_s3 + $0x60] sm:$0xff] %vm31_vm0, %v301_v59  ;;  %v294_v10 = vadd.f32 %v245_v4, %v53_v54 }
 0x113   :  { %v356_v7 = vadd.f32 %v738_v45, %v333_v1  ;;  %v336_v9 = vld [vmem:[%s915_s3 + $0x58] sm:$0xff]  ;;  %v302_v11 = vadd.f32 %v277_v5, %v61_v55  ;;  %v366_v12 = vmax.f32 %v350_v62, 0.0  ;;  %v351_v14 = vadd.f32 %v738_v45, %v328_v8  ;;  %v326_v16 = vld [vmem:[%s915_s3 + $0x8] sm:$0xff]  ;;  %313 = vst.msk [vmem:[%s915_s3 + $0x38] sm:$0xff] %vm31_vm0, %v296_v2  ;;  %321 = vst.msk [vmem:[%s915_s3 + $0x78] sm:$0xff] %vm31_vm0, %v304_v3 }
 0x114   :  { %v374_v13 = vmax.f32 %v358_v63, 0.0  ;;  %v359_v15 = vadd.f32 %v738_v45, %v336_v9  ;;  %v334_v17 = vld [vmem:[%s915_s3 + $0x48] sm:$0xff]  ;;  %v364_v18 = vmax.f32 %v348_v6, 0.0  ;;  %v349_v20 = vadd.f32 %v738_v45, %v326_v16  ;;  %311 = vst.msk [vmem:[%s915_s3 + $0x28] sm:$0xff] %vm31_vm0, %v294_v10 }
 0x115   :  { %v372_v19 = vmax.f32 %v356_v7, 0.0  ;;  %v357_v21 = vadd.f32 %v738_v45, %v334_v17  ;;  %319 = vst.msk [vmem:[%s915_s3 + $0x68] sm:$0xff] %vm31_vm0, %v302_v11  ;;  %382 = vst.msk [vmem:[%s915_s3 + $0x10] sm:$0xff] %vm31_vm0, %v366_v12  ;;  %v367_v22 = vmax.f32 %v351_v14, 0.0 }
 0x116   :  { %390 = vst.msk [vmem:[%s915_s3 + $0x50] sm:$0xff] %vm31_vm0, %v374_v13  ;;  %v375_v23 = vmax.f32 %v359_v15, 0.0  ;;  %380 = vst.msk [vmem:[%s915_s3] sm:$0xff] %vm31_vm0, %v364_v18  ;;  %v365_v24 = vmax.f32 %v349_v20, 0.0 }
 0x117   :  { %388 = vst.msk [vmem:[%s915_s3 + $0x40] sm:$0xff] %vm31_vm0, %v372_v19  ;;  %v373_v25 = vmax.f32 %v357_v21, 0.0  ;;  %383 = vst.msk [vmem:[%s915_s3 + $0x18] sm:$0xff] %vm31_vm0, %v367_v22 }
 0x118   :  { %391 = vst.msk [vmem:[%s915_s3 + $0x58] sm:$0xff] %vm31_vm0, %v375_v23  ;;  %381 = vst.msk [vmem:[%s915_s3 + $0x8] sm:$0xff] %vm31_vm0, %v365_v24  ;;  %v331_v26 = vld [vmem:[%s915_s3 + $0x30] sm:$0xff] }
 0x119   :  { %389 = vst.msk [vmem:[%s915_s3 + $0x48] sm:$0xff] %vm31_vm0, %v373_v25  ;;  %v339_v27 = vld [vmem:[%s915_s3 + $0x70] sm:$0xff]  ;;  %v354_v28 = vadd.f32 %v738_v45, %v331_v26  ;;  %v329_v30 = vld [vmem:[%s915_s3 + $0x20] sm:$0xff] }
 0x11a   :  { %v362_v29 = vadd.f32 %v738_v45, %v339_v27  ;;  %v337_v31 = vld [vmem:[%s915_s3 + $0x60] sm:$0xff]  ;;  %v352_v32 = vadd.f32 %v738_v45, %v329_v30  ;;  %v332_v34 = vld [vmem:[%s915_s3 + $0x38] sm:$0xff] }
 0x11b   :  { %v360_v33 = vadd.f32 %v738_v45, %v337_v31  ;;  %v340_v35 = vld [vmem:[%s915_s3 + $0x78] sm:$0xff]  ;;  %v370_v36 = vmax.f32 %v354_v28, 0.0  ;;  %v355_v38 = vadd.f32 %v738_v45, %v332_v34  ;;  %v330_v40 = vld [vmem:[%s915_s3 + $0x28] sm:$0xff] }
 0x11c   :  { %v378_v37 = vmax.f32 %v362_v29, 0.0  ;;  %v363_v39 = vadd.f32 %v738_v45, %v340_v35  ;;  %v338_v41 = vld [vmem:[%s915_s3 + $0x68] sm:$0xff]  ;;  %v368_v42 = vmax.f32 %v352_v32, 0.0  ;;  %v353_v44 = vadd.f32 %v738_v45, %v330_v40 }
 0x11d   :  { %v376_v43 = vmax.f32 %v360_v33, 0.0  ;;  %v361_v46 = vadd.f32 %v738_v45, %v338_v41  ;;  %386 = vst.msk [vmem:[%s915_s3 + $0x30] sm:$0xff] %vm31_vm0, %v370_v36  ;;  %v371_v47 = vmax.f32 %v355_v38, 0.0 }
 0x11e   :  { %394 = vst.msk [vmem:[%s915_s3 + $0x70] sm:$0xff] %vm31_vm0, %v378_v37  ;;  %v379_v48 = vmax.f32 %v363_v39, 0.0  ;;  %384 = vst.msk [vmem:[%s915_s3 + $0x20] sm:$0xff] %vm31_vm0, %v368_v42  ;;  %v369_v45 = vmax.f32 %v353_v44, 0.0 }
 0x11f   :  { %392 = vst.msk [vmem:[%s915_s3 + $0x60] sm:$0xff] %vm31_vm0, %v376_v43  ;;  %v377_v49 = vmax.f32 %v361_v46, 0.0  ;;  %387 = vst.msk [vmem:[%s915_s3 + $0x38] sm:$0xff] %vm31_vm0, %v371_v47 }
 0x120   :  { %395 = vst.msk [vmem:[%s915_s3 + $0x78] sm:$0xff] %vm31_vm0, %v379_v48  ;;  %385 = vst.msk [vmem:[%s915_s3 + $0x28] sm:$0xff] %vm31_vm0, %v369_v45 }
 0x121   :  { %393 = vst.msk [vmem:[%s915_s3 + $0x68] sm:$0xff] %vm31_vm0, %v377_v49 }
 0x122   :  { %400 = vsyncpa [#allocation3], 1 }

// kernel: policy_forward.5
= control target key start
LH: loop header
LB: loop body
LE: loop exit
PB: predicated region body
PF: predicated region fallthrough
CT: control target
= control target key end

     0   :  { %s1451_s12 = smov 0   ;;  %s1453_s13 = smov 0   ;;  %s1885_s0 = inlined_call_operand.vmem [shape: bf16[128,2048], index: 0, kind: input, shape index: {}]   ;;  %s1886_s1 = inlined_call_operand.vmem [shape: bf16[2048,128], index: 1, kind: input, shape index: {}]   ;;  %s1887_s2 = inlined_call_operand.vmem [shape: f32[1,128], index: 2, kind: input, shape index: {}]   ;;  %s1888_s3 = inlined_call_operand.vmem [shape: f32[128,128], index: 3, kind: output, shape index: {}]  }
   0x1   :  { %s1455_s14 = smov 0  }
   0x2 LB: > { %s1467_s15 = sadd.s32 4294967295, %s1428_s14   ;;  %s1470_s16 = sadd.s32 1, %s1428_s14   ;;  %s1428_s14 = sphi %s1455_s14, %s1891_s14   ;;  %s1424_s13 = sphi %s1453_s13, %s1890_s13   ;;  %s1420_s12 = sphi %s1451_s12, %s1889_s12  }
   0x3   : > { %s17_s17 = ssub.s32 %s1428_s14, %s1470_s16  ;;  %s20_s18 = sadd.s32 1, %s1424_s13 }
   0x4   : > { %p18_p0 = scmp.eq.s32.totalorder %s17_s17, 0  ;;  %p27_p1 = scmp.ne.s32.totalorder %s1424_s13, %s1420_s12 }
   0x5   : > { %p28_p2 = scmp.eq.s32.totalorder %s1428_s14, 0  ;;  %p1095_p4 = scmp.ge.s32.totalorder %s1428_s14, 4 }
   0x6   : > { %s1479_s19 = scalar_select %p18_p0, %s1424_s13, %s20_s18  }
   0x7   : > { %p29_p3 = por %p28_p2, %p27_p1  ;;  %124 = sbr.rel (%p1095_p4) target bundleno = 34 (0x22), region = 20 }
   0xe   : > { %127 = sbr.rel (!%p29_p3) target bundleno = 34 (0x22), region = 24  ;;  %s129_s20 = sand.u32 (%p29_p3), 1, %s1424_s13  }
   0xf   : > { %s1172_s21 = sshll.u32 (%p29_p3), %s1428_s14, 4  ;;  %s1096_s22 = sshll.u32 (%p29_p3), %s129_s20, 8 }
  0x10   : > { %s1487_s25 = scalar_lea.vmem (%p29_p3), %s1885_s0, %s1172_s21  ;;  %s1492_s26 = scalar_lea.vmem (%p29_p3), [#allocation2], %s1096_s22 }
  0x11   : > { %v147_v0 = vld [vmem:[%s1487_s25] sm:$0xff] (%p29_p3)  ;;  %v149_v1 = vld [vmem:[%s1487_s25 + $0x8] sm:$0xff] (%p29_p3) }
  0x12   : > { %v151_v2 = vld [vmem:[%s1487_s25 + $0x40] sm:$0xff] (%p29_p3)  ;;  %148 = vst [vmem:[%s1492_s26] sm:$0xff] (%p29_p3), %v147_v0  ;;  %150 = vst [vmem:[%s1492_s26 + $0x8] sm:$0xff] (%p29_p3), %v149_v1  ;;  %v153_v3 = vld [vmem:[%s1487_s25 + $0x48] sm:$0xff] (%p29_p3) }
  0x13   : > { %152 = vst [vmem:[%s1492_s26 + $0x10] sm:$0xff] (%p29_p3), %v151_v2  ;;  %v155_v4 = vld [vmem:[%s1487_s25 + $0x80] sm:$0xff] (%p29_p3)  ;;  %v157_v5 = vld [vmem:[%s1487_s25 + $0x88] sm:$0xff] (%p29_p3)  ;;  %154 = vst [vmem:[%s1492_s26 + $0x18] sm:$0xff] (%p29_p3), %v153_v3 }
  0x14   : > { %156 = vst [vmem:[%s1492_s26 + $0x20] sm:$0xff] (%p29_p3), %v155_v4  ;;  %158 = vst [vmem:[%s1492_s26 + $0x28] sm:$0xff] (%p29_p3), %v157_v5  ;;  %v159_v6 = vld [vmem:[%s1487_s25 + $0xc0] sm:$0xff] (%p29_p3)  ;;  %v161_v7 = vld [vmem:[%s1487_s25 + $0xc8] sm:$0xff] (%p29_p3) }
  0x15   : > { %v163_v8 = vld [vmem:[%s1487_s25 + $0x100] sm:$0xff]  ;;  %160 = vst [vmem:[%s1492_s26 + $0x30] sm:$0xff] %v159_v6  ;;  %162 = vst [vmem:[%s1492_s26 + $0x38] sm:$0xff] %v161_v7  ;;  %v165_v9 = vld [vmem:[%s1487_s25 + $0x108] sm:$0xff] }
  0x16   : > { %164 = vst [vmem:[%s1492_s26 + $0x40] sm:$0xff] %v163_v8  ;;  %v167_v10 = vld [vmem:[%s1487_s25 + $0x140] sm:$0xff]  ;;  %v169_v11 = vld [vmem:[%s1487_s25 + $0x148] sm:$0xff]  ;;  %166 = vst [vmem:[%s1492_s26 + $0x48] sm:$0xff] %v165_v9 }
  0x17   : > { %168 = vst [vmem:[%s1492_s26 + $0x50] sm:$0xff] %v167_v10  ;;  %170 = vst [vmem:[%s1492_s26 + $0x58] sm:$0xff] %v169_v11  ;;  %v171_v12 = vld [vmem:[%s1487_s25 + $0x180] sm:$0xff]  ;;  %v173_v13 = vld [vmem:[%s1487_s25 + $0x188] sm:$0xff] }
  0x18   : > { %v175_v14 = vld [vmem:[%s1487_s25 + $0x1c0] sm:$0xff]  ;;  %172 = vst [vmem:[%s1492_s26 + $0x60] sm:$0xff] %v171_v12  ;;  %174 = vst [vmem:[%s1492_s26 + $0x68] sm:$0xff] %v173_v13  ;;  %v177_v15 = vld [vmem:[%s1487_s25 + $0x1c8] sm:$0xff] }
  0x19   : > { %176 = vst [vmem:[%s1492_s26 + $0x70] sm:$0xff] %v175_v14  ;;  %v179_v16 = vld [vmem:[%s1487_s25 + $0x200] sm:$0xff]  ;;  %v181_v17 = vld [vmem:[%s1487_s25 + $0x208] sm:$0xff]  ;;  %178 = vst [vmem:[%s1492_s26 + $0x78] sm:$0xff] %v177_v15 }
  0x1a   : > { %180 = vst [vmem:[%s1492_s26 + $0x80] sm:$0xff] %v179_v16  ;;  %182 = vst [vmem:[%s1492_s26 + $0x88] sm:$0xff] %v181_v17  ;;  %v183_v18 = vld [vmem:[%s1487_s25 + $0x240] sm:$0xff]  ;;  %v185_v19 = vld [vmem:[%s1487_s25 + $0x248] sm:$0xff] }
  0x1b   : > { %v187_v20 = vld [vmem:[%s1487_s25 + $0x280] sm:$0xff]  ;;  %184 = vst [vmem:[%s1492_s26 + $0x90] sm:$0xff] %v183_v18  ;;  %186 = vst [vmem:[%s1492_s26 + $0x98] sm:$0xff] %v185_v19  ;;  %v189_v21 = vld [vmem:[%s1487_s25 + $0x288] sm:$0xff] }
  0x1c   : > { %188 = vst [vmem:[%s1492_s26 + $0xa0] sm:$0xff] %v187_v20  ;;  %v191_v22 = vld [vmem:[%s1487_s25 + $0x2c0] sm:$0xff]  ;;  %v193_v23 = vld [vmem:[%s1487_s25 + $0x2c8] sm:$0xff]  ;;  %190 = vst [vmem:[%s1492_s26 + $0xa8] sm:$0xff] %v189_v21 }
  0x1d   : > { %192 = vst [vmem:[%s1492_s26 + $0xb0] sm:$0xff] %v191_v22  ;;  %194 = vst [vmem:[%s1492_s26 + $0xb8] sm:$0xff] %v193_v23  ;;  %v195_v24 = vld [vmem:[%s1487_s25 + $0x300] sm:$0xff]  ;;  %v197_v25 = vld [vmem:[%s1487_s25 + $0x308] sm:$0xff] }
  0x1e   : > { %v199_v26 = vld [vmem:[%s1487_s25 + $0x340] sm:$0xff]  ;;  %196 = vst [vmem:[%s1492_s26 + $0xc0] sm:$0xff] %v195_v24  ;;  %198 = vst [vmem:[%s1492_s26 + $0xc8] sm:$0xff] %v197_v25  ;;  %v201_v27 = vld [vmem:[%s1487_s25 + $0x348] sm:$0xff] }
  0x1f   : > { %200 = vst [vmem:[%s1492_s26 + $0xd0] sm:$0xff] %v199_v26  ;;  %v203_v28 = vld [vmem:[%s1487_s25 + $0x380] sm:$0xff]  ;;  %v205_v29 = vld [vmem:[%s1487_s25 + $0x388] sm:$0xff]  ;;  %202 = vst [vmem:[%s1492_s26 + $0xd8] sm:$0xff] %v201_v27 }
  0x20   : > { %204 = vst [vmem:[%s1492_s26 + $0xe0] sm:$0xff] %v203_v28  ;;  %206 = vst [vmem:[%s1492_s26 + $0xe8] sm:$0xff] %v205_v29  ;;  %v207_v30 = vld [vmem:[%s1487_s25 + $0x3c0] sm:$0xff]  ;;  %v209_v31 = vld [vmem:[%s1487_s25 + $0x3c8] sm:$0xff] }
  0x21   : > { %208 = vst [vmem:[%s1492_s26 + $0xf0] sm:$0xff] %v207_v30  ;;  %210 = vst [vmem:[%s1492_s26 + $0xf8] sm:$0xff] %v209_v31 }
  0x22 PF: > { %p1099_p5 = scmp.ge.s32.totalorder %s1428_s14, 1  ;;  %p224_p6 = scmp.lt.s32.totalorder %s1428_s14, 5 }
  0x24   : > { %p225_p7 = pnand %p1099_p5, %p224_p6 }
  0x25   : > { %s231_s27 = sand.u32 (!%p225_p7), 1, %s1420_s12   ;;  %s1101_s28 = sshll.u32 (!%p225_p7), %s1467_s15, 6 }
  0x26   : > { %228 = sbr.rel (%p225_p7) target bundleno = 380 (0x17c), region = 51  ;;  %s1100_s29 = sshll.u32 (!%p225_p7), %s231_s27, 8 }
  0x27   : > { %p256_p8 = scmp.lt.s32.totalorder (!%p225_p7), %s1101_s28, 255  ;;  %s1564_s7 = scalar_lea.vmem (!%p225_p7), [#allocation2], %s1100_s29 }
  0x28   : > { %p1103_p9 = scmp.ne.s32.totalorder (!%p225_p7), %s1467_s15, 0 }
  0x2d   : > { %s1893_s28 = smov (!%p256_p8, %s1101_s28), 255  ;;  %265 = sbr.rel (%p1103_p9) target bundleno = 55 (0x37), region = 59 }
  0x2e   : > { %s1102_s30 = sshll.u32 %s1893_s28, 2  ;;  %v1430_v32 = vmov (!%p1103_p9), 0.0  }
  0x2f   : > { %s1562_s6 = scalar_lea.vmem %s1886_s1, %s1102_s30  ;;  %266 = vst [vmem:[%s1888_s3] sm:$0xff] (!%p1103_p9), %v1430_v32  ;;  %267 = vst [vmem:[%s1888_s3 + $0x8] sm:$0xff] (!%p1103_p9), %v1430_v32 }
  0x30   : > { %268 = vst [vmem:[%s1888_s3 + $0x10] sm:$0xff] (!%p1103_p9), %v1430_v32  ;;  %269 = vst [vmem:[%s1888_s3 + $0x18] sm:$0xff] (!%p1103_p9), %v1430_v32 }
  0x31   : > { %270 = vst [vmem:[%s1888_s3 + $0x20] sm:$0xff] (!%p1103_p9), %v1430_v32  ;;  %271 = vst [vmem:[%s1888_s3 + $0x28] sm:$0xff] (!%p1103_p9), %v1430_v32 }
  0x32   : > { %272 = vst [vmem:[%s1888_s3 + $0x30] sm:$0xff] (!%p1103_p9), %v1430_v32  ;;  %273 = vst [vmem:[%s1888_s3 + $0x38] sm:$0xff] (!%p1103_p9), %v1430_v32 }
  0x33   : > { %274 = vst [vmem:[%s1888_s3 + $0x40] sm:$0xff] (!%p1103_p9), %v1430_v32  ;;  %275 = vst [vmem:[%s1888_s3 + $0x48] sm:$0xff] (!%p1103_p9), %v1430_v32 }
  0x34   : > { %276 = vst [vmem:[%s1888_s3 + $0x50] sm:$0xff] %v1430_v32  ;;  %277 = vst [vmem:[%s1888_s3 + $0x58] sm:$0xff] %v1430_v32 }
  0x35   : > { %278 = vst [vmem:[%s1888_s3 + $0x60] sm:$0xff] %v1430_v32  ;;  %279 = vst [vmem:[%s1888_s3 + $0x68] sm:$0xff] %v1430_v32 }
  0x36   : > { %280 = vst [vmem:[%s1888_s3 + $0x70] sm:$0xff] %v1430_v32  ;;  %281 = vst [vmem:[%s1888_s3 + $0x78] sm:$0xff] %v1430_v32 }
  0x37 PF: > { %v1326_v33 = vld [vmem:[%s1562_s6 + $0x40] sm:$0xff]   ;;  %v1330_v37 = vld [vmem:[%s1562_s6 + $0x48] sm:$0xff]   ;;  %v1334_v41 = vld [vmem:[%s1562_s6 + $0x50] sm:$0xff]   ;;  %p1168_p10 = scmp.ne.s32.totalorder %s1467_s15, 3 }
  0x38   : > { %v1327_v34 = vld [vmem:[%s1562_s6 + $0xc0] sm:$0xff]   ;;  %1173 = vmatprep.subr.bf16.mxu0 %v1326_v33  ;;  %v1331_v38 = vld [vmem:[%s1562_s6 + $0xc8] sm:$0xff]   ;;  %v1335_v42 = vld [vmem:[%s1562_s6 + $0xd0] sm:$0xff]  }
  0x39   : > { %v1328_v35 = vld [vmem:[%s1562_s6] sm:$0xff]   ;;  %1237 = vmatprep.subr.bf16.mxu1 %v1327_v34  ;;  %v1332_v39 = vld [vmem:[%s1562_s6 + $0x8] sm:$0xff]   ;;  %v1336_v43 = vld [vmem:[%s1562_s6 + $0x10] sm:$0xff]  }
  0x3a   : > { %v1329_v36 = vld [vmem:[%s1562_s6 + $0x80] sm:$0xff]   ;;  %1174 = vmatpush3.bf16.msra.mxu0 %v1328_v35  ;;  %v1333_v40 = vld [vmem:[%s1562_s6 + $0x88] sm:$0xff]   ;;  %v1337_v44 = vld [vmem:[%s1562_s6 + $0x90] sm:$0xff]  }
  0x3b   : > { %1238 = vmatpush3.bf16.msra.mxu1 %v1329_v36  ;;  %1175 = vmatprep.subr.bf16.mxu0 %v1330_v37  ;;  %v1338_v45 = vld [vmem:[%s1562_s6 + $0x58] sm:$0xff]   ;;  %v1342_v49 = vld [vmem:[%s1562_s6 + $0x60] sm:$0xff]   ;;  %v1346_v53 = vld [vmem:[%s1562_s6 + $0x68] sm:$0xff]  }
  0x3c   : > { %1239 = vmatprep.subr.bf16.mxu1 %v1331_v38  ;;  %v1339_v46 = vld [vmem:[%s1562_s6 + $0xd8] sm:$0xff]   ;;  %v1343_v50 = vld [vmem:[%s1562_s6 + $0xe0] sm:$0xff]   ;;  %v1347_v54 = vld [vmem:[%s1562_s6 + $0xe8] sm:$0xff]  }
  0x3d   : > { %v1340_v47 = vld [vmem:[%s1562_s6 + $0x18] sm:$0xff]   ;;  %v1344_v51 = vld [vmem:[%s1562_s6 + $0x20] sm:$0xff]   ;;  %v1348_v55 = vld [vmem:[%s1562_s6 + $0x28] sm:$0xff]  }
  0x3e   : > { %1176 = vmatpush3.bf16.msra.mxu0 %v1332_v39  ;;  %v1341_v48 = vld [vmem:[%s1562_s6 + $0x98] sm:$0xff]   ;;  %v1345_v52 = vld [vmem:[%s1562_s6 + $0xa0] sm:$0xff]   ;;  %v1349_v56 = vld [vmem:[%s1562_s6 + $0xa8] sm:$0xff]  }
  0x3f   : > { %1240 = vmatpush3.bf16.msra.mxu1 %v1333_v40  ;;  %1177 = vmatprep.subr.bf16.mxu0 %v1334_v41  ;;  %v1350_v57 = vld [vmem:[%s1562_s6 + $0x70] sm:$0xff]   ;;  %v1354_v61 = vld [vmem:[%s1562_s6 + $0x78] sm:$0xff]  }
  0x40   : > { %1241 = vmatprep.subr.bf16.mxu1 %v1335_v42  ;;  %v1351_v58 = vld [vmem:[%s1562_s6 + $0xf0] sm:$0xff]   ;;  %v1355_v62 = vld [vmem:[%s1562_s6 + $0xf8] sm:$0xff]   ;;  %v282_v42 = vld [vmem:[%s1888_s3] sm:$0xff] }
  0x41   : > { %v1352_v59 = vld [vmem:[%s1562_s6 + $0x30] sm:$0xff]   ;;  %v1356_v63 = vld [vmem:[%s1562_s6 + $0x38] sm:$0xff]  }
  0x42   : > { %1178 = vmatpush3.bf16.msra.mxu0 %v1336_v43  ;;  %v1353_v60 = vld [vmem:[%s1562_s6 + $0xb0] sm:$0xff]   ;;  %v1357_v0 = vld [vmem:[%s1562_s6 + $0xb8] sm:$0xff]  }
  0x43   : > { %1242 = vmatpush3.bf16.msra.mxu1 %v1337_v44  ;;  %1179 = vmatprep.subr.bf16.mxu0 %v1338_v45  ;;  %v1358_v1 = vld [vmem:[%s1564_s7] ss:$16 sps:$4 sm:$0xff]   ;;  %v1360_v2 = vld [vmem:[%s1564_s7 + $0x4] ss:$16 sps:$4 sm:$0xff]   ;;  %v1361_v3 = vld [vmem:[%s1564_s7 + $0x8] ss:$16 sps:$4 sm:$0xff]  }
  0x44   : > { %1243 = vmatprep.subr.bf16.mxu1 %v1339_v46  ;;  %v1363_v4 = vld [vmem:[%s1564_s7 + $0xc] ss:$16 sps:$4 sm:$0xff]   ;;  %778 = vmatprep.mubr.bf16.mxu0 %v1360_v2  ;;  %v1364_v5 = vld [vmem:[%s1564_s7 + $0x24] ss:$16 sps:$4 sm:$0xff]   ;;  %v1368_v7 = vld [vmem:[%s1564_s7 + $0x20] ss:$16 sps:$4 sm:$0xff]  }
  0x45   : > { %875 = vmatprep.mubr.bf16.mxu1 %v1363_v4  ;;  %v1366_v6 = vld [vmem:[%s1564_s7 + $0x2c] ss:$16 sps:$4 sm:$0xff]   ;;  %v1369_v8 = vld [vmem:[%s1564_s7 + $0x28] ss:$16 sps:$4 sm:$0xff]   ;;  %v1370_v9 = vld [vmem:[%s1564_s7 + $0x44] ss:$16 sps:$4 sm:$0xff]  }
  0x46   : > { %1180 = vmatpush3.bf16.msra.mxu0 %v1340_v47  ;;  %v1372_v10 = vld [vmem:[%s1564_s7 + $0x4c] ss:$16 sps:$4 sm:$0xff]   ;;  %v1374_v11 = vld [vmem:[%s1564_s7 + $0x40] ss:$16 sps:$4 sm:$0xff]   ;;  %v1375_v12 = vld [vmem:[%s1564_s7 + $0x48] ss:$16 sps:$4 sm:$0xff]  }
  0x47   : > { %1244 = vmatpush3.bf16.msra.mxu1 %v1341_v48  ;;  %1181 = vmatprep.subr.bf16.mxu0 %v1342_v49  ;;  %v1376_v13 = vld [vmem:[%s1564_s7 + $0x64] ss:$16 sps:$4 sm:$0xff]   ;;  %v1378_v14 = vld [vmem:[%s1564_s7 + $0x6c] ss:$16 sps:$4 sm:$0xff]   ;;  %v1380_v15 = vld [vmem:[%s1564_s7 + $0x60] ss:$16 sps:$4 sm:$0xff]  }
  0x48   : > { %1245 = vmatprep.subr.bf16.mxu1 %v1343_v50  ;;  %v1381_v16 = vld [vmem:[%s1564_s7 + $0x68] ss:$16 sps:$4 sm:$0xff]   ;;  %v1382_v17 = vld [vmem:[%s1564_s7 + $0x84] ss:$16 sps:$4 sm:$0xff]   ;;  %v1384_v18 = vld [vmem:[%s1564_s7 + $0x8c] ss:$16 sps:$4 sm:$0xff]  }
  0x49   : > { %v1386_v19 = vld [vmem:[%s1564_s7 + $0x80] ss:$16 sps:$4 sm:$0xff]   ;;  %v1387_v20 = vld [vmem:[%s1564_s7 + $0x88] ss:$16 sps:$4 sm:$0xff]   ;;  %v1388_v21 = vld [vmem:[%s1564_s7 + $0xa4] ss:$16 sps:$4 sm:$0xff]  }
  0x4a   : > { %1182 = vmatpush3.bf16.msra.mxu0 %v1344_v51  ;;  %v1390_v22 = vld [vmem:[%s1564_s7 + $0xac] ss:$16 sps:$4 sm:$0xff]   ;;  %v1392_v23 = vld [vmem:[%s1564_s7 + $0xa0] ss:$16 sps:$4 sm:$0xff]   ;;  %v1393_v24 = vld [vmem:[%s1564_s7 + $0xa8] ss:$16 sps:$4 sm:$0xff]  }
  0x4b   : > { %1246 = vmatpush3.bf16.msra.mxu1 %v1345_v52  ;;  %1183 = vmatprep.subr.bf16.mxu0 %v1346_v53  ;;  %v1394_v25 = vld [vmem:[%s1564_s7 + $0xc4] ss:$16 sps:$4 sm:$0xff]   ;;  %v1396_v26 = vld [vmem:[%s1564_s7 + $0xcc] ss:$16 sps:$4 sm:$0xff]   ;;  %v1398_v27 = vld [vmem:[%s1564_s7 + $0xc0] ss:$16 sps:$4 sm:$0xff]  }
  0x4c   : > { %1247 = vmatprep.subr.bf16.mxu1 %v1347_v54  ;;  %v1399_v28 = vld [vmem:[%s1564_s7 + $0xc8] ss:$16 sps:$4 sm:$0xff]   ;;  %v1400_v29 = vld [vmem:[%s1564_s7 + $0xe4] ss:$16 sps:$4 sm:$0xff]   ;;  %v1402_v30 = vld [vmem:[%s1564_s7 + $0xec] ss:$16 sps:$4 sm:$0xff]  }
  0x4d   : > { %v1404_v31 = vld [vmem:[%s1564_s7 + $0xe0] ss:$16 sps:$4 sm:$0xff]   ;;  %v1405_v32 = vld [vmem:[%s1564_s7 + $0xe8] ss:$16 sps:$4 sm:$0xff]  }
  0x4e   : > { %1184 = vmatpush3.bf16.msra.mxu0 %v1348_v55  ;;  %v283_v47 = vld [vmem:[%s1888_s3 + $0x8] sm:$0xff] }
  0x4f   : > { %1248 = vmatpush3.bf16.msra.mxu1 %v1349_v56  ;;  %1185 = vmatprep.subr.bf16.mxu0 %v1350_v57 }
  0x50   : > { %1249 = vmatprep.subr.bf16.mxu1 %v1351_v58 }
  0x52   : > { %1186 = vmatpush3.bf16.msra.mxu0 %v1352_v59 }
  0x53   : > { %1250 = vmatpush3.bf16.msra.mxu1 %v1353_v60  ;;  %1187 = vmatprep.subr.bf16.mxu0 %v1354_v61  ;;  %v284_v60 = vld [vmem:[%s1888_s3 + $0x10] sm:$0xff] }
  0x54   : > { %1251 = vmatprep.subr.bf16.mxu1 %v1355_v62 }
  0x56   : > { %1188 = vmatpush3.bf16.msra.mxu0 %v1356_v63 }
  0x57   : > { %1252 = vmatpush3.bf16.msra.mxu1 %v1357_v0 }
  0x59   : > { %779 = vmatmul.mubr.bf16.vlgmr.msra.gmra.mrb[0].mxu0 %v1358_v1  ;;  %v285_v1 = vld [vmem:[%s1888_s3 + $0x18] sm:$0xff] }
  0x5a   : > { %876 = vmatmul.mubr.bf16.vlgmr.msra.gmra.mrb[0].mxu1 %v1361_v3  ;;  %786 = vmatprep.mubr.bf16.mxu0 %v1364_v5 }
  0x5b   : > { %883 = vmatprep.mubr.bf16.mxu1 %v1366_v6 }
  0x61   : > { %787 = vmatmul.mubr.bf16.gmra.mrb[4].mxu0 %v1368_v7 }
  0x62   : > { %884 = vmatmul.mubr.bf16.gmra.mrb[4].mxu1 %v1369_v8  ;;  %794 = vmatprep.mubr.bf16.mxu0 %v1370_v9 }
  0x63   : > { %891 = vmatprep.mubr.bf16.mxu1 %v1372_v10 }
  0x69   : > { %795 = vmatmul.mubr.bf16.gmra.mrb[8].mxu0 %v1374_v11 }
  0x6a   : > { %892 = vmatmul.mubr.bf16.gmra.mrb[8].mxu1 %v1375_v12  ;;  %802 = vmatprep.mubr.bf16.mxu0 %v1376_v13 }
  0x6b   : > { %899 = vmatprep.mubr.bf16.mxu1 %v1378_v14  ;;  %v286_v14 = vld [vmem:[%s1888_s3 + $0x20] sm:$0xff] }
  0x71   : > { %803 = vmatmul.mubr.bf16.gmra.mrb[12].mxu0 %v1380_v15 }
  0x72   : > { %900 = vmatmul.mubr.bf16.gmra.mrb[12].mxu1 %v1381_v16  ;;  %810 = vmatprep.mubr.bf16.mxu0 %v1382_v17 }
  0x73   : > { %907 = vmatprep.mubr.bf16.mxu1 %v1384_v18 }
  0x79   : > { %811 = vmatmul.mubr.bf16.gmra.mrb[16].mxu0 %v1386_v19  ;;  %v287_v19 = vld [vmem:[%s1888_s3 + $0x28] sm:$0xff] }
  0x7a   : > { %908 = vmatmul.mubr.bf16.gmra.mrb[16].mxu1 %v1387_v20  ;;  %818 = vmatprep.mubr.bf16.mxu0 %v1388_v21 }
  0x7b   : > { %915 = vmatprep.mubr.bf16.mxu1 %v1390_v22 }
  0x81   : > { %819 = vmatmul.mubr.bf16.gmra.mrb[20].mxu0 %v1392_v23 }
  0x82   : > { %916 = vmatmul.mubr.bf16.gmra.mrb[20].mxu1 %v1393_v24  ;;  %826 = vmatprep.mubr.bf16.mxu0 %v1394_v25 }
  0x83   : > { %923 = vmatprep.mubr.bf16.mxu1 %v1396_v26 }
  0x89   : > { %827 = vmatmul.mubr.bf16.gmra.mrb[24].mxu0 %v1398_v27 }
  0x8a   : > { %924 = vmatmul.mubr.bf16.gmra.mrb[24].mxu1 %v1399_v28  ;;  %834 = vmatprep.mubr.bf16.mxu0 %v1400_v29 }
  0x8b   : > { %931 = vmatprep.mubr.bf16.mxu1 %v1402_v30 }
  0x91   : > { %835 = vmatmul.mubr.bf16.gmra.mrb[28].mxu0 %v1404_v31 }
  0x92   : > { %932 = vmatmul.mubr.bf16.gmra.mrb[28].mxu1 %v1405_v32  ;;  %v288_v32 = vld [vmem:[%s1888_s3 + $0x30] sm:$0xff] }
 0x12c   : > { %v1189_v33 = vpop.f32.mrb[0].mxu0 }
 0x12d   : > { %v1253_v34 = vpop.f32.mrb[0].mxu1  ;;  %v1190_v35 = vpop.f32.mrb[1].mxu0 }
 0x12e   : > { %v1191_v36 = vadd.f32 %v1190_v35, %v1189_v33  ;;  %v1254_v37 = vpop.f32.mrb[1].mxu1  ;;  %v1192_v38 = vpop.f32.mrb[2].mxu0 }
 0x12f   : > { %v1255_v39 = vadd.f32 %v1254_v37, %v1253_v34  ;;  %v1256_v40 = vpop.f32.mrb[2].mxu1  ;;  %v1193_v41 = vpop.f32.mrb[3].mxu0  ;;  %v289_v37 = vld [vmem:[%s1888_s3 + $0x38] sm:$0xff] }
 0x130   : > { %v1194_v43 = vadd.f32 %v1193_v41, %v1192_v38  ;;  %v1257_v44 = vpop.f32.mrb[3].mxu1 }
 0x131   : > { %v878_v45 = vadd.f32 %v1255_v39, %v1191_v36  ;;  %v1258_v46 = vadd.f32 %v1257_v44, %v1256_v40 }
 0x133   : > { %v940_v48 = vadd.f32 %v878_v45, %v282_v42  ;;  %v881_v49 = vadd.f32 %v1258_v46, %v1194_v43 }
 0x134   : > { %v1195_v50 = vpop.f32.mrb[4].mxu0 }
 0x135   : > { %956 = vst [vmem:[%s1888_s3] sm:$0xff] %v940_v48  ;;  %v941_v51 = vadd.f32 %v881_v49, %v283_v47  ;;  %v1259_v52 = vpop.f32.mrb[4].mxu1  ;;  %v1196_v53 = vpop.f32.mrb[5].mxu0 }
 0x136   : > { %v1197_v54 = vadd.f32 %v1196_v53, %v1195_v50  ;;  %v1260_v55 = vpop.f32.mrb[5].mxu1  ;;  %v1198_v56 = vpop.f32.mrb[6].mxu0  ;;  %v290_v50 = vld [vmem:[%s1888_s3 + $0x40] sm:$0xff] }
 0x137   : > { %957 = vst [vmem:[%s1888_s3 + $0x8] sm:$0xff] %v941_v51  ;;  %v1261_v57 = vadd.f32 %v1260_v55, %v1259_v52  ;;  %v1262_v58 = vpop.f32.mrb[6].mxu1  ;;  %v1199_v59 = vpop.f32.mrb[7].mxu0  ;;  %v291_v55 = vld [vmem:[%s1888_s3 + $0x48] sm:$0xff] }
 0x138   : > { %v1200_v61 = vadd.f32 %v1199_v59, %v1198_v56  ;;  %v1263_v62 = vpop.f32.mrb[7].mxu1 }
 0x139   : > { %v886_v63 = vadd.f32 %v1261_v57, %v1197_v54  ;;  %v1264_v0 = vadd.f32 %v1263_v62, %v1262_v58 }
 0x13b   : > { %v942_v2 = vadd.f32 %v886_v63, %v284_v60  ;;  %v889_v3 = vadd.f32 %v1264_v0, %v1200_v61 }
 0x13c   : > { %v1201_v4 = vpop.f32.mrb[8].mxu0 }
 0x13d   : > { %958 = vst [vmem:[%s1888_s3 + $0x10] sm:$0xff] %v942_v2  ;;  %v943_v5 = vadd.f32 %v889_v3, %v285_v1  ;;  %v1265_v6 = vpop.f32.mrb[8].mxu1  ;;  %v1202_v7 = vpop.f32.mrb[9].mxu0 }
 0x13e   : > { %v1203_v8 = vadd.f32 %v1202_v7, %v1201_v4  ;;  %v1266_v9 = vpop.f32.mrb[9].mxu1  ;;  %v1204_v10 = vpop.f32.mrb[10].mxu0  ;;  %v292_v4 = vld [vmem:[%s1888_s3 + $0x50] sm:$0xff] }
 0x13f   : > { %959 = vst [vmem:[%s1888_s3 + $0x18] sm:$0xff] %v943_v5  ;;  %v1267_v11 = vadd.f32 %v1266_v9, %v1265_v6  ;;  %v1268_v12 = vpop.f32.mrb[10].mxu1  ;;  %v1205_v13 = vpop.f32.mrb[11].mxu0  ;;  %v293_v9 = vld [vmem:[%s1888_s3 + $0x58] sm:$0xff] }
 0x140   : > { %v1206_v15 = vadd.f32 %v1205_v13, %v1204_v10  ;;  %v1269_v16 = vpop.f32.mrb[11].mxu1 }
 0x141   : > { %v894_v17 = vadd.f32 %v1267_v11, %v1203_v8  ;;  %v1270_v18 = vadd.f32 %v1269_v16, %v1268_v12 }
 0x143   : > { %v944_v20 = vadd.f32 %v894_v17, %v286_v14  ;;  %v897_v21 = vadd.f32 %v1270_v18, %v1206_v15 }
 0x144   : > { %v1207_v22 = vpop.f32.mrb[12].mxu0 }
 0x145   : > { %960 = vst [vmem:[%s1888_s3 + $0x20] sm:$0xff] %v944_v20  ;;  %v945_v23 = vadd.f32 %v897_v21, %v287_v19  ;;  %v1271_v24 = vpop.f32.mrb[12].mxu1  ;;  %v1208_v25 = vpop.f32.mrb[13].mxu0 }
 0x146   : > { %v1209_v26 = vadd.f32 %v1208_v25, %v1207_v22  ;;  %v1272_v27 = vpop.f32.mrb[13].mxu1  ;;  %v1210_v28 = vpop.f32.mrb[14].mxu0  ;;  %v294_v22 = vld [vmem:[%s1888_s3 + $0x60] sm:$0xff] }
 0x147   : > { %961 = vst [vmem:[%s1888_s3 + $0x28] sm:$0xff] %v945_v23  ;;  %v1273_v29 = vadd.f32 %v1272_v27, %v1271_v24  ;;  %v1274_v30 = vpop.f32.mrb[14].mxu1  ;;  %v1211_v31 = vpop.f32.mrb[15].mxu0  ;;  %v295_v27 = vld [vmem:[%s1888_s3 + $0x68] sm:$0xff] }
 0x148   : > { %v1212_v33 = vadd.f32 %v1211_v31, %v1210_v28  ;;  %v1275_v34 = vpop.f32.mrb[15].mxu1 }
 0x149   : > { %v902_v35 = vadd.f32 %v1273_v29, %v1209_v26  ;;  %v1276_v36 = vadd.f32 %v1275_v34, %v1274_v30 }
 0x14b   : > { %v946_v38 = vadd.f32 %v902_v35, %v288_v32  ;;  %v905_v39 = vadd.f32 %v1276_v36, %v1212_v33 }
 0x14c   : > { %v1213_v40 = vpop.f32.mrb[16].mxu0 }
 0x14d   : > { %962 = vst [vmem:[%s1888_s3 + $0x30] sm:$0xff] %v946_v38  ;;  %v947_v41 = vadd.f32 %v905_v39, %v289_v37  ;;  %v1277_v42 = vpop.f32.mrb[16].mxu1  ;;  %v1214_v43 = vpop.f32.mrb[17].mxu0 }
 0x14e   : > { %v1215_v44 = vadd.f32 %v1214_v43, %v1213_v40  ;;  %v1278_v45 = vpop.f32.mrb[17].mxu1  ;;  %v1216_v46 = vpop.f32.mrb[18].mxu0  ;;  %v296_v40 = vld [vmem:[%s1888_s3 + $0x70] sm:$0xff] }
 0x14f   : > { %963 = vst [vmem:[%s1888_s3 + $0x38] sm:$0xff] %v947_v41  ;;  %v1279_v47 = vadd.f32 %v1278_v45, %v1277_v42  ;;  %v1280_v48 = vpop.f32.mrb[18].mxu1  ;;  %v1217_v49 = vpop.f32.mrb[19].mxu0  ;;  %v297_v45 = vld [vmem:[%s1888_s3 + $0x78] sm:$0xff] }
 0x150   : > { %v1218_v51 = vadd.f32 %v1217_v49, %v1216_v46  ;;  %v1281_v52 = vpop.f32.mrb[19].mxu1  ;;  %v976_v49 = vld [vmem:[%s1888_s3] sm:$0xff] (!%p1168_p10) }
 0x151   : > { %v910_v53 = vadd.f32 %v1279_v47, %v1215_v44  ;;  %v1282_v54 = vadd.f32 %v1281_v52, %v1280_v48 }
 0x153   : > { %v948_v56 = vadd.f32 %v910_v53, %v290_v50  ;;  %v913_v57 = vadd.f32 %v1282_v54, %v1218_v51  ;;  %v1169_v50 = vld [vmem:[%s1887_s2] ss:$0 sm:$0xff] (!%p1168_p10)  ;;  %v977_v51 = vld [vmem:[%s1888_s3 + $0x8] sm:$0xff] (!%p1168_p10)  ;;  %v978_v54 = vld [vmem:[%s1888_s3 + $0x10] sm:$0xff] (!%p1168_p10) }
 0x154   : > { %v1219_v58 = vpop.f32.mrb[20].mxu0  ;;  %v999_v52 = vadd.f32 (!%p1168_p10), %v1169_v50, %v976_v49  ;;  %v1000_v53 = vadd.f32 (!%p1168_p10), %v1169_v50, %v977_v51 }
 0x155   : > { %964 = vst [vmem:[%s1888_s3 + $0x40] sm:$0xff] %v948_v56  ;;  %v949_v59 = vadd.f32 %v913_v57, %v291_v55  ;;  %v1283_v60 = vpop.f32.mrb[20].mxu1  ;;  %v1220_v61 = vpop.f32.mrb[21].mxu0  ;;  %v979_v55 = vld [vmem:[%s1888_s3 + $0x18] sm:$0xff] (!%p1168_p10)  ;;  %v980_v56 = vld [vmem:[%s1888_s3 + $0x20] sm:$0xff] (!%p1168_p10)  ;;  %v1001_v57 = vadd.f32 (!%p1168_p10), %v1169_v50, %v978_v54 }
 0x156   : > { %v1221_v62 = vadd.f32 %v1220_v61, %v1219_v58  ;;  %v1284_v63 = vpop.f32.mrb[21].mxu1  ;;  %v1222_v0 = vpop.f32.mrb[22].mxu0  ;;  %v1002_v58 = vadd.f32 (!%p1168_p10), %v1169_v50, %v979_v55  ;;  %v982_v61 = vld [vmem:[%s1888_s3 + $0x30] sm:$0xff] (!%p1168_p10) }
 0x157   : > { %965 = vst [vmem:[%s1888_s3 + $0x48] sm:$0xff] %v949_v59  ;;  %v1285_v1 = vadd.f32 %v1284_v63, %v1283_v60  ;;  %v1286_v2 = vpop.f32.mrb[22].mxu1  ;;  %v1223_v3 = vpop.f32.mrb[23].mxu0  ;;  %v1003_v59 = vadd.f32 (!%p1168_p10), %v1169_v50, %v980_v56  ;;  %v981_v60 = vld [vmem:[%s1888_s3 + $0x28] sm:$0xff] (!%p1168_p10)  ;;  %v1015_v63 = vmax.f32 (!%p1168_p10), %v999_v52, 0.0 }
 0x158   : > { %v1224_v5 = vadd.f32 %v1223_v3, %v1222_v0  ;;  %v1287_v6 = vpop.f32.mrb[23].mxu1  ;;  %v1016_v0 = vmax.f32 (!%p1168_p10), %v1000_v53, 0.0 }
 0x159   : > { %v918_v7 = vadd.f32 %v1285_v1, %v1221_v62  ;;  %v1288_v8 = vadd.f32 %v1287_v6, %v1286_v2  ;;  %v983_v62 = vld [vmem:[%s1888_s3 + $0x38] sm:$0xff] (!%p1168_p10)  ;;  %v1004_v1 = vadd.f32 (!%p1168_p10), %v1169_v50, %v981_v60  ;;  %v1005_v2 = vadd.f32 (!%p1168_p10), %v1169_v50, %v982_v61  ;;  %1031 = vst [vmem:[%s1888_s3] sm:$0xff] (!%p1168_p10), %v1015_v63 }
 0x15a   : > { %v1017_v6 = vmax.f32 (!%p1168_p10), %v1001_v57, 0.0  ;;  %1032 = vst [vmem:[%s1888_s3 + $0x8] sm:$0xff] (!%p1168_p10), %v1016_v0 }
 0x15b   : > { %v950_v10 = vadd.f32 %v918_v7, %v292_v4  ;;  %v921_v11 = vadd.f32 %v1288_v8, %v1224_v5  ;;  %v1018_v7 = vmax.f32 (!%p1168_p10), %v1002_v58, 0.0  ;;  %v1019_v8 = vmax.f32 (!%p1168_p10), %v1003_v59, 0.0 }
 0x15c   : > { %v1225_v12 = vpop.f32.mrb[24].mxu0  ;;  %v984_v3 = vld [vmem:[%s1888_s3 + $0x40] sm:$0xff] (!%p1168_p10)  ;;  %1033 = vst [vmem:[%s1888_s3 + $0x10] sm:$0xff] (!%p1168_p10), %v1017_v6 }
 0x15d   : > { %966 = vst [vmem:[%s1888_s3 + $0x50] sm:$0xff] %v950_v10  ;;  %v951_v13 = vadd.f32 %v921_v11, %v293_v9  ;;  %v1289_v14 = vpop.f32.mrb[24].mxu1  ;;  %v1226_v15 = vpop.f32.mrb[25].mxu0  ;;  %v1006_v9 = vadd.f32 (!%p1168_p10), %v1169_v50, %v983_v62  ;;  %1034 = vst [vmem:[%s1888_s3 + $0x18] sm:$0xff] (!%p1168_p10), %v1018_v7 }
 0x15e   : > { %v1227_v16 = vadd.f32 %v1226_v15, %v1225_v12  ;;  %v1290_v17 = vpop.f32.mrb[25].mxu1  ;;  %v1228_v18 = vpop.f32.mrb[26].mxu0  ;;  %v985_v4 = vld [vmem:[%s1888_s3 + $0x48] sm:$0xff] (!%p1168_p10)  ;;  %v1007_v15 = vadd.f32 (!%p1168_p10), %v1169_v50, %v984_v3  ;;  %1035 = vst [vmem:[%s1888_s3 + $0x20] sm:$0xff] (!%p1168_p10), %v1019_v8 }
 0x15f   : > { %967 = vst [vmem:[%s1888_s3 + $0x58] sm:$0xff] %v951_v13  ;;  %v1291_v19 = vadd.f32 %v1290_v17, %v1289_v14  ;;  %v1292_v20 = vpop.f32.mrb[26].mxu1  ;;  %v1229_v21 = vpop.f32.mrb[27].mxu0  ;;  %v1020_v13 = vmax.f32 (!%p1168_p10), %v1004_v1, 0.0  ;;  %v1021_v14 = vmax.f32 (!%p1168_p10), %v1005_v2, 0.0 }
 0x160   : > { %v1230_v23 = vadd.f32 %v1229_v21, %v1228_v18  ;;  %v1293_v24 = vpop.f32.mrb[27].mxu1 }
 0x161   : > { %v926_v25 = vadd.f32 %v1291_v19, %v1227_v16  ;;  %v1294_v26 = vadd.f32 %v1293_v24, %v1292_v20  ;;  %v1008_v16 = vadd.f32 (!%p1168_p10), %v1169_v50, %v985_v4  ;;  %v1022_v19 = vmax.f32 (!%p1168_p10), %v1006_v9, 0.0  ;;  %1036 = vst [vmem:[%s1888_s3 + $0x28] sm:$0xff] (!%p1168_p10), %v1020_v13  ;;  %1037 = vst [vmem:[%s1888_s3 + $0x30] sm:$0xff] (!%p1168_p10), %v1021_v14 }
 0x163   : > { %v952_v28 = vadd.f32 %v926_v25, %v294_v22  ;;  %v929_v29 = vadd.f32 %v1294_v26, %v1230_v23  ;;  %v1023_v23 = vmax.f32 (!%p1168_p10), %v1007_v15, 0.0  ;;  %v1024_v24 = vmax.f32 (!%p1168_p10), %v1008_v16, 0.0  ;;  %1038 = vst [vmem:[%s1888_s3 + $0x38] sm:$0xff] (!%p1168_p10), %v1022_v19 }
 0x164   : > { %v1231_v30 = vpop.f32.mrb[28].mxu0  ;;  %v986_v5 = vld [vmem:[%s1888_s3 + $0x50] sm:$0xff] (!%p1168_p10) }
 0x165   : > { %968 = vst [vmem:[%s1888_s3 + $0x60] sm:$0xff] %v952_v28  ;;  %v953_v31 = vadd.f32 %v929_v29, %v295_v27  ;;  %v1295_v32 = vpop.f32.mrb[28].mxu1  ;;  %v1232_v33 = vpop.f32.mrb[29].mxu0  ;;  %v1009_v20 = vadd.f32 (!%p1168_p10), %v1169_v50, %v986_v5  ;;  %1039 = vst [vmem:[%s1888_s3 + $0x40] sm:$0xff] (!%p1168_p10), %v1023_v23 }
 0x166   : > { %v1233_v34 = vadd.f32 %v1232_v33, %v1231_v30  ;;  %v1296_v35 = vpop.f32.mrb[29].mxu1  ;;  %v1234_v36 = vpop.f32.mrb[30].mxu0  ;;  %v987_v10 = vld [vmem:[%s1888_s3 + $0x58] sm:$0xff] (!%p1168_p10)  ;;  %1040 = vst [vmem:[%s1888_s3 + $0x48] sm:$0xff] (!%p1168_p10), %v1024_v24 }
 0x167   : > { %969 = vst [vmem:[%s1888_s3 + $0x68] sm:$0xff] %v953_v31  ;;  %v1297_v37 = vadd.f32 %v1296_v35, %v1295_v32  ;;  %v1298_v38 = vpop.f32.mrb[30].mxu1  ;;  %v1235_v39 = vpop.f32.mrb[31].mxu0  ;;  %v1010_v21 = vadd.f32 (!%p1168_p10), %v1169_v50, %v987_v10  ;;  %v1025_v27 = vmax.f32 (!%p1168_p10), %v1009_v20, 0.0 }
 0x168   : > { %v1236_v41 = vadd.f32 %v1235_v39, %v1234_v36  ;;  %v1299_v42 = vpop.f32.mrb[31].mxu1 }
 0x169   : > { %v934_v43 = vadd.f32 %v1297_v37, %v1233_v34  ;;  %v1300_v44 = vadd.f32 %v1299_v42, %v1298_v38  ;;  %975 = sbr.rel (%p1168_p10) target bundleno = 380 (0x17c), region = 63  ;;  %v1026_v28 = vmax.f32 (!%p1168_p10), %v1010_v21, 0.0  ;;  %1041 = vst [vmem:[%s1888_s3 + $0x50] sm:$0xff] (!%p1168_p10), %v1025_v27 }
 0x16b   : > { %v954_v46 = vadd.f32 %v934_v43, %v296_v40  ;;  %v937_v47 = vadd.f32 %v1300_v44, %v1236_v41  ;;  %1042 = vst [vmem:[%s1888_s3 + $0x58] sm:$0xff] (!%p1168_p10), %v1026_v28 }
 0x16c   : > { %v988_v11 = vld [vmem:[%s1888_s3 + $0x60] sm:$0xff] (!%p1168_p10) }
 0x16d   : > { %970 = vst [vmem:[%s1888_s3 + $0x70] sm:$0xff] %v954_v46  ;;  %v955_v48 = vadd.f32 %v937_v47, %v297_v45  ;;  %v1011_v22 = vadd.f32 (!%p1168_p10), %v1169_v50, %v988_v11 }
 0x16e   : > { %v989_v12 = vld [vmem:[%s1888_s3 + $0x68] sm:$0xff] (!%p1168_p10) }
 0x16f   : > { %971 = vst [vmem:[%s1888_s3 + $0x78] sm:$0xff] %v955_v48  ;;  %v1012_v25 = vadd.f32 (!%p1168_p10), %v1169_v50, %v989_v12  ;;  %v1027_v29 = vmax.f32 (!%p1168_p10), %v1011_v22, 0.0 }
 0x171   : > { %v1028_v31 = vmax.f32 %v1012_v25, 0.0  ;;  %1043 = vst [vmem:[%s1888_s3 + $0x60] sm:$0xff] %v1027_v29 }
 0x173   : > { %1044 = vst [vmem:[%s1888_s3 + $0x68] sm:$0xff] %v1028_v31 }
 0x174   : > { %v990_v17 = vld [vmem:[%s1888_s3 + $0x70] sm:$0xff] }
 0x175   : > { %v1013_v26 = vadd.f32 %v1169_v50, %v990_v17 }
 0x176   : > { %v991_v18 = vld [vmem:[%s1888_s3 + $0x78] sm:$0xff] }
 0x177   : > { %v1014_v30 = vadd.f32 %v1169_v50, %v991_v18  ;;  %v1029_v32 = vmax.f32 %v1013_v26, 0.0 }
 0x179   : > { %v1030_v33 = vmax.f32 %v1014_v30, 0.0  ;;  %1045 = vst [vmem:[%s1888_s3 + $0x70] sm:$0xff] %v1029_v32 }
 0x17b   : > { %1046 = vst [vmem:[%s1888_s3 + $0x78] sm:$0xff] %v1030_v33 }
 0x17c PF: > { %p10_p11 = scmp.ge.s32.totalorder %s1470_s16, 6   ;;  %s1889_s12 = smov %s1424_s13 }
 0x17d   : > { %s1890_s13 = smov %s1479_s19  ;;  %s1891_s14 = smov %s1470_s16 }
 0x17e   :  { %12 = sbr.rel (!%p10_p11) target bundleno = 2 (0x2), region = 97 }

// kernel: policy_forward.6
= control target key start
LH: loop header
LB: loop body
LE: loop exit
PB: predicated region body
PF: predicated region fallthrough
CT: control target
= control target key end

     0   :  { %s1061_s12 = smov 0   ;;  %s1063_s13 = smov 0   ;;  %s1251_s0 = inlined_call_operand.vmem [shape: bf16[16,3584], index: 0, kind: input, shape index: {}]   ;;  %s1252_s1 = inlined_call_operand.vmem [shape: bf16[3584,256], index: 1, kind: input, shape index: {}]   ;;  %s1253_s2 = inlined_call_operand.vmem [shape: f32[1,256], index: 2, kind: input, shape index: {}]   ;;  %s1254_s3 = inlined_call_operand.vmem [shape: f32[16,256], index: 3, kind: output, shape index: {}]  }
   0x1   :  { %s1065_s14 = smov 0  }
   0x2 LB: > { %s1077_s15 = sadd.s32 4294967295, %s1038_s14   ;;  %s1080_s16 = sadd.s32 1, %s1038_s14   ;;  %s1038_s14 = sphi %s1065_s14, %s1257_s14   ;;  %s1034_s13 = sphi %s1063_s13, %s1256_s13   ;;  %s1030_s12 = sphi %s1061_s12, %s1255_s12  }
   0x3   : > { %s17_s17 = ssub.s32 %s1038_s14, %s1080_s16  ;;  %s20_s18 = sadd.s32 1, %s1034_s13 }
   0x4   : > { %p18_p0 = scmp.eq.s32.totalorder %s17_s17, 0  ;;  %p27_p1 = scmp.ne.s32.totalorder %s1034_s13, %s1030_s12 }
   0x5   : > { %p28_p2 = scmp.eq.s32.totalorder %s1038_s14, 0  ;;  %p802_p4 = scmp.ge.s32.totalorder %s1038_s14, 7 }
   0x6   : > { %s1089_s19 = scalar_select %p18_p0, %s1034_s13, %s20_s18  }
   0x7   : > { %p29_p3 = por %p28_p2, %p27_p1  ;;  %124 = sbr.rel (%p802_p4) target bundleno = 21 (0x15), region = 20 }
   0xe   : > { %127 = sbr.rel (!%p29_p3) target bundleno = 21 (0x15), region = 24  ;;  %s129_s20 = sand.u32 (%p29_p3), 1, %s1034_s13  }
   0xf   : > { %s883_s21 = sshll.u32 (%p29_p3), %s1038_s14, 4  ;;  %s803_s22 = sshll.u32 (%p29_p3), %s129_s20, 5 }
  0x10   : > { %s134_s25 = scalar_lea.vmem (%p29_p3), %s1251_s0, %s883_s21  ;;  %s131_s26 = scalar_lea.vmem (%p29_p3), [#allocation2], %s803_s22 }
  0x11   : > { %v147_v0 = vld [vmem:[%s134_s25] sm:$0xff] (%p29_p3)  ;;  %v149_v1 = vld [vmem:[%s134_s25 + $0x8] sm:$0xff] (%p29_p3)  ;;  %v151_v2 = vld [vmem:[%s134_s25 + $0x70] sm:$0xff] (%p29_p3) }
  0x12   : > { %148 = vst [vmem:[%s131_s26] sm:$0xff] (%p29_p3), %v147_v0  ;;  %150 = vst [vmem:[%s131_s26 + $0x8] sm:$0xff] (%p29_p3), %v149_v1  ;;  %v153_v3 = vld [vmem:[%s134_s25 + $0x78] sm:$0xff] (%p29_p3) }
  0x13   : > { %152 = vst [vmem:[%s131_s26 + $0x10] sm:$0xff] (%p29_p3), %v151_v2  ;;  %154 = vst [vmem:[%s131_s26 + $0x18] sm:$0xff] (%p29_p3), %v153_v3 }
  0x15 PF: > { %p806_p5 = scmp.ge.s32.totalorder %s1038_s14, 1  ;;  %p169_p6 = scmp.lt.s32.totalorder %s1038_s14, 8 }
  0x17   : > { %p170_p7 = pnand %p806_p5, %p169_p6 }
  0x18   : > { %s176_s27 = sand.u32 (!%p170_p7), 1, %s1030_s12   ;;  %s808_s28 = sshll.u32 (!%p170_p7), %s1077_s15, 6 }
  0x19   : > { %173 = sbr.rel (%p170_p7) target bundleno = 337 (0x151), region = 51  ;;  %s807_s29 = sshll.u32 (!%p170_p7), %s176_s27, 5 }
  0x1a   : > { %p202_p8 = scmp.lt.s32.totalorder (!%p170_p7), %s808_s28, 447  ;;  %s1106_s7 = scalar_lea.vmem (!%p170_p7), [#allocation2], %s807_s29 }
  0x1b   : > { %p811_p9 = scmp.ne.s32.totalorder (!%p170_p7), %s1077_s15, 0 }
  0x20   : > { %s1259_s28 = smov (!%p202_p8, %s808_s28), 447  ;;  %211 = sbr.rel (%p811_p9) target bundleno = 39 (0x27), region = 59 }
  0x21   : > { %s884_s30 = sshll.u32 %s1259_s28, 3  ;;  %v1040_v4 = vmov (!%p811_p9), 0.0  }
  0x22   : > { %s1104_s6 = scalar_lea.vmem %s1252_s1, %s884_s30  ;;  %212 = vst [vmem:[%s1254_s3] sm:$0xff] (!%p811_p9), %v1040_v4  ;;  %213 = vst [vmem:[%s1254_s3 + $0x8] sm:$0xff] (!%p811_p9), %v1040_v4 }
  0x23   : > { %214 = vst [vmem:[%s1254_s3 + $0x10] sm:$0xff] (!%p811_p9), %v1040_v4  ;;  %215 = vst [vmem:[%s1254_s3 + $0x18] sm:$0xff] (!%p811_p9), %v1040_v4 }
  0x27 PF: > { %v914_v5 = vld [vmem:[%s1104_s6 + $0x4] ss:$8 sps:$4 sm:$0xff]   ;;  %v918_v7 = vld [vmem:[%s1104_s6] ss:$8 sps:$4 sm:$0xff]   ;;  %v920_v9 = vld [vmem:[%s1104_s6 + $0x14] ss:$8 sps:$4 sm:$0xff]  }
  0x28   : > { %v916_v6 = vld [vmem:[%s1104_s6 + $0x104] ss:$8 sps:$4 sm:$0xff]   ;;  %628 = vmatprep.subr.bf16.mxu1 %v914_v5  ;;  %v919_v8 = vld [vmem:[%s1104_s6 + $0x100] ss:$8 sps:$4 sm:$0xff]   ;;  %v922_v10 = vld [vmem:[%s1104_s6 + $0x114] ss:$8 sps:$4 sm:$0xff]  }
  0x29   : > { %671 = vmatprep.subr.bf16.mxu0 %v916_v6  ;;  %629 = vmatpush1.bf16.msra.mxu1 %v918_v7  ;;  %v924_v11 = vld [vmem:[%s1104_s6 + $0x10] ss:$8 sps:$4 sm:$0xff]   ;;  %v926_v13 = vld [vmem:[%s1104_s6 + $0x24] ss:$8 sps:$4 sm:$0xff]   ;;  %v930_v15 = vld [vmem:[%s1104_s6 + $0x20] ss:$8 sps:$4 sm:$0xff]  }
  0x2a   : > { %672 = vmatpush1.bf16.msra.mxu0 %v919_v8  ;;  %630 = vmatprep.subr.bf16.mxu1 %v920_v9  ;;  %v925_v12 = vld [vmem:[%s1104_s6 + $0x110] ss:$8 sps:$4 sm:$0xff]   ;;  %v928_v14 = vld [vmem:[%s1104_s6 + $0x124] ss:$8 sps:$4 sm:$0xff]   ;;  %v931_v16 = vld [vmem:[%s1104_s6 + $0x120] ss:$8 sps:$4 sm:$0xff]  }
  0x2b   : > { %673 = vmatprep.subr.bf16.mxu0 %v922_v10  ;;  %v932_v17 = vld [vmem:[%s1104_s6 + $0x34] ss:$8 sps:$4 sm:$0xff]   ;;  %v936_v19 = vld [vmem:[%s1104_s6 + $0x30] ss:$8 sps:$4 sm:$0xff]   ;;  %v938_v21 = vld [vmem:[%s1104_s6 + $0x44] ss:$8 sps:$4 sm:$0xff]  }
  0x2c   : > { %v934_v18 = vld [vmem:[%s1104_s6 + $0x134] ss:$8 sps:$4 sm:$0xff]   ;;  %v937_v20 = vld [vmem:[%s1104_s6 + $0x130] ss:$8 sps:$4 sm:$0xff]   ;;  %v940_v22 = vld [vmem:[%s1104_s6 + $0x144] ss:$8 sps:$4 sm:$0xff]  }
  0x2d   : > { %631 = vmatpush1.bf16.msra.mxu1 %v924_v11  ;;  %v942_v23 = vld [vmem:[%s1104_s6 + $0x40] ss:$8 sps:$4 sm:$0xff]   ;;  %v944_v25 = vld [vmem:[%s1104_s6 + $0x54] ss:$8 sps:$4 sm:$0xff]   ;;  %v948_v27 = vld [vmem:[%s1104_s6 + $0x50] ss:$8 sps:$4 sm:$0xff]  }
  0x2e   : > { %674 = vmatpush1.bf16.msra.mxu0 %v925_v12  ;;  %632 = vmatprep.subr.bf16.mxu1 %v926_v13  ;;  %v943_v24 = vld [vmem:[%s1104_s6 + $0x140] ss:$8 sps:$4 sm:$0xff]   ;;  %v946_v26 = vld [vmem:[%s1104_s6 + $0x154] ss:$8 sps:$4 sm:$0xff]   ;;  %v949_v28 = vld [vmem:[%s1104_s6 + $0x150] ss:$8 sps:$4 sm:$0xff]  }
  0x2f   : > { %675 = vmatprep.subr.bf16.mxu0 %v928_v14  ;;  %v950_v29 = vld [vmem:[%s1104_s6 + $0x64] ss:$8 sps:$4 sm:$0xff]   ;;  %v954_v31 = vld [vmem:[%s1104_s6 + $0x60] ss:$8 sps:$4 sm:$0xff]   ;;  %v956_v33 = vld [vmem:[%s1104_s6 + $0x74] ss:$8 sps:$4 sm:$0xff]  }
  0x30   : > { %v952_v30 = vld [vmem:[%s1104_s6 + $0x164] ss:$8 sps:$4 sm:$0xff]   ;;  %v955_v32 = vld [vmem:[%s1104_s6 + $0x160] ss:$8 sps:$4 sm:$0xff]   ;;  %v958_v34 = vld [vmem:[%s1104_s6 + $0x174] ss:$8 sps:$4 sm:$0xff]  }
  0x31   : > { %633 = vmatpush1.bf16.msra.mxu1 %v930_v15  ;;  %v960_v35 = vld [vmem:[%s1104_s6 + $0x70] ss:$8 sps:$4 sm:$0xff]   ;;  %v962_v37 = vld [vmem:[%s1104_s6 + $0x84] ss:$8 sps:$4 sm:$0xff]   ;;  %v966_v39 = vld [vmem:[%s1104_s6 + $0x80] ss:$8 sps:$4 sm:$0xff]  }
  0x32   : > { %676 = vmatpush1.bf16.msra.mxu0 %v931_v16  ;;  %634 = vmatprep.subr.bf16.mxu1 %v932_v17  ;;  %v961_v36 = vld [vmem:[%s1104_s6 + $0x170] ss:$8 sps:$4 sm:$0xff]   ;;  %v964_v38 = vld [vmem:[%s1104_s6 + $0x184] ss:$8 sps:$4 sm:$0xff]   ;;  %v967_v40 = vld [vmem:[%s1104_s6 + $0x180] ss:$8 sps:$4 sm:$0xff]  }
  0x33   : > { %677 = vmatprep.subr.bf16.mxu0 %v934_v18  ;;  %v968_v41 = vld [vmem:[%s1104_s6 + $0x94] ss:$8 sps:$4 sm:$0xff]   ;;  %v972_v43 = vld [vmem:[%s1104_s6 + $0x90] ss:$8 sps:$4 sm:$0xff]   ;;  %v974_v45 = vld [vmem:[%s1104_s6 + $0xa4] ss:$8 sps:$4 sm:$0xff]  }
  0x34   : > { %v970_v42 = vld [vmem:[%s1104_s6 + $0x194] ss:$8 sps:$4 sm:$0xff]   ;;  %v973_v44 = vld [vmem:[%s1104_s6 + $0x190] ss:$8 sps:$4 sm:$0xff]   ;;  %v976_v46 = vld [vmem:[%s1104_s6 + $0x1a4] ss:$8 sps:$4 sm:$0xff]  }
  0x35   : > { %635 = vmatpush1.bf16.msra.mxu1 %v936_v19  ;;  %v978_v47 = vld [vmem:[%s1104_s6 + $0xa0] ss:$8 sps:$4 sm:$0xff]   ;;  %v980_v49 = vld [vmem:[%s1104_s6 + $0xb4] ss:$8 sps:$4 sm:$0xff]   ;;  %v984_v51 = vld [vmem:[%s1104_s6 + $0xb0] ss:$8 sps:$4 sm:$0xff]  }
  0x36   : > { %678 = vmatpush1.bf16.msra.mxu0 %v937_v20  ;;  %636 = vmatprep.subr.bf16.mxu1 %v938_v21  ;;  %v979_v48 = vld [vmem:[%s1104_s6 + $0x1a0] ss:$8 sps:$4 sm:$0xff]   ;;  %v982_v50 = vld [vmem:[%s1104_s6 + $0x1b4] ss:$8 sps:$4 sm:$0xff]   ;;  %v985_v53 = vld [vmem:[%s1104_s6 + $0x1b0] ss:$8 sps:$4 sm:$0xff]  }
  0x37   : > { %679 = vmatprep.subr.bf16.mxu0 %v940_v22  ;;  %v1012_v52 = vld [vmem:[%s1106_s7 + $0x4] ss:$16 sps:$4 sm:$0xff]   ;;  %v1015_v56 = vld [vmem:[%s1106_s7 + $0xc] ss:$16 sps:$4 sm:$0xff]   ;;  %v990_v57 = vld [vmem:[%s1104_s6 + $0xc0] ss:$8 sps:$4 sm:$0xff]  }
  0x38   : > { %v986_v54 = vld [vmem:[%s1104_s6 + $0xc4] ss:$8 sps:$4 sm:$0xff]   ;;  %660 = vmatprep.mubr.bf16.mxu1 %v1012_v52  ;;  %703 = vmatprep.mubr.bf16.mxu0 %v1015_v56  ;;  %v991_v58 = vld [vmem:[%s1104_s6 + $0x1c0] ss:$8 sps:$4 sm:$0xff]   ;;  %v992_v59 = vld [vmem:[%s1104_s6 + $0xd4] ss:$8 sps:$4 sm:$0xff]  }
  0x39   : > { %637 = vmatpush1.bf16.msra.mxu1 %v942_v23  ;;  %v988_v55 = vld [vmem:[%s1104_s6 + $0x1c4] ss:$8 sps:$4 sm:$0xff]   ;;  %v994_v60 = vld [vmem:[%s1104_s6 + $0x1d4] ss:$8 sps:$4 sm:$0xff]   ;;  %v996_v61 = vld [vmem:[%s1104_s6 + $0xd0] ss:$8 sps:$4 sm:$0xff]  }
  0x3a   : > { %680 = vmatpush1.bf16.msra.mxu0 %v943_v24  ;;  %638 = vmatprep.subr.bf16.mxu1 %v944_v25  ;;  %v997_v62 = vld [vmem:[%s1104_s6 + $0x1d0] ss:$8 sps:$4 sm:$0xff]   ;;  %v998_v63 = vld [vmem:[%s1104_s6 + $0xe4] ss:$8 sps:$4 sm:$0xff]   ;;  %v1002_v1 = vld [vmem:[%s1104_s6 + $0xe0] ss:$8 sps:$4 sm:$0xff]  }
  0x3b   : > { %681 = vmatprep.subr.bf16.mxu0 %v946_v26  ;;  %v1000_v0 = vld [vmem:[%s1104_s6 + $0x1e4] ss:$8 sps:$4 sm:$0xff]   ;;  %v1003_v2 = vld [vmem:[%s1104_s6 + $0x1e0] ss:$8 sps:$4 sm:$0xff]   ;;  %v1004_v3 = vld [vmem:[%s1104_s6 + $0xf4] ss:$8 sps:$4 sm:$0xff]  }
  0x3c   : > { %v1006_v4 = vld [vmem:[%s1104_s6 + $0x1f4] ss:$8 sps:$4 sm:$0xff]   ;;  %v1008_v5 = vld [vmem:[%s1104_s6 + $0xf0] ss:$8 sps:$4 sm:$0xff]   ;;  %v216_v10 = vld [vmem:[%s1254_s3] sm:$0xff]  ;;  %p880_p10 = scmp.ne.s32.totalorder %s1077_s15, 6 }
  0x3d   : > { %639 = vmatpush1.bf16.msra.mxu1 %v948_v27  ;;  %v1009_v6 = vld [vmem:[%s1104_s6 + $0x1f0] ss:$8 sps:$4 sm:$0xff]   ;;  %v217_v14 = vld [vmem:[%s1254_s3 + $0x8] sm:$0xff] }
  0x3e   : > { %682 = vmatpush1.bf16.msra.mxu0 %v949_v28  ;;  %640 = vmatprep.subr.bf16.mxu1 %v950_v29  ;;  %v1010_v7 = vld [vmem:[%s1106_s7] ss:$16 sps:$4 sm:$0xff]   ;;  %v1013_v8 = vld [vmem:[%s1106_s7 + $0x8] ss:$16 sps:$4 sm:$0xff]   ;;  %v732_v29 = vlaneseq (!%p880_p10) }
  0x3f   : > { %683 = vmatprep.subr.bf16.mxu0 %v952_v30  ;;  %v218_v18 = vld [vmem:[%s1254_s3 + $0x10] sm:$0xff]  ;;  %v219_v23 = vld [vmem:[%s1254_s3 + $0x18] sm:$0xff] }
  0x40   : > { %v733_v30 = vshrl.u32 (!%p880_p10), %v732_v29, 7 }
  0x41   : > { %641 = vmatpush1.bf16.msra.mxu1 %v954_v31  ;;  %v730_v31 = vld [vmem:[%s1253_s2] sm:$0x3] (!%p880_p10) }
  0x42   : > { %684 = vmatpush1.bf16.msra.mxu0 %v955_v32  ;;  %642 = vmatprep.subr.bf16.mxu1 %v956_v33  ;;  %v734_v33 = vsub.s32 (!%p880_p10), 0, %v733_v30 }
  0x43   : > { %685 = vmatprep.subr.bf16.mxu0 %v958_v34  ;;  %v738_v34 = vsub.s32 (!%p880_p10), 1, %v733_v30 }
  0x45   : > { %643 = vmatpush1.bf16.msra.mxu1 %v960_v35 }
  0x46   : > { %686 = vmatpush1.bf16.msra.mxu0 %v961_v36  ;;  %644 = vmatprep.subr.bf16.mxu1 %v962_v37 }
  0x47   : > { %687 = vmatprep.subr.bf16.mxu0 %v964_v38  ;;  %v735_v38 = vrot.slane (!%p880_p10), %v730_v31, %v734_v33 }
  0x49   : > { %645 = vmatpush1.bf16.msra.mxu1 %v966_v39  ;;  %v739_v39 = vrot.slane (!%p880_p10), %v730_v31, %v738_v34 }
  0x4a   : > { %688 = vmatpush1.bf16.msra.mxu0 %v967_v40  ;;  %646 = vmatprep.subr.bf16.mxu1 %v968_v41 }
  0x4b   : > { %689 = vmatprep.subr.bf16.mxu0 %v970_v42 }
  0x4d   : > { %647 = vmatpush1.bf16.msra.mxu1 %v972_v43 }
  0x4e   : > { %690 = vmatpush1.bf16.msra.mxu0 %v973_v44  ;;  %648 = vmatprep.subr.bf16.mxu1 %v974_v45 }
  0x4f   : > { %691 = vmatprep.subr.bf16.mxu0 %v976_v46 }
  0x51   : > { %649 = vmatpush1.bf16.msra.mxu1 %v978_v47 }
  0x52   : > { %692 = vmatpush1.bf16.msra.mxu0 %v979_v48  ;;  %650 = vmatprep.subr.bf16.mxu1 %v980_v49 }
  0x53   : > { %693 = vmatprep.subr.bf16.mxu0 %v982_v50 }
  0x55   : > { %651 = vmatpush1.bf16.msra.mxu1 %v984_v51 }
  0x56   : > { %694 = vmatpush1.bf16.msra.mxu0 %v985_v53  ;;  %652 = vmatprep.subr.bf16.mxu1 %v986_v54 }
  0x57   : > { %695 = vmatprep.subr.bf16.mxu0 %v988_v55 }
  0x59   : > { %653 = vmatpush1.bf16.msra.mxu1 %v990_v57 }
  0x5a   : > { %696 = vmatpush1.bf16.msra.mxu0 %v991_v58  ;;  %654 = vmatprep.subr.bf16.mxu1 %v992_v59 }
  0x5b   : > { %697 = vmatprep.subr.bf16.mxu0 %v994_v60 }
  0x5d   : > { %655 = vmatpush1.bf16.msra.mxu1 %v996_v61 }
  0x5e   : > { %698 = vmatpush1.bf16.msra.mxu0 %v997_v62  ;;  %656 = vmatprep.subr.bf16.mxu1 %v998_v63 }
  0x5f   : > { %699 = vmatprep.subr.bf16.mxu0 %v1000_v0 }
  0x61   : > { %657 = vmatpush1.bf16.msra.mxu1 %v1002_v1 }
  0x62   : > { %700 = vmatpush1.bf16.msra.mxu0 %v1003_v2  ;;  %658 = vmatprep.subr.bf16.mxu1 %v1004_v3 }
  0x63   : > { %701 = vmatprep.subr.bf16.mxu0 %v1006_v4 }
  0x65   : > { %659 = vmatpush1.bf16.msra.mxu1 %v1008_v5 }
  0x66   : > { %702 = vmatpush1.bf16.msra.mxu0 %v1009_v6 }
  0x68   : > { %661 = vmatmul.mubr.bf16.vlgmr.msra.gmra.mrb[0].mxu1 %v1010_v7 }
  0x69   : > { %704 = vmatmul.mubr.bf16.vlgmr.msra.gmra.mrb[0].mxu0 %v1013_v8 }
 0x13b   : > { %v662_v9 = vpop.f32.mrb[0].mxu1 }
 0x13c   : > { %v705_v11 = vpop.f32.mrb[0].mxu0  ;;  %v664_v13 = vpop.f32.mrb[1].mxu1 }
 0x13d   : > { %v706_v12 = vadd.f32 %v705_v11, %v662_v9  ;;  %v707_v15 = vpop.f32.mrb[1].mxu0  ;;  %v666_v17 = vpop.f32.mrb[2].mxu1 }
 0x13e   : > { %v708_v16 = vadd.f32 %v707_v15, %v664_v13  ;;  %v709_v19 = vpop.f32.mrb[2].mxu0  ;;  %v668_v22 = vpop.f32.mrb[3].mxu1  ;;  %725 = sbr.rel (%p880_p10) target bundleno = 337 (0x151), region = 63 }
 0x13f   : > { %v714_v20 = vadd.f32 %v706_v12, %v216_v10  ;;  %v710_v21 = vadd.f32 %v709_v19, %v666_v17  ;;  %v711_v24 = vpop.f32.mrb[3].mxu0 }
 0x140   : > { %v715_v25 = vadd.f32 %v708_v16, %v217_v14  ;;  %v712_v26 = vadd.f32 %v711_v24, %v668_v22 }
 0x141   : > { %718 = vst [vmem:[%s1254_s3] sm:$0xff] %v714_v20  ;;  %v716_v27 = vadd.f32 %v710_v21, %v218_v18 }
 0x142   : > { %719 = vst [vmem:[%s1254_s3 + $0x8] sm:$0xff] %v715_v25  ;;  %v717_v28 = vadd.f32 %v712_v26, %v219_v23 }
 0x143   : > { %720 = vst [vmem:[%s1254_s3 + $0x10] sm:$0xff] %v716_v27 }
 0x144   : > { %721 = vst [vmem:[%s1254_s3 + $0x18] sm:$0xff] %v717_v28 }
 0x148   : > { %v726_v32 = vld [vmem:[%s1254_s3] sm:$0xff] }
 0x149   : > { %v727_v35 = vld [vmem:[%s1254_s3 + $0x8] sm:$0xff]  ;;  %v742_v40 = vadd.f32 %v735_v38, %v726_v32 }
 0x14a   : > { %v728_v36 = vld [vmem:[%s1254_s3 + $0x10] sm:$0xff]  ;;  %v743_v41 = vadd.f32 %v739_v39, %v727_v35 }
 0x14b   : > { %v729_v37 = vld [vmem:[%s1254_s3 + $0x18] sm:$0xff]  ;;  %v744_v42 = vadd.f32 %v735_v38, %v728_v36  ;;  %v746_v44 = vmax.f32 %v742_v40, 0.0 }
 0x14c   : > { %v745_v43 = vadd.f32 %v739_v39, %v729_v37  ;;  %v747_v45 = vmax.f32 %v743_v41, 0.0 }
 0x14d   : > { %v748_v46 = vmax.f32 %v744_v42, 0.0  ;;  %750 = vst [vmem:[%s1254_s3] sm:$0xff] %v746_v44 }
 0x14e   : > { %v749_v47 = vmax.f32 %v745_v43, 0.0  ;;  %751 = vst [vmem:[%s1254_s3 + $0x8] sm:$0xff] %v747_v45 }
 0x14f   : > { %752 = vst [vmem:[%s1254_s3 + $0x10] sm:$0xff] %v748_v46 }
 0x150   : > { %753 = vst [vmem:[%s1254_s3 + $0x18] sm:$0xff] %v749_v47 }
 0x151 PF: > { %p10_p11 = scmp.ge.s32.totalorder %s1080_s16, 9   ;;  %s1255_s12 = smov %s1034_s13 }
 0x152   : > { %s1256_s13 = smov %s1089_s19  ;;  %s1257_s14 = smov %s1080_s16 }
 0x153   :  { %12 = sbr.rel (!%p10_p11) target bundleno = 2 (0x2), region = 97 }

// kernel: policy_forward.7
= control target key start
LH: loop header
LB: loop body
LE: loop exit
PB: predicated region body
PF: predicated region fallthrough
CT: control target
= control target key end

     0   :  { %12 = vsyncpa [#allocation5], 0  ;;  %s2618_s24 = smov 0   ;;  %s2620_s25 = smov 0   ;;  %s2974_s0 = inlined_call_operand.vmem [shape: bf16[16,7168], index: 0, kind: input, shape index: {}]   ;;  %s2975_s1 = inlined_call_operand.vmem [shape: bf16[7168,512], index: 1, kind: input, shape index: {}]   ;;  %s2976_s2 = inlined_call_operand.vmem [shape: f32[1,512], index: 2, kind: input, shape index: {}]   ;;  %s2977_s3 = inlined_call_operand.vmem [shape: bf16[512,128], index: 3, kind: input, shape index: {}]   ;;  %s2978_s4 = inlined_call_operand.vmem [shape: f32[1,128], index: 4, kind: input, shape index: {}]   ;;  %s2979_s5 = inlined_call_operand.vmem [shape: bf16[128,128], index: 5, kind: input, shape index: {}]   ;;  %s2980_s6 = inlined_call_operand.vmem [shape: f32[1,128], index: 6, kind: input, shape index: {}]   ;;  %s2981_s7 = inlined_call_operand.hbm [shape: f32[2,128], index: 7, kind: output, shape index: {}]  }
   0x1   :  { %s2622_s26 = smov 0  }
   0x2 LB: > { %s2634_s27 = sadd.s32 4294967295, %s2572_s26   ;;  %s2637_s28 = sadd.s32 1, %s2572_s26   ;;  %s2572_s26 = sphi %s2622_s26, %s2984_s26   ;;  %s2568_s25 = sphi %s2620_s25, %s2983_s25   ;;  %s2564_s24 = sphi %s2618_s24, %s2982_s24  }
   0x3   : > { %s22_s29 = ssub.s32 %s2572_s26, %s2637_s28  ;;  %s25_s30 = sadd.s32 1, %s2568_s25 }
   0x4   : > { %p23_p0 = scmp.eq.s32.totalorder %s22_s29, 0  ;;  %p32_p1 = scmp.ne.s32.totalorder %s2568_s25, %s2564_s24 }
   0x5   : > { %p33_p2 = scmp.eq.s32.totalorder %s2572_s26, 0  ;;  %p1976_p4 = scmp.ge.s32.totalorder %s2572_s26, 14 }
   0x6   : > { %s2646_s8 = scalar_select %p23_p0, %s2568_s25, %s25_s30  }
   0x7   : > { %p34_p3 = por %p33_p2, %p32_p1  ;;  %225 = sbr.rel (%p1976_p4) target bundleno = 21 (0x15), region = 36 }
   0xe   : > { %228 = sbr.rel (!%p34_p3) target bundleno = 21 (0x15), region = 40  ;;  %s230_s9 = sand.u32 (%p34_p3), 1, %s2568_s25  }
   0xf   : > { %s2165_s10 = sshll.u32 (%p34_p3), %s2572_s26, 4  ;;  %s1977_s11 = sshll.u32 (%p34_p3), %s230_s9, 5 }
  0x10   : > { %s235_s14 = scalar_lea.vmem (%p34_p3), %s2974_s0, %s2165_s10  ;;  %s232_s15 = scalar_lea.vmem (%p34_p3), [#allocation3], %s1977_s11 }
  0x11   : > { %v248_v0 = vld [vmem:[%s235_s14] sm:$0xff] (%p34_p3)  ;;  %v250_v1 = vld [vmem:[%s235_s14 + $0x8] sm:$0xff] (%p34_p3) }
  0x12   : > { %v252_v2 = vld [vmem:[%s235_s14 + $0xe0] sm:$0xff] (%p34_p3)  ;;  %249 = vst [vmem:[%s232_s15] sm:$0xff] (%p34_p3), %v248_v0  ;;  %251 = vst [vmem:[%s232_s15 + $0x8] sm:$0xff] (%p34_p3), %v250_v1  ;;  %v254_v3 = vld [vmem:[%s235_s14 + $0xe8] sm:$0xff] (%p34_p3) }
  0x13   : > { %253 = vst [vmem:[%s232_s15 + $0x10] sm:$0xff] (%p34_p3), %v252_v2  ;;  %255 = vst [vmem:[%s232_s15 + $0x18] sm:$0xff] (%p34_p3), %v254_v3 }
  0x15 PF: > { %p1980_p5 = scmp.ge.s32.totalorder %s2572_s26, 1  ;;  %p270_p6 = scmp.lt.s32.totalorder %s2572_s26, 15 }
  0x17   : > { %p271_p7 = pnand %p1980_p5, %p270_p6 }
  0x18   : > { %s277_s16 = sand.u32 (!%p271_p7), 1, %s2564_s24   ;;  %s1982_s17 = sshll.u32 (!%p271_p7), %s2634_s27, 6 }
  0x19   : > { %274 = sbr.rel (%p271_p7) target bundleno = 880 (0x370), region = 67  ;;  %s1981_s18 = sshll.u32 (!%p271_p7), %s277_s16, 5 }
  0x1a   : > { %p311_p8 = scmp.lt.s32.totalorder (!%p271_p7), %s1982_s17, 895  ;;  %s2663_s23 = scalar_lea.vmem (!%p271_p7), [#allocation3], %s1981_s18 }
  0x1b   : > { %p1985_p9 = scmp.ne.s32.totalorder (!%p271_p7), %s2634_s27, 0 }
  0x20   : > { %s2986_s17 = smov (!%p311_p8, %s1982_s17), 895  ;;  %321 = sbr.rel (%p1985_p9) target bundleno = 39 (0x27), region = 75 }
  0x21   : > { %s2166_s19 = sshll.u32 %s2986_s17, 4  ;;  %v2574_v4 = vmov (!%p1985_p9), 0.0  }
  0x22   : > { %s2661_s22 = scalar_lea.vmem %s2975_s1, %s2166_s19  ;;  %322 = vst [vmem:[#allocation2] sm:$0xff] (!%p1985_p9), %v2574_v4  ;;  %323 = vst [vmem:[#allocation2 + $0x8] sm:$0xff] (!%p1985_p9), %v2574_v4 }
  0x23   : > { %324 = vst [vmem:[#allocation2 + $0x10] sm:$0xff] (!%p1985_p9), %v2574_v4  ;;  %325 = vst [vmem:[#allocation2 + $0x18] sm:$0xff] (!%p1985_p9), %v2574_v4 }
  0x24   : > { %326 = vst [vmem:[#allocation2 + $0x20] sm:$0xff] (!%p1985_p9), %v2574_v4  ;;  %327 = vst [vmem:[#allocation2 + $0x28] sm:$0xff] (!%p1985_p9), %v2574_v4 }
  0x25   : > { %328 = vst [vmem:[#allocation2 + $0x30] sm:$0xff] (!%p1985_p9), %v2574_v4  ;;  %329 = vst [vmem:[#allocation2 + $0x38] sm:$0xff] (!%p1985_p9), %v2574_v4 }
  0x27 PF: > { %v2282_v5 = vld [vmem:[%s2661_s22 + $0x4] ss:$16 sps:$4 sm:$0xff]   ;;  %v2284_v6 = vld [vmem:[%s2661_s22 + $0xc] ss:$16 sps:$4 sm:$0xff]   ;;  %v2286_v7 = vld [vmem:[%s2661_s22] ss:$16 sps:$4 sm:$0xff]  }
  0x28   : > { %1130 = vmatprep.subr.bf16.mxu0 %v2282_v5  ;;  %v2287_v8 = vld [vmem:[%s2661_s22 + $0x8] ss:$16 sps:$4 sm:$0xff]   ;;  %1216 = vmatprep.subr.bf16.mxu1 %v2284_v6  ;;  %v2288_v9 = vld [vmem:[%s2661_s22 + $0x24] ss:$16 sps:$4 sm:$0xff]   ;;  %v2290_v10 = vld [vmem:[%s2661_s22 + $0x2c] ss:$16 sps:$4 sm:$0xff]  }
  0x29   : > { %1131 = vmatpush1.bf16.msra.mxu0 %v2286_v7  ;;  %1217 = vmatpush1.bf16.msra.mxu1 %v2287_v8  ;;  %v2292_v11 = vld [vmem:[%s2661_s22 + $0x20] ss:$16 sps:$4 sm:$0xff]   ;;  %v2293_v12 = vld [vmem:[%s2661_s22 + $0x28] ss:$16 sps:$4 sm:$0xff]   ;;  %v2294_v13 = vld [vmem:[%s2661_s22 + $0x44] ss:$16 sps:$4 sm:$0xff]  }
  0x2a   : > { %1132 = vmatprep.subr.bf16.mxu0 %v2288_v9  ;;  %1218 = vmatprep.subr.bf16.mxu1 %v2290_v10  ;;  %v2296_v14 = vld [vmem:[%s2661_s22 + $0x4c] ss:$16 sps:$4 sm:$0xff]   ;;  %v2298_v15 = vld [vmem:[%s2661_s22 + $0x40] ss:$16 sps:$4 sm:$0xff]   ;;  %v2299_v16 = vld [vmem:[%s2661_s22 + $0x48] ss:$16 sps:$4 sm:$0xff]  }
  0x2b   : > { %v2300_v17 = vld [vmem:[%s2661_s22 + $0x64] ss:$16 sps:$4 sm:$0xff]   ;;  %v2302_v18 = vld [vmem:[%s2661_s22 + $0x6c] ss:$16 sps:$4 sm:$0xff]   ;;  %v2304_v19 = vld [vmem:[%s2661_s22 + $0x60] ss:$16 sps:$4 sm:$0xff]  }
  0x2c   : > { %v2305_v20 = vld [vmem:[%s2661_s22 + $0x68] ss:$16 sps:$4 sm:$0xff]   ;;  %v2306_v21 = vld [vmem:[%s2661_s22 + $0x84] ss:$16 sps:$4 sm:$0xff]   ;;  %v2308_v22 = vld [vmem:[%s2661_s22 + $0x8c] ss:$16 sps:$4 sm:$0xff]  }
  0x2d   : > { %1133 = vmatpush1.bf16.msra.mxu0 %v2292_v11  ;;  %1219 = vmatpush1.bf16.msra.mxu1 %v2293_v12  ;;  %v2310_v23 = vld [vmem:[%s2661_s22 + $0x80] ss:$16 sps:$4 sm:$0xff]   ;;  %v2311_v24 = vld [vmem:[%s2661_s22 + $0x88] ss:$16 sps:$4 sm:$0xff]   ;;  %v2312_v25 = vld [vmem:[%s2661_s22 + $0xa4] ss:$16 sps:$4 sm:$0xff]  }
  0x2e   : > { %1134 = vmatprep.subr.bf16.mxu0 %v2294_v13  ;;  %1220 = vmatprep.subr.bf16.mxu1 %v2296_v14  ;;  %v2314_v26 = vld [vmem:[%s2661_s22 + $0xac] ss:$16 sps:$4 sm:$0xff]   ;;  %v2316_v27 = vld [vmem:[%s2661_s22 + $0xa0] ss:$16 sps:$4 sm:$0xff]   ;;  %v2317_v28 = vld [vmem:[%s2661_s22 + $0xa8] ss:$16 sps:$4 sm:$0xff]  }
  0x2f   : > { %v2318_v29 = vld [vmem:[%s2661_s22 + $0xc4] ss:$16 sps:$4 sm:$0xff]   ;;  %v2320_v30 = vld [vmem:[%s2661_s22 + $0xcc] ss:$16 sps:$4 sm:$0xff]   ;;  %v2322_v31 = vld [vmem:[%s2661_s22 + $0xc0] ss:$16 sps:$4 sm:$0xff]  }
  0x30   : > { %v2323_v32 = vld [vmem:[%s2661_s22 + $0xc8] ss:$16 sps:$4 sm:$0xff]   ;;  %v2324_v33 = vld [vmem:[%s2661_s22 + $0xe4] ss:$16 sps:$4 sm:$0xff]   ;;  %v2326_v34 = vld [vmem:[%s2661_s22 + $0xec] ss:$16 sps:$4 sm:$0xff]  }
  0x31   : > { %1135 = vmatpush1.bf16.msra.mxu0 %v2298_v15  ;;  %1221 = vmatpush1.bf16.msra.mxu1 %v2299_v16  ;;  %v2328_v35 = vld [vmem:[%s2661_s22 + $0xe0] ss:$16 sps:$4 sm:$0xff]   ;;  %v2329_v36 = vld [vmem:[%s2661_s22 + $0xe8] ss:$16 sps:$4 sm:$0xff]   ;;  %v2330_v37 = vld [vmem:[%s2661_s22 + $0x104] ss:$16 sps:$4 sm:$0xff]  }
  0x32   : > { %1136 = vmatprep.subr.bf16.mxu0 %v2300_v17  ;;  %1222 = vmatprep.subr.bf16.mxu1 %v2302_v18  ;;  %v2332_v38 = vld [vmem:[%s2661_s22 + $0x10c] ss:$16 sps:$4 sm:$0xff]   ;;  %v2334_v39 = vld [vmem:[%s2661_s22 + $0x100] ss:$16 sps:$4 sm:$0xff]   ;;  %v2335_v40 = vld [vmem:[%s2661_s22 + $0x108] ss:$16 sps:$4 sm:$0xff]  }
  0x33   : > { %v2336_v41 = vld [vmem:[%s2661_s22 + $0x124] ss:$16 sps:$4 sm:$0xff]   ;;  %v2338_v42 = vld [vmem:[%s2661_s22 + $0x12c] ss:$16 sps:$4 sm:$0xff]   ;;  %v2340_v43 = vld [vmem:[%s2661_s22 + $0x120] ss:$16 sps:$4 sm:$0xff]  }
  0x34   : > { %v2341_v44 = vld [vmem:[%s2661_s22 + $0x128] ss:$16 sps:$4 sm:$0xff]   ;;  %v2342_v45 = vld [vmem:[%s2661_s22 + $0x144] ss:$16 sps:$4 sm:$0xff]   ;;  %v2344_v46 = vld [vmem:[%s2661_s22 + $0x14c] ss:$16 sps:$4 sm:$0xff]  }
  0x35   : > { %1137 = vmatpush1.bf16.msra.mxu0 %v2304_v19  ;;  %1223 = vmatpush1.bf16.msra.mxu1 %v2305_v20  ;;  %v2346_v47 = vld [vmem:[%s2661_s22 + $0x140] ss:$16 sps:$4 sm:$0xff]   ;;  %v2347_v48 = vld [vmem:[%s2661_s22 + $0x148] ss:$16 sps:$4 sm:$0xff]   ;;  %v2348_v49 = vld [vmem:[%s2661_s22 + $0x164] ss:$16 sps:$4 sm:$0xff]  }
  0x36   : > { %1138 = vmatprep.subr.bf16.mxu0 %v2306_v21  ;;  %1224 = vmatprep.subr.bf16.mxu1 %v2308_v22  ;;  %v2350_v50 = vld [vmem:[%s2661_s22 + $0x16c] ss:$16 sps:$4 sm:$0xff]   ;;  %v2352_v51 = vld [vmem:[%s2661_s22 + $0x160] ss:$16 sps:$4 sm:$0xff]   ;;  %v2353_v52 = vld [vmem:[%s2661_s22 + $0x168] ss:$16 sps:$4 sm:$0xff]  }
  0x37   : > { %v2380_v53 = vld [vmem:[%s2663_s23 + $0x4] ss:$16 sps:$4 sm:$0xff]   ;;  %v2356_v55 = vld [vmem:[%s2661_s22 + $0x18c] ss:$16 sps:$4 sm:$0xff]   ;;  %v2358_v56 = vld [vmem:[%s2661_s22 + $0x180] ss:$16 sps:$4 sm:$0xff]  }
  0x38   : > { %v2354_v54 = vld [vmem:[%s2661_s22 + $0x184] ss:$16 sps:$4 sm:$0xff]   ;;  %1162 = vmatprep.mubr.bf16.mxu0 %v2380_v53  ;;  %1248 = vmatprep.mubr.bf16.mxu1 %v2380_v53  ;;  %v2359_v57 = vld [vmem:[%s2661_s22 + $0x188] ss:$16 sps:$4 sm:$0xff]   ;;  %v2362_v59 = vld [vmem:[%s2661_s22 + $0x1ac] ss:$16 sps:$4 sm:$0xff]  }
  0x39   : > { %1139 = vmatpush1.bf16.msra.mxu0 %v2310_v23  ;;  %1225 = vmatpush1.bf16.msra.mxu1 %v2311_v24  ;;  %v2360_v58 = vld [vmem:[%s2661_s22 + $0x1a4] ss:$16 sps:$4 sm:$0xff]   ;;  %v2364_v60 = vld [vmem:[%s2661_s22 + $0x1a0] ss:$16 sps:$4 sm:$0xff]   ;;  %v2365_v61 = vld [vmem:[%s2661_s22 + $0x1a8] ss:$16 sps:$4 sm:$0xff]  }
  0x3a   : > { %1140 = vmatprep.subr.bf16.mxu0 %v2312_v25  ;;  %1226 = vmatprep.subr.bf16.mxu1 %v2314_v26  ;;  %v2366_v62 = vld [vmem:[%s2661_s22 + $0x1c4] ss:$16 sps:$4 sm:$0xff]   ;;  %v2368_v63 = vld [vmem:[%s2661_s22 + $0x1cc] ss:$16 sps:$4 sm:$0xff]   ;;  %v2370_v0 = vld [vmem:[%s2661_s22 + $0x1c0] ss:$16 sps:$4 sm:$0xff]  }
  0x3b   : > { %v2371_v1 = vld [vmem:[%s2661_s22 + $0x1c8] ss:$16 sps:$4 sm:$0xff]   ;;  %v2372_v2 = vld [vmem:[%s2661_s22 + $0x1e4] ss:$16 sps:$4 sm:$0xff]   ;;  %v2374_v3 = vld [vmem:[%s2661_s22 + $0x1ec] ss:$16 sps:$4 sm:$0xff]  }
  0x3c   : > { %v2376_v4 = vld [vmem:[%s2661_s22 + $0x1e0] ss:$16 sps:$4 sm:$0xff]   ;;  %v2377_v5 = vld [vmem:[%s2661_s22 + $0x1e8] ss:$16 sps:$4 sm:$0xff]   ;;  %v2383_v6 = vld [vmem:[%s2661_s22 + $0x204] ss:$16 sps:$4 sm:$0xff]  }
  0x3d   : > { %1141 = vmatpush1.bf16.msra.mxu0 %v2316_v27  ;;  %1227 = vmatpush1.bf16.msra.mxu1 %v2317_v28  ;;  %v2386_v7 = vld [vmem:[%s2661_s22 + $0x20c] ss:$16 sps:$4 sm:$0xff]   ;;  %v2378_v8 = vld [vmem:[%s2663_s23] ss:$16 sps:$4 sm:$0xff]   ;;  %v2384_v10 = vld [vmem:[%s2661_s22 + $0x208] ss:$16 sps:$4 sm:$0xff]  }
  0x3e   : > { %1142 = vmatprep.subr.bf16.mxu0 %v2318_v29  ;;  %1228 = vmatprep.subr.bf16.mxu1 %v2320_v30  ;;  %v2381_v9 = vld [vmem:[%s2661_s22 + $0x200] ss:$16 sps:$4 sm:$0xff]   ;;  %v2389_v11 = vld [vmem:[%s2661_s22 + $0x224] ss:$16 sps:$4 sm:$0xff]   ;;  %v2392_v12 = vld [vmem:[%s2661_s22 + $0x22c] ss:$16 sps:$4 sm:$0xff]  }
  0x3f   : > { %v2387_v13 = vld [vmem:[%s2661_s22 + $0x220] ss:$16 sps:$4 sm:$0xff]   ;;  %v2390_v14 = vld [vmem:[%s2661_s22 + $0x228] ss:$16 sps:$4 sm:$0xff]   ;;  %v2395_v15 = vld [vmem:[%s2661_s22 + $0x244] ss:$16 sps:$4 sm:$0xff]  }
  0x40   : > { %v2398_v16 = vld [vmem:[%s2661_s22 + $0x24c] ss:$16 sps:$4 sm:$0xff]   ;;  %v2393_v17 = vld [vmem:[%s2661_s22 + $0x240] ss:$16 sps:$4 sm:$0xff]   ;;  %v2396_v18 = vld [vmem:[%s2661_s22 + $0x248] ss:$16 sps:$4 sm:$0xff]  }
  0x41   : > { %1143 = vmatpush1.bf16.msra.mxu0 %v2322_v31  ;;  %1229 = vmatpush1.bf16.msra.mxu1 %v2323_v32  ;;  %v2401_v19 = vld [vmem:[%s2661_s22 + $0x264] ss:$16 sps:$4 sm:$0xff]   ;;  %v2404_v20 = vld [vmem:[%s2661_s22 + $0x26c] ss:$16 sps:$4 sm:$0xff]   ;;  %v2399_v21 = vld [vmem:[%s2661_s22 + $0x260] ss:$16 sps:$4 sm:$0xff]  }
  0x42   : > { %1144 = vmatprep.subr.bf16.mxu0 %v2324_v33  ;;  %1230 = vmatprep.subr.bf16.mxu1 %v2326_v34  ;;  %v2402_v22 = vld [vmem:[%s2661_s22 + $0x268] ss:$16 sps:$4 sm:$0xff]   ;;  %v2407_v23 = vld [vmem:[%s2661_s22 + $0x284] ss:$16 sps:$4 sm:$0xff]   ;;  %v2410_v24 = vld [vmem:[%s2661_s22 + $0x28c] ss:$16 sps:$4 sm:$0xff]  }
  0x43   : > { %v2405_v25 = vld [vmem:[%s2661_s22 + $0x280] ss:$16 sps:$4 sm:$0xff]   ;;  %v2408_v26 = vld [vmem:[%s2661_s22 + $0x288] ss:$16 sps:$4 sm:$0xff]   ;;  %v2413_v27 = vld [vmem:[%s2661_s22 + $0x2a4] ss:$16 sps:$4 sm:$0xff]  }
  0x44   : > { %v2416_v28 = vld [vmem:[%s2661_s22 + $0x2ac] ss:$16 sps:$4 sm:$0xff]   ;;  %v2411_v29 = vld [vmem:[%s2661_s22 + $0x2a0] ss:$16 sps:$4 sm:$0xff]   ;;  %v2414_v30 = vld [vmem:[%s2661_s22 + $0x2a8] ss:$16 sps:$4 sm:$0xff]  }
  0x45   : > { %1145 = vmatpush1.bf16.msra.mxu0 %v2328_v35  ;;  %1231 = vmatpush1.bf16.msra.mxu1 %v2329_v36  ;;  %v2419_v31 = vld [vmem:[%s2661_s22 + $0x2c4] ss:$16 sps:$4 sm:$0xff]   ;;  %v2422_v32 = vld [vmem:[%s2661_s22 + $0x2cc] ss:$16 sps:$4 sm:$0xff]   ;;  %v2417_v34 = vld [vmem:[%s2661_s22 + $0x2c0] ss:$16 sps:$4 sm:$0xff]  }
  0x46   : > { %1146 = vmatprep.subr.bf16.mxu0 %v2330_v37  ;;  %1232 = vmatprep.subr.bf16.mxu1 %v2332_v38  ;;  %v2479_v33 = vld [vmem:[%s2663_s23 + $0xc] ss:$16 sps:$4 sm:$0xff]   ;;  %v2420_v35 = vld [vmem:[%s2661_s22 + $0x2c8] ss:$16 sps:$4 sm:$0xff]   ;;  %v2425_v36 = vld [vmem:[%s2661_s22 + $0x2e4] ss:$16 sps:$4 sm:$0xff]  }
  0x47   : > { %v2428_v37 = vld [vmem:[%s2661_s22 + $0x2ec] ss:$16 sps:$4 sm:$0xff]   ;;  %v2423_v38 = vld [vmem:[%s2661_s22 + $0x2e0] ss:$16 sps:$4 sm:$0xff]   ;;  %p2118_p10 = scmp.ne.s32.totalorder %s2634_s27, 13 }
  0x48   : > { %v2452_v53 = vld [vmem:[%s2661_s22 + $0x36c] ss:$16 sps:$4 sm:$0xff]   ;;  %vm1511_vm0 = vcmask (!%p2118_p10), 1041409   ;;  %vm2576_vm1 = vmmov (!%p2118_p10), 0  }
  0x49   : > { %1147 = vmatpush1.bf16.msra.mxu0 %v2334_v39  ;;  %1233 = vmatpush1.bf16.msra.mxu1 %v2335_v40  ;;  %v2426_v39 = vld [vmem:[%s2661_s22 + $0x2e8] ss:$16 sps:$4 sm:$0xff]   ;;  %v2431_v40 = vld [vmem:[%s2661_s22 + $0x304] ss:$16 sps:$4 sm:$0xff]  }
  0x4a   : > { %1148 = vmatprep.subr.bf16.mxu0 %v2336_v41  ;;  %1234 = vmatprep.subr.bf16.mxu1 %v2338_v42  ;;  %v2434_v41 = vld [vmem:[%s2661_s22 + $0x30c] ss:$16 sps:$4 sm:$0xff]   ;;  %v2429_v42 = vld [vmem:[%s2661_s22 + $0x300] ss:$16 sps:$4 sm:$0xff]  }
  0x4d   : > { %1149 = vmatpush1.bf16.msra.mxu0 %v2340_v43  ;;  %1235 = vmatpush1.bf16.msra.mxu1 %v2341_v44  ;;  %v2432_v43 = vld [vmem:[%s2661_s22 + $0x308] ss:$16 sps:$4 sm:$0xff]   ;;  %v2437_v44 = vld [vmem:[%s2661_s22 + $0x324] ss:$16 sps:$4 sm:$0xff]  }
  0x4e   : > { %1150 = vmatprep.subr.bf16.mxu0 %v2342_v45  ;;  %1236 = vmatprep.subr.bf16.mxu1 %v2344_v46  ;;  %v2440_v45 = vld [vmem:[%s2661_s22 + $0x32c] ss:$16 sps:$4 sm:$0xff]   ;;  %v2435_v46 = vld [vmem:[%s2661_s22 + $0x320] ss:$16 sps:$4 sm:$0xff]  }
  0x51   : > { %1151 = vmatpush1.bf16.msra.mxu0 %v2346_v47  ;;  %1237 = vmatpush1.bf16.msra.mxu1 %v2347_v48  ;;  %v2438_v47 = vld [vmem:[%s2661_s22 + $0x328] ss:$16 sps:$4 sm:$0xff]   ;;  %v2443_v48 = vld [vmem:[%s2661_s22 + $0x344] ss:$16 sps:$4 sm:$0xff]  }
  0x52   : > { %1152 = vmatprep.subr.bf16.mxu0 %v2348_v49  ;;  %1238 = vmatprep.subr.bf16.mxu1 %v2350_v50  ;;  %v2446_v49 = vld [vmem:[%s2661_s22 + $0x34c] ss:$16 sps:$4 sm:$0xff]   ;;  %v2441_v50 = vld [vmem:[%s2661_s22 + $0x340] ss:$16 sps:$4 sm:$0xff]  }
  0x55   : > { %1153 = vmatpush1.bf16.msra.mxu0 %v2352_v51  ;;  %1239 = vmatpush1.bf16.msra.mxu1 %v2353_v52  ;;  %v2444_v51 = vld [vmem:[%s2661_s22 + $0x348] ss:$16 sps:$4 sm:$0xff]   ;;  %v2449_v52 = vld [vmem:[%s2661_s22 + $0x364] ss:$16 sps:$4 sm:$0xff]  }
  0x56   : > { %1154 = vmatprep.subr.bf16.mxu0 %v2354_v54  ;;  %1240 = vmatprep.subr.bf16.mxu1 %v2356_v55  ;;  %v2447_v54 = vld [vmem:[%s2661_s22 + $0x360] ss:$16 sps:$4 sm:$0xff]   ;;  %v2450_v55 = vld [vmem:[%s2661_s22 + $0x368] ss:$16 sps:$4 sm:$0xff]  }
  0x59   : > { %1155 = vmatpush1.bf16.msra.mxu0 %v2358_v56  ;;  %1241 = vmatpush1.bf16.msra.mxu1 %v2359_v57  ;;  %v2455_v56 = vld [vmem:[%s2661_s22 + $0x384] ss:$16 sps:$4 sm:$0xff]   ;;  %v2458_v57 = vld [vmem:[%s2661_s22 + $0x38c] ss:$16 sps:$4 sm:$0xff]  }
  0x5a   : > { %1156 = vmatprep.subr.bf16.mxu0 %v2360_v58  ;;  %1242 = vmatprep.subr.bf16.mxu1 %v2362_v59  ;;  %v2453_v58 = vld [vmem:[%s2661_s22 + $0x380] ss:$16 sps:$4 sm:$0xff]   ;;  %v2456_v59 = vld [vmem:[%s2661_s22 + $0x388] ss:$16 sps:$4 sm:$0xff]  }
  0x5d   : > { %1157 = vmatpush1.bf16.msra.mxu0 %v2364_v60  ;;  %1243 = vmatpush1.bf16.msra.mxu1 %v2365_v61  ;;  %v2461_v60 = vld [vmem:[%s2661_s22 + $0x3a4] ss:$16 sps:$4 sm:$0xff]   ;;  %v2464_v61 = vld [vmem:[%s2661_s22 + $0x3ac] ss:$16 sps:$4 sm:$0xff]  }
  0x5e   : > { %1158 = vmatprep.subr.bf16.mxu0 %v2366_v62  ;;  %1244 = vmatprep.subr.bf16.mxu1 %v2368_v63  ;;  %v2459_v62 = vld [vmem:[%s2661_s22 + $0x3a0] ss:$16 sps:$4 sm:$0xff]   ;;  %v2462_v63 = vld [vmem:[%s2661_s22 + $0x3a8] ss:$16 sps:$4 sm:$0xff]  }
  0x61   : > { %1159 = vmatpush1.bf16.msra.mxu0 %v2370_v0  ;;  %1245 = vmatpush1.bf16.msra.mxu1 %v2371_v1  ;;  %v2467_v0 = vld [vmem:[%s2661_s22 + $0x3c4] ss:$16 sps:$4 sm:$0xff]   ;;  %v2470_v1 = vld [vmem:[%s2661_s22 + $0x3cc] ss:$16 sps:$4 sm:$0xff]  }
  0x62   : > { %1160 = vmatprep.subr.bf16.mxu0 %v2372_v2  ;;  %1246 = vmatprep.subr.bf16.mxu1 %v2374_v3  ;;  %v2465_v2 = vld [vmem:[%s2661_s22 + $0x3c0] ss:$16 sps:$4 sm:$0xff]   ;;  %v2468_v3 = vld [vmem:[%s2661_s22 + $0x3c8] ss:$16 sps:$4 sm:$0xff]  }
  0x65   : > { %1161 = vmatpush1.bf16.msra.mxu0 %v2376_v4  ;;  %1247 = vmatpush1.bf16.msra.mxu1 %v2377_v5  ;;  %v2473_v4 = vld [vmem:[%s2661_s22 + $0x3e4] ss:$16 sps:$4 sm:$0xff]   ;;  %v2476_v5 = vld [vmem:[%s2661_s22 + $0x3ec] ss:$16 sps:$4 sm:$0xff]  }
  0x66   : > { %1173 = vmatprep.subr.bf16.mxu0 %v2383_v6  ;;  %1259 = vmatprep.subr.bf16.mxu1 %v2386_v7  ;;  %v2471_v6 = vld [vmem:[%s2661_s22 + $0x3e0] ss:$16 sps:$4 sm:$0xff]   ;;  %v2474_v7 = vld [vmem:[%s2661_s22 + $0x3e8] ss:$16 sps:$4 sm:$0xff]  }
  0x68   : > { %1163 = vmatmul.mubr.bf16.vlgmr.msra.gmra.mrb[0].mxu0 %v2378_v8  ;;  %1249 = vmatmul.mubr.bf16.vlgmr.msra.gmra.mrb[0].mxu1 %v2378_v8  ;;  %v2477_v8 = vld [vmem:[%s2663_s23 + $0x8] ss:$16 sps:$4 sm:$0xff]  }
  0x69   : > { %1174 = vmatpush1.bf16.msra.mxu0 %v2381_v9  ;;  %1260 = vmatpush1.bf16.msra.mxu1 %v2384_v10  ;;  %v330_v9 = vld [vmem:[#allocation2] sm:$0xff]  ;;  %v332_v10 = vld [vmem:[#allocation2 + $0x10] sm:$0xff] }
  0x6a   : > { %1175 = vmatprep.subr.bf16.mxu0 %v2389_v11  ;;  %1261 = vmatprep.subr.bf16.mxu1 %v2392_v12  ;;  %v331_v11 = vld [vmem:[#allocation2 + $0x8] sm:$0xff]  ;;  %v333_v12 = vld [vmem:[#allocation2 + $0x18] sm:$0xff] }
  0x6b   : > { %1205 = vmatprep.mubr.bf16.mxu0 %v2479_v33  ;;  %1291 = vmatprep.mubr.bf16.mxu1 %v2479_v33  ;;  %v2480_v33 = vld [vmem:[%s2977_s3 + $0x40] sm:$0xff] (!%p2118_p10)  }
  0x6d   : > { %1176 = vmatpush1.bf16.msra.mxu0 %v2387_v13  ;;  %1262 = vmatpush1.bf16.msra.mxu1 %v2390_v14 }
  0x6e   : > { %1177 = vmatprep.subr.bf16.mxu0 %v2395_v15  ;;  %1263 = vmatprep.subr.bf16.mxu1 %v2398_v16  ;;  %v334_v15 = vld [vmem:[#allocation2 + $0x20] sm:$0xff]  ;;  %v336_v16 = vld [vmem:[#allocation2 + $0x30] sm:$0xff] }
  0x71   : > { %1178 = vmatpush1.bf16.msra.mxu0 %v2393_v17  ;;  %1264 = vmatpush1.bf16.msra.mxu1 %v2396_v18 }
  0x72   : > { %1179 = vmatprep.subr.bf16.mxu0 %v2401_v19  ;;  %1265 = vmatprep.subr.bf16.mxu1 %v2404_v20 }
  0x75   : > { %1180 = vmatpush1.bf16.msra.mxu0 %v2399_v21  ;;  %1266 = vmatpush1.bf16.msra.mxu1 %v2402_v22  ;;  %v335_v21 = vld [vmem:[#allocation2 + $0x28] sm:$0xff]  ;;  %v337_v22 = vld [vmem:[#allocation2 + $0x38] sm:$0xff] }
  0x76   : > { %1181 = vmatprep.subr.bf16.mxu0 %v2407_v23  ;;  %1267 = vmatprep.subr.bf16.mxu1 %v2410_v24 }
  0x79   : > { %1182 = vmatpush1.bf16.msra.mxu0 %v2405_v25  ;;  %1268 = vmatpush1.bf16.msra.mxu1 %v2408_v26 }
  0x7a   : > { %1183 = vmatprep.subr.bf16.mxu0 %v2413_v27  ;;  %1269 = vmatprep.subr.bf16.mxu1 %v2416_v28 }
  0x7d   : > { %1184 = vmatpush1.bf16.msra.mxu0 %v2411_v29  ;;  %1270 = vmatpush1.bf16.msra.mxu1 %v2414_v30 }
  0x7e   : > { %1185 = vmatprep.subr.bf16.mxu0 %v2419_v31  ;;  %1271 = vmatprep.subr.bf16.mxu1 %v2422_v32 }
  0x81   : > { %1186 = vmatpush1.bf16.msra.mxu0 %v2417_v34  ;;  %1272 = vmatpush1.bf16.msra.mxu1 %v2420_v35  ;;  %v2481_v34 = vld [vmem:[%s2977_s3 + $0xc0] sm:$0xff] (!%p2118_p10)  }
  0x82   : > { %1187 = vmatprep.subr.bf16.mxu0 %v2425_v36  ;;  %1273 = vmatprep.subr.bf16.mxu1 %v2428_v37  ;;  %v2482_v35 = vld [vmem:[%s2977_s3] sm:$0xff] (!%p2118_p10)   ;;  %v2484_v37 = vld [vmem:[%s2977_s3 + $0x48] sm:$0xff] (!%p2118_p10)  }
  0x83   : > { %v2483_v36 = vld [vmem:[%s2977_s3 + $0x80] sm:$0xff] (!%p2118_p10)  }
  0x85   : > { %1188 = vmatpush1.bf16.msra.mxu0 %v2423_v38  ;;  %1274 = vmatpush1.bf16.msra.mxu1 %v2426_v39  ;;  %v2485_v38 = vld [vmem:[%s2977_s3 + $0xc8] sm:$0xff] (!%p2118_p10)  }
  0x86   : > { %1189 = vmatprep.subr.bf16.mxu0 %v2431_v40  ;;  %1275 = vmatprep.subr.bf16.mxu1 %v2434_v41  ;;  %v2486_v39 = vld [vmem:[%s2977_s3 + $0x8] sm:$0xff] (!%p2118_p10)   ;;  %v2488_v41 = vld [vmem:[%s2977_s3 + $0x50] sm:$0xff] (!%p2118_p10)  }
  0x87   : > { %v2487_v40 = vld [vmem:[%s2977_s3 + $0x88] sm:$0xff] (!%p2118_p10)  }
  0x89   : > { %1190 = vmatpush1.bf16.msra.mxu0 %v2429_v42  ;;  %1276 = vmatpush1.bf16.msra.mxu1 %v2432_v43  ;;  %v2489_v42 = vld [vmem:[%s2977_s3 + $0xd0] sm:$0xff] (!%p2118_p10)  }
  0x8a   : > { %1191 = vmatprep.subr.bf16.mxu0 %v2437_v44  ;;  %1277 = vmatprep.subr.bf16.mxu1 %v2440_v45  ;;  %v2490_v43 = vld [vmem:[%s2977_s3 + $0x10] sm:$0xff] (!%p2118_p10)   ;;  %v2492_v45 = vld [vmem:[%s2977_s3 + $0x58] sm:$0xff] (!%p2118_p10)  }
  0x8b   : > { %v2491_v44 = vld [vmem:[%s2977_s3 + $0x90] sm:$0xff] (!%p2118_p10)  }
  0x8d   : > { %1192 = vmatpush1.bf16.msra.mxu0 %v2435_v46  ;;  %1278 = vmatpush1.bf16.msra.mxu1 %v2438_v47  ;;  %v2493_v46 = vld [vmem:[%s2977_s3 + $0xd8] sm:$0xff] (!%p2118_p10)  }
  0x8e   : > { %1193 = vmatprep.subr.bf16.mxu0 %v2443_v48  ;;  %1279 = vmatprep.subr.bf16.mxu1 %v2446_v49  ;;  %v2494_v47 = vld [vmem:[%s2977_s3 + $0x18] sm:$0xff] (!%p2118_p10)   ;;  %v2496_v49 = vld [vmem:[%s2977_s3 + $0x60] sm:$0xff] (!%p2118_p10)  }
  0x8f   : > { %v2495_v48 = vld [vmem:[%s2977_s3 + $0x98] sm:$0xff] (!%p2118_p10)  }
  0x91   : > { %1194 = vmatpush1.bf16.msra.mxu0 %v2441_v50  ;;  %1280 = vmatpush1.bf16.msra.mxu1 %v2444_v51  ;;  %v2497_v50 = vld [vmem:[%s2977_s3 + $0xe0] sm:$0xff] (!%p2118_p10)  }
  0x92   : > { %1195 = vmatprep.subr.bf16.mxu0 %v2449_v52  ;;  %1281 = vmatprep.subr.bf16.mxu1 %v2452_v53  ;;  %v2498_v51 = vld [vmem:[%s2977_s3 + $0x20] sm:$0xff] (!%p2118_p10)   ;;  %v1332_v52 = vlaneseq (!%p2118_p10) }
  0x93   : > { %v2499_v53 = vld [vmem:[%s2977_s3 + $0xa0] sm:$0xff] (!%p2118_p10)  }
  0x95   : > { %1196 = vmatpush1.bf16.msra.mxu0 %v2447_v54  ;;  %1282 = vmatpush1.bf16.msra.mxu1 %v2450_v55  ;;  %v2500_v54 = vld [vmem:[%s2977_s3 + $0x68] sm:$0xff] (!%p2118_p10)  }
  0x96   : > { %1197 = vmatprep.subr.bf16.mxu0 %v2455_v56  ;;  %1283 = vmatprep.subr.bf16.mxu1 %v2458_v57  ;;  %v2501_v55 = vld [vmem:[%s2977_s3 + $0xe8] sm:$0xff] (!%p2118_p10)   ;;  %v1333_v57 = vshrl.u32 (!%p2118_p10), %v1332_v52, 7 }
  0x97   : > { %v2502_v56 = vld [vmem:[%s2977_s3 + $0x28] sm:$0xff] (!%p2118_p10)  }
  0x99   : > { %1198 = vmatpush1.bf16.msra.mxu0 %v2453_v58  ;;  %1284 = vmatpush1.bf16.msra.mxu1 %v2456_v59  ;;  %v2503_v58 = vld [vmem:[%s2977_s3 + $0xa8] sm:$0xff] (!%p2118_p10)   ;;  %v2504_v59 = vld [vmem:[%s2977_s3 + $0x70] sm:$0xff] (!%p2118_p10)  }
  0x9a   : > { %1199 = vmatprep.subr.bf16.mxu0 %v2461_v60  ;;  %1285 = vmatprep.subr.bf16.mxu1 %v2464_v61  ;;  %v2505_v60 = vld [vmem:[%s2977_s3 + $0xf0] sm:$0xff] (!%p2118_p10)  }
  0x9b   : > { %v2506_v61 = vld [vmem:[%s2977_s3 + $0x30] sm:$0xff] (!%p2118_p10)  }
  0x9d   : > { %1200 = vmatpush1.bf16.msra.mxu0 %v2459_v62  ;;  %1286 = vmatpush1.bf16.msra.mxu1 %v2462_v63  ;;  %v1338_v62 = vsub.s32 (!%p2118_p10), 1, %v1333_v57  ;;  %v2507_v63 = vld [vmem:[%s2977_s3 + $0xb0] sm:$0xff] (!%p2118_p10)  }
  0x9e   : > { %1201 = vmatprep.subr.bf16.mxu0 %v2467_v0  ;;  %1287 = vmatprep.subr.bf16.mxu1 %v2470_v1  ;;  %v1346_v0 = vsub.s32 (!%p2118_p10), 3, %v1333_v57  ;;  %v2508_v1 = vld [vmem:[%s2977_s3 + $0x78] sm:$0xff] (!%p2118_p10)  }
  0xa1   : > { %1202 = vmatpush1.bf16.msra.mxu0 %v2465_v2  ;;  %1288 = vmatpush1.bf16.msra.mxu1 %v2468_v3  ;;  %v1334_v2 = vsub.s32 (!%p2118_p10), 0, %v1333_v57  ;;  %v2509_v3 = vld [vmem:[%s2977_s3 + $0xf8] sm:$0xff] (!%p2118_p10)  }
  0xa2   : > { %1203 = vmatprep.subr.bf16.mxu0 %v2473_v4  ;;  %1289 = vmatprep.subr.bf16.mxu1 %v2476_v5  ;;  %v1342_v4 = vsub.s32 (!%p2118_p10), 2, %v1333_v57  ;;  %v2510_v5 = vld [vmem:[%s2977_s3 + $0x38] sm:$0xff] (!%p2118_p10)  }
  0xa5   : > { %1204 = vmatpush1.bf16.msra.mxu0 %v2471_v6  ;;  %1290 = vmatpush1.bf16.msra.mxu1 %v2474_v7  ;;  %v2511_v6 = vld [vmem:[%s2977_s3 + $0xb8] sm:$0xff] (!%p2118_p10)  }
  0xa6   : > { %2167 = vmatprep.subr.bf16.mxu0 (!%p2118_p10), %v2480_v33  ;;  %2189 = vmatprep.subr.bf16.mxu1 (!%p2118_p10), %v2481_v34 }
  0xa8   : > { %1206 = vmatmul.mubr.bf16.vlgmr.msra.gmra.mrb[0].mxu0 %v2477_v8  ;;  %1292 = vmatmul.mubr.bf16.vlgmr.msra.gmra.mrb[0].mxu1 %v2477_v8 }
  0xa9   : > { %2168 = vmatpush3.bf16.msra.mxu0 (!%p2118_p10), %v2482_v35  ;;  %2190 = vmatpush3.bf16.msra.mxu1 (!%p2118_p10), %v2483_v36 }
  0xaa   : > { %2169 = vmatprep.subr.bf16.mxu0 (!%p2118_p10), %v2484_v37  ;;  %2191 = vmatprep.subr.bf16.mxu1 (!%p2118_p10), %v2485_v38 }
  0xad   : > { %2170 = vmatpush3.bf16.msra.mxu0 (!%p2118_p10), %v2486_v39  ;;  %2192 = vmatpush3.bf16.msra.mxu1 (!%p2118_p10), %v2487_v40 }
  0xae   : > { %2171 = vmatprep.subr.bf16.mxu0 (!%p2118_p10), %v2488_v41  ;;  %2193 = vmatprep.subr.bf16.mxu1 (!%p2118_p10), %v2489_v42 }
  0xb1   : > { %2172 = vmatpush3.bf16.msra.mxu0 (!%p2118_p10), %v2490_v43  ;;  %2194 = vmatpush3.bf16.msra.mxu1 (!%p2118_p10), %v2491_v44 }
  0xb2   : > { %2173 = vmatprep.subr.bf16.mxu0 (!%p2118_p10), %v2492_v45  ;;  %2195 = vmatprep.subr.bf16.mxu1 (!%p2118_p10), %v2493_v46 }
  0xb5   : > { %2174 = vmatpush3.bf16.msra.mxu0 (!%p2118_p10), %v2494_v47  ;;  %2196 = vmatpush3.bf16.msra.mxu1 (!%p2118_p10), %v2495_v48 }
  0xb6   : > { %2175 = vmatprep.subr.bf16.mxu0 (!%p2118_p10), %v2496_v49  ;;  %2197 = vmatprep.subr.bf16.mxu1 (!%p2118_p10), %v2497_v50 }
  0xb9   : > { %2176 = vmatpush3.bf16.msra.mxu0 (!%p2118_p10), %v2498_v51  ;;  %2198 = vmatpush3.bf16.msra.mxu1 (!%p2118_p10), %v2499_v53 }
  0xba   : > { %2177 = vmatprep.subr.bf16.mxu0 (!%p2118_p10), %v2500_v54  ;;  %2199 = vmatprep.subr.bf16.mxu1 (!%p2118_p10), %v2501_v55 }
  0xbd   : > { %2178 = vmatpush3.bf16.msra.mxu0 (!%p2118_p10), %v2502_v56  ;;  %2200 = vmatpush3.bf16.msra.mxu1 (!%p2118_p10), %v2503_v58 }
  0xbe   : > { %2179 = vmatprep.subr.bf16.mxu0 (!%p2118_p10), %v2504_v59  ;;  %2201 = vmatprep.subr.bf16.mxu1 (!%p2118_p10), %v2505_v60 }
  0xc1   : > { %2180 = vmatpush3.bf16.msra.mxu0 (!%p2118_p10), %v2506_v61  ;;  %2202 = vmatpush3.bf16.msra.mxu1 (!%p2118_p10), %v2507_v63 }
  0xc2   : > { %2181 = vmatprep.subr.bf16.mxu0 (!%p2118_p10), %v2508_v1  ;;  %2203 = vmatprep.subr.bf16.mxu1 (!%p2118_p10), %v2509_v3 }
  0xc5   : > { %2182 = vmatpush3.bf16.msra.mxu0 (!%p2118_p10), %v2510_v5  ;;  %2204 = vmatpush3.bf16.msra.mxu1 (!%p2118_p10), %v2511_v6 }
 0x17b   : > { %v1207_v13 = vpop.f32.mrb[0].mxu0  ;;  %v1293_v14 = vpop.f32.mrb[0].mxu1  ;;  %1321 = sbr.rel (%p2118_p10) target bundleno = 855 (0x357), region = 79 }
 0x17c   : > { %v1302_v17 = vadd.f32 %v1207_v13, %v330_v9  ;;  %v1304_v18 = vadd.f32 %v1293_v14, %v332_v10  ;;  %v1209_v19 = vpop.f32.mrb[1].mxu0  ;;  %v1295_v20 = vpop.f32.mrb[1].mxu1  ;;  %v1330_v9 = vld [vmem:[%s2976_s2] sm:$0xf] (!%p2118_p10) }
 0x17d   : > { %v1303_v23 = vadd.f32 %v1209_v19, %v331_v11  ;;  %v1305_v24 = vadd.f32 %v1295_v20, %v333_v12  ;;  %v1211_v25 = vpop.f32.mrb[2].mxu0  ;;  %v1297_v26 = vpop.f32.mrb[2].mxu1  ;;  %v1339_v10 = vrot.slane (!%p2118_p10), %v1330_v9, %v1338_v62  ;;  %v1347_v13 = vrot.slane (!%p2118_p10), %v1330_v9, %v1346_v0 }
 0x17e   : > { %1310 = vst [vmem:[#allocation2] sm:$0xff] %v1302_v17  ;;  %1312 = vst [vmem:[#allocation2 + $0x10] sm:$0xff] %v1304_v18  ;;  %v1306_v27 = vadd.f32 %v1211_v25, %v334_v15  ;;  %v1308_v28 = vadd.f32 %v1297_v26, %v336_v16  ;;  %v1213_v29 = vpop.f32.mrb[3].mxu0  ;;  %v1299_v30 = vpop.f32.mrb[3].mxu1  ;;  %v1335_v15 = vrot.slane (!%p2118_p10), %v1330_v9, %v1334_v2  ;;  %v2575_v20 = vmov (!%p2118_p10), 0.0  }
 0x17f   : > { %1311 = vst [vmem:[#allocation2 + $0x8] sm:$0xff] %v1303_v23  ;;  %1313 = vst [vmem:[#allocation2 + $0x18] sm:$0xff] %v1305_v24  ;;  %v1307_v31 = vadd.f32 %v1213_v29, %v335_v21  ;;  %v1309_v32 = vadd.f32 %v1299_v30, %v337_v22  ;;  %v1343_v16 = vrot.slane (!%p2118_p10), %v1330_v9, %v1342_v4  ;;  %2220 = vmatprep.subr.bf16.mxu0 (!%p2118_p10), %v2575_v20 }
 0x180   : > { %1314 = vst [vmem:[#allocation2 + $0x20] sm:$0xff] %v1306_v27  ;;  %1316 = vst [vmem:[#allocation2 + $0x30] sm:$0xff] %v1308_v28 }
 0x181   : > { %1315 = vst [vmem:[#allocation2 + $0x28] sm:$0xff] %v1307_v31  ;;  %1317 = vst [vmem:[#allocation2 + $0x38] sm:$0xff] %v1309_v32 }
 0x185   : > { %v1322_v14 = vld [vmem:[#allocation2] sm:$0xff]  ;;  %v1324_v18 = vld [vmem:[#allocation2 + $0x10] sm:$0xff] }
 0x186   : > { %v1323_v7 = vld [vmem:[#allocation2 + $0x8] sm:$0xff]  ;;  %v1325_v11 = vld [vmem:[#allocation2 + $0x18] sm:$0xff]  ;;  %v1352_v25 = vadd.f32 %v1335_v15, %v1322_v14  ;;  %v1354_v27 = vadd.f32 %v1343_v16, %v1324_v18 }
 0x187   : > { %v1326_v17 = vld [vmem:[#allocation2 + $0x20] sm:$0xff]  ;;  %v1328_v19 = vld [vmem:[#allocation2 + $0x30] sm:$0xff]  ;;  %v1353_v21 = vadd.f32 %v1339_v10, %v1323_v7  ;;  %v1355_v23 = vadd.f32 %v1347_v13, %v1325_v11 }
 0x188   : > { %v1327_v8 = vld [vmem:[#allocation2 + $0x28] sm:$0xff]  ;;  %v1329_v12 = vld [vmem:[#allocation2 + $0x38] sm:$0xff]  ;;  %v1356_v26 = vadd.f32 %v1335_v15, %v1326_v17  ;;  %v1358_v28 = vadd.f32 %v1343_v16, %v1328_v19  ;;  %v1360_v33 = vmax.f32 %v1352_v25, 0.0  ;;  %v1362_v35 = vmax.f32 %v1354_v27, 0.0 }
 0x189   : > { %v1357_v22 = vadd.f32 %v1339_v10, %v1327_v8  ;;  %v1359_v24 = vadd.f32 %v1347_v13, %v1329_v12  ;;  %v1361_v29 = vmax.f32 %v1353_v21, 0.0  ;;  %v1363_v31 = vmax.f32 %v1355_v23, 0.0 }
 0x18a   : > { %v1364_v34 = vmax.f32 %v1356_v26, 0.0  ;;  %v1366_v36 = vmax.f32 %v1358_v28, 0.0  ;;  %v1368_v41 = vrot.slane %v1360_v33, 4  ;;  %v1380_v43 = vrot.slane %v1362_v35, 4 }
 0x18b   : > { %v1365_v30 = vmax.f32 %v1357_v22, 0.0  ;;  %v1367_v32 = vmax.f32 %v1359_v24, 0.0  ;;  %v1374_v37 = vrot.slane %v1361_v29, 4  ;;  %v1386_v39 = vrot.slane %v1363_v31, 4 }
 0x18c   : > { %v1392_v42 = vrot.slane %v1364_v34, 4  ;;  %v1404_v44 = vrot.slane %v1366_v36, 4  ;;  %v1369_v49 = vmax.f32 %v1360_v33, %v1368_v41  ;;  %v1381_v51 = vmax.f32 %v1362_v35, %v1380_v43 }
 0x18d   : > { %v1398_v38 = vrot.slane %v1365_v30, 4  ;;  %v1410_v40 = vrot.slane %v1367_v32, 4  ;;  %v1375_v45 = vmax.f32 %v1361_v29, %v1374_v37  ;;  %v1387_v47 = vmax.f32 %v1363_v31, %v1386_v39 }
 0x18e   : > { %v1393_v50 = vmax.f32 %v1364_v34, %v1392_v42  ;;  %v1405_v52 = vmax.f32 %v1366_v36, %v1404_v44  ;;  %v1370_v57 = vrot.slane %v1369_v49, 2  ;;  %v1382_v59 = vrot.slane %v1381_v51, 2  ;;  %v2512_v44 = vld [vmem:[%s2979_s5] sm:$0xff]  }
 0x18f   : > { %v1399_v46 = vmax.f32 %v1365_v30, %v1398_v38  ;;  %v1411_v48 = vmax.f32 %v1367_v32, %v1410_v40  ;;  %v1376_v53 = vrot.slane %v1375_v45, 2  ;;  %v1388_v55 = vrot.slane %v1387_v47, 2 }
 0x190   : > { %v1394_v58 = vrot.slane %v1393_v50, 2  ;;  %v1406_v60 = vrot.slane %v1405_v52, 2  ;;  %v1371_v1 = vmax.f32 %v1369_v49, %v1370_v57  ;;  %v1383_v3 = vmax.f32 %v1381_v51, %v1382_v59  ;;  %v2515_v49 = vld [vmem:[%s2979_s5 + $0x18] sm:$0xff]   ;;  %v2517_v51 = vld [vmem:[%s2979_s5 + $0x28] sm:$0xff]  }
 0x191   : > { %v1400_v54 = vrot.slane %v1399_v46, 2  ;;  %v1412_v56 = vrot.slane %v1411_v48, 2  ;;  %v1377_v61 = vmax.f32 %v1375_v45, %v1376_v53  ;;  %v1389_v63 = vmax.f32 %v1387_v47, %v1388_v55  ;;  %v2513_v47 = vld [vmem:[%s2979_s5 + $0x8] sm:$0xff]   ;;  %v2519_v53 = vld [vmem:[%s2979_s5 + $0x38] sm:$0xff]  }
 0x192   : > { %v1395_v2 = vmax.f32 %v1393_v50, %v1394_v58  ;;  %v1407_v4 = vmax.f32 %v1405_v52, %v1406_v60  ;;  %v1372_v9 = vrot.slane %v1371_v1, 1  ;;  %v1384_v11 = vrot.slane %v1383_v3, 1  ;;  %v2516_v50 = vld [vmem:[%s2979_s5 + $0x20] sm:$0xff]   ;;  %v2518_v52 = vld [vmem:[%s2979_s5 + $0x30] sm:$0xff]  }
 0x193   : > { %v1401_v62 = vmax.f32 %v1399_v46, %v1400_v54  ;;  %v1413_v0 = vmax.f32 %v1411_v48, %v1412_v56  ;;  %v1378_v5 = vrot.slane %v1377_v61, 1  ;;  %v1390_v7 = vrot.slane %v1389_v63, 1  ;;  %v2514_v48 = vld [vmem:[%s2979_s5 + $0x10] sm:$0xff]   ;;  %v2119_v56 = vld [vmem:[%s2978_s4] ss:$0 sm:$0xff] }
 0x194   : > { %v1396_v10 = vrot.slane %v1395_v2, 1  ;;  %v1408_v12 = vrot.slane %v1407_v4, 1  ;;  %v1373_v17 = vmax.f32 %v1371_v1, %v1372_v9  ;;  %v1385_v19 = vmax.f32 %v1383_v3, %v1384_v11 }
 0x195   : > { %v1402_v6 = vrot.slane %v1401_v62, 1  ;;  %v1414_v8 = vrot.slane %v1413_v0, 1  ;;  %v1379_v13 = vmax.f32 %v1377_v61, %v1378_v5  ;;  %v1391_v15 = vmax.f32 %v1389_v63, %v1390_v7 }
 0x196   : > { %v1397_v18 = vmax.f32 %v1395_v2, %v1396_v10  ;;  %v1409_v21 = vmax.f32 %v1407_v4, %v1408_v12  ;;  %v1416_v26 = vpack.c.bf16 %v1373_v17, %v1373_v17  ;;  %v1418_v28 = vpack.c.bf16 %v1385_v19, %v1385_v19 }
 0x197   : > { %v1403_v14 = vmax.f32 %v1401_v62, %v1402_v6  ;;  %v1415_v16 = vmax.f32 %v1413_v0, %v1414_v8  ;;  %v1417_v22 = vpack.c.bf16 %v1379_v13, %v1379_v13  ;;  %v1419_v24 = vpack.c.bf16 %v1391_v15, %v1391_v15 }
 0x198   : > { %v1420_v27 = vpack.c.bf16 %v1397_v18, %v1397_v18  ;;  %v1422_v29 = vpack.c.bf16 %v1409_v21, %v1409_v21  ;;  %v1503_v34 = vunpack.c.l.b16 %v1416_v26  ;;  %v1505_v36 = vunpack.c.l.b16 %v1418_v28 }
 0x199   : > { %v1421_v23 = vpack.c.bf16 %v1403_v14, %v1403_v14  ;;  %v1423_v25 = vpack.c.bf16 %v1415_v16, %v1415_v16  ;;  %v1504_v30 = vunpack.c.l.b16 %v1417_v22  ;;  %v1506_v32 = vunpack.c.l.b16 %v1419_v24 }
 0x19a   : > { %v1507_v35 = vunpack.c.l.b16 %v1420_v27  ;;  %v1509_v37 = vunpack.c.l.b16 %v1422_v29 }
 0x19b   : > { %v1508_v31 = vunpack.c.l.b16 %v1421_v23  ;;  %v1510_v33 = vunpack.c.l.b16 %v1423_v25 }
 0x19c   : > { %v1512_v42 = vsel %vm1511_vm0, %v1507_v35, %v1503_v34  ;;  %v1514_v43 = vsel %vm1511_vm0, %v1509_v37, %v1505_v36 }
 0x19d   : > { %v1513_v38 = vsel %vm1511_vm0, %v1508_v31, %v1504_v30  ;;  %v1515_v39 = vsel %vm1511_vm0, %v1510_v33, %v1506_v32  ;;  %v1516_v45 = vpack.c.b16 %v1512_v42, %v1512_v42  ;;  %v1518_v46 = vpack.c.b16 %v1514_v43, %v1514_v43 }
 0x19e   : > { %v1517_v40 = vpack.c.b16 %v1513_v38, %v1513_v38  ;;  %v1519_v41 = vpack.c.b16 %v1515_v39, %v1515_v39 }
 0x1a0   : > { %1748 = vmatprep.mubr.bf16.mxu0 %v1517_v40  ;;  %1788 = vmatprep.mubr.bf16.mxu1 %v1519_v41 }
 0x1a1   : > { %1749 = vmatmul.mubr.bf16.vlgmr.msra.gmra.mrb[0].mxu0 %v1516_v45  ;;  %1789 = vmatmul.mubr.bf16.vlgmr.msra.gmra.mrb[0].mxu1 %v1518_v46 }
 0x1a2   : > { %2221 = vmatpush3.bf16.msra.mxu0 %v2512_v44  ;;  %2236 = vmatprep.mubr.msk.bf16.mxu0 %vm2576_vm1, %v2575_v20 }
 0x1a3   : > { %2222 = vmatprep.subr.bf16.mxu0 %v2575_v20 }
 0x1a6   : > { %2223 = vmatpush3.bf16.msra.mxu0 %v2513_v47 }
 0x1a7   : > { %2224 = vmatprep.subr.bf16.mxu0 %v2575_v20 }
 0x1aa   : > { %2225 = vmatpush3.bf16.msra.mxu0 %v2514_v48 }
 0x1ab   : > { %2226 = vmatprep.subr.bf16.mxu0 %v2575_v20 }
 0x1ae   : > { %2227 = vmatpush3.bf16.msra.mxu0 %v2515_v49 }
 0x1af   : > { %2228 = vmatprep.subr.bf16.mxu0 %v2575_v20 }
 0x1b2   : > { %2229 = vmatpush3.bf16.msra.mxu0 %v2516_v50 }
 0x1b3   : > { %2230 = vmatprep.subr.bf16.mxu0 %v2575_v20 }
 0x1b6   : > { %2231 = vmatpush3.bf16.msra.mxu0 %v2517_v51 }
 0x1b7   : > { %2232 = vmatprep.subr.bf16.mxu0 %v2575_v20 }
 0x1ba   : > { %2233 = vmatpush3.bf16.msra.mxu0 %v2518_v52 }
 0x1bb   : > { %2234 = vmatprep.subr.bf16.mxu0 %v2575_v20  ;;  %v2152_v20 = vld [vmem:[%s2980_s6] ss:$0 sm:$0xff] }
 0x1be   : > { %2235 = vmatpush3.bf16.msra.mxu0 %v2519_v53 }
 0x274   : > { %v2183_v54 = vpop.f32.mrb[0].mxu0  ;;  %v2205_v55 = vpop.f32.mrb[0].mxu1 }
 0x275   : > { %v2184_v57 = vpop.f32.mrb[1].mxu0  ;;  %v2206_v58 = vpop.f32.mrb[1].mxu1 }
 0x276   : > { %v2185_v59 = vadd.f32 %v2184_v57, %v2183_v54  ;;  %v2207_v60 = vadd.f32 %v2206_v58, %v2205_v55  ;;  %v2186_v61 = vpop.f32.mrb[2].mxu0  ;;  %v2208_v62 = vpop.f32.mrb[2].mxu1 }
 0x277   : > { %v2187_v63 = vpop.f32.mrb[3].mxu0  ;;  %v2209_v0 = vpop.f32.mrb[3].mxu1 }
 0x278   : > { %v1751_v1 = vadd.f32 %v2185_v59, %v2119_v56 }
 0x27a   : > { %v1791_v2 = vadd.f32 %v2207_v60, %v1751_v1 }
 0x27c   : > { %v1796_v3 = vmax.f32 %v1791_v2, 0.0 }
 0x27e   : > { %v1797_v4 = vpack.c.bf16 %v1796_v3, %v1796_v3 }
 0x280   : > { %2237 = vmatmul.mubr.bf16.vlgmr.msra.gmra.mrb[4].mxu0 %v1797_v4 }
 0x353   : > { %v1903_v5 = vpop.f32.mrb[4].mxu0 }
 0x354   : > { %v1904_v6 = vadd.f32 %v2152_v20, %v1903_v5  ;;  %v2238_v7 = vpop.f32.mrb[5].mxu0 }
 0x355   : > { %v1906_v8 = vpop.f32.mrb[6].mxu0 }
 0x356   : > { %1909 = vst [vmem:[#allocation4] sm:$0x3] %v1904_v6  ;;  %v2239_v9 = vpop.f32.mrb[7].mxu0 }
 0x357 PF: > { %p2252_p11 = scmp.eq.s32.totalorder %s2634_s27, 13  ;;  %s2577_s15 = smov [#allocation4]  }
 0x358   : > { %s1917_s16 = sshll.u32 %s2577_s15, 4  ;;  %s1918_s16 = int_to_ptr.vmem [resolvable:$true] %s1917_s16 }
 0x359   : > { %s2520_s17 = scalar_lea.vmem %s1918_s16, 32  ;;  %p2527_p1 = scmp.lt.s32.totalorder %s1918_s16, %s1918_s16 }
 0x35a   : > { %p2521_p12 = scmp.ne.s32.totalorder %s1918_s16, %s2520_s17  ;;  %p2528_p2 = scmp.lt.s32.totalorder %s2520_s17, %s2520_s17 }
 0x35c   : > { %p2522_p13 = pnand %p2521_p12, %p2252_p11  ;;  %p2529_p3 = por %p2528_p2, %p2527_p1 }
 0x35e   : > { %p2523_p0 = pneg %p2522_p13 }
 0x360   : > { %p2530_p4 = pnand %p2529_p3, %p2523_p0 }
 0x362   : > { %2533 = shalt.err (!%p2530_p4)
}
 0x363   : > { %s2534_s20 = scalar_lea.hbm %s2981_s7, 32 }
 0x364   : > { %p2535_p5 = scmp.ne.s32.totalorder %s2981_s7, %s2534_s20  ;;  %p2540_p8 = scmp.lt.u32.totalorder %s2534_s20, %s2981_s7 }
 0x366   : > { %p2536_p6 = pnand %p2535_p5, %p2252_p11 }
 0x368   : > { %p2537_p7 = pneg %p2536_p6 }
 0x36a   : > { %p2542_p9 = pnand %p2540_p8, %p2537_p7 }
 0x36c   : > { %2545 = shalt.err (!%p2542_p9)
}
 0x36d   : > { %2249 = dma.vmem_to_hbm [thread:$0]  (%p2252_p11), %s1918_s16, 32, %s2981_s7, [#allocation5]  }
 0x36e   : > { %2559 = dma.done.wait (%p2252_p11), [#allocation5], 32  }
 0x36f   : > { %2561 = vsyncadd (%p2252_p11), [#allocation5], 4294967264 }
 0x370 PF: > { %p15_p10 = scmp.ge.s32.totalorder %s2637_s28, 16   ;;  %s2982_s24 = smov %s2568_s25 }
 0x371   : > { %s2983_s25 = smov %s2646_s8  ;;  %s2984_s26 = smov %s2637_s28 }
 0x372   :  { %17 = sbr.rel (!%p15_p10) target bundleno = 2 (0x2), region = 114 }
 0x379   :  { %1930 = vsyncpa [#allocation5], 1 }
 0x37a   :  { %1932 = vsyncpa [#allocation5 + $0x1], 1 }

</bundles_post_ra>
